<compile_context>
chip_gen: v6e
topology: v6e:2x2x1
jax: 0.10.0
libtpu: 0.0.40
codegen_flags: <defaults>
</compile_context>

<pallas_src>
import jax
import jax.numpy as jnp
from jax.experimental import pallas as pl
from jax.experimental.pallas import tpu as pltpu


def _round_up(x, m):
    return (x + m - 1) // m * m


def _lstm_double_att_kernel(
    # per-tile data
    x_ref, att_ref, st0_ref,
    # attention weights (wrapper-preprocessed, lane-dense layouts)
    a2a_bd_ref, a2a_bias_ref,
    h2a_w_ref, h2a_b_ref, d2d_bd_ref,
    h2a1_w_ref, h2a1_b_ref, d2d1_bd_ref,
    exp_w_ref, seg_sum_ref,
    res_sc_ref, res_sh_ref, res1_sc_ref, res1_sh_ref,
    # gate + projection weights
    wi_ref, wh_ref, wa_ref, gate_b_ref,
    proj_w_ref, proj_b_ref,
    # outputs
    st_out_ref, logp_ref,
):
    bt = x_ref.shape[0]
    AR = att_ref.shape[1]
    R = seg_sum_ref.shape[1]
    A = AR // R
    AA = A * A
    L = st0_ref.shape[1] // (2 * R)
    G = wi_ref.shape[1]
    PR = G // 4
    P = PR // R

    # ---- hoist all weight loads out of the (statically unrolled) layer loop ----
    a2a_bd = a2a_bd_ref[...]
    a2a_bias = a2a_bias_ref[...]
    h2a_w = h2a_w_ref[...]
    h2a_b = h2a_b_ref[...]
    d2d_bd = d2d_bd_ref[...]
    h2a1_w = h2a1_w_ref[...]
    h2a1_b = h2a1_b_ref[...]
    d2d1_bd = d2d1_bd_ref[...]
    exp_w = exp_w_ref[...]
    seg_sum = seg_sum_ref[...]
    res_sc = res_sc_ref[...]
    res_sh = res_sh_ref[...]
    res1_sc = res1_sc_ref[...]
    res1_sh = res1_sh_ref[...]
    wi = wi_ref[...]
    wh = wh_ref[...]
    wa = wa_ref[...]
    gate_b = gate_b_ref[...]
    proj_w = proj_w_ref[...]
    proj_b = proj_b_ref[...]

    att_bf = att_ref[...]                    # (BT, A*R) bf16 -- only att copy

    # a2a / a2a1 fused into a single block-diagonal matmul; output is already
    # lane-dense (BT, 2*A*A).  Depends only on `att` -> hoisted above the loop.
    att_vv = jax.nn.relu(
        jnp.dot(att_bf, a2a_bd, preferred_element_type=jnp.float32) + a2a_bias)
    att_v = att_vv[:, :AA]
    att_v1 = att_vv[:, AA:]

    st0 = st0_ref[...]
    # x @ Wi + gate bias hoisted out of the layer loop (xt@Wi = x@Wi + prev_top@Wi)
    gx = jnp.dot(x_ref[...], wi, preferred_element_type=jnp.float32) + gate_b

    def soft_attention(h, h2a_wx, h2a_bx, att_vx, d2d_bdx, bn_sc, bn_sh):
        # h2a (+ folded BN) with the A->A*A expansion folded into the weights:
        # result is directly the (BT, A*A) lane-dense layout of the tanh block.
        att_h = jax.nn.relu(
            jnp.dot(h, h2a_wx, preferred_element_type=jnp.float32) + h2a_bx)
        dot3 = jnp.tanh(att_vx + att_h)                  # dense 256-lane tanh
        # d2d reduction as block-diag matmul (bias dropped: softmax-invariant)
        score = jnp.dot(dot3, d2d_bdx, preferred_element_type=jnp.float32)
        m = jnp.max(score, axis=-1, keepdims=True)
        e = jnp.exp(score - m)
        inv = pl.reciprocal(jnp.sum(e, axis=-1, keepdims=True), approx=True)
        w = e * inv                                      # softmax over A positions
        # weighted sum of att values with no 3-D relayouts:
        #   w_rep[b, a*R + r] = w[b, a] ; res[b, r] = sum_a w[b,a] * att[b,a,r]
        w_rep = jnp.dot(w, exp_w, preferred_element_type=jnp.float32)
        prod = w_rep * att_bf.astype(jnp.float32)
        res = jnp.dot(prod, seg_sum, preferred_element_type=jnp.float32)
        return jax.nn.relu(res * bn_sc + bn_sh)          # folded bn_res + relu

    pieces = []
    prev_top = None
    inv_p = jnp.float32(1.0 / P)
    for layer in range(L):                               # static unroll
        prev_c = st0[:, (2 * layer) * R:(2 * layer + 1) * R]
        prev_h = st0[:, (2 * layer + 1) * R:(2 * layer + 2) * R]

        # ---- first (pre) attention on prev_h ----
        att_res = soft_attention(prev_h, h2a_w, h2a_b, att_v, d2d_bd,
                                 res_sc, res_sh)

        # ---- gate pre-activations for all P parallel cells (bf16 MXU) ----
        gates = (gx
                 + jnp.dot(prev_h.astype(jnp.bfloat16), wh,
                           preferred_element_type=jnp.float32)
                 + jnp.dot(att_res.astype(jnp.bfloat16), wa,
                           preferred_element_type=jnp.float32))
        if layer > 0:
            gates = gates + jnp.dot(prev_top.astype(jnp.bfloat16), wi,
                                    preferred_element_type=jnp.float32)

        # column order: [in all P | forget all P | out all P | cand all P]
        sig = jax.nn.sigmoid(gates[:, :3 * PR])          # one wide sigmoid
        cand = jnp.tanh(gates[:, 3 * PR:])               # one wide tanh
        in_g = sig[:, :PR]
        f_g = sig[:, PR:2 * PR]
        o_g = sig[:, 2 * PR:]
        prev_c_t = prev_c if P == 1 else jnp.concatenate([prev_c] * P, axis=-1)
        c_all = f_g * prev_c_t + in_g * cand             # (BT, P*R)
        h_all = o_g * jnp.tanh(c_all)
        next_c = c_all[:, :R]
        next_h = h_all[:, :R]
        for j in range(1, P):
            next_c = next_c + c_all[:, j * R:(j + 1) * R]
            next_h = next_h + h_all[:, j * R:(j + 1) * R]
        next_c = next_c * inv_p                          # mean over parallels
        next_h = next_h * inv_p

        # ---- second (post) attention on next_h ----
        att_res1 = soft_attention(next_h, h2a1_w, h2a1_b, att_v1, d2d1_bd,
                                  res1_sc, res1_sh)
        top_h = att_res1 + next_h

        pieces += [next_c, top_h]
        prev_top = top_h

    # ---- single lane-dense packed state store ----
    s_real = 2 * L * R
    s_pad = st_out_ref.shape[1]
    if s_pad > s_real:
        pieces.append(jnp.zeros((bt, s_pad - s_real), jnp.float32))
    st_out_ref[...] = jnp.concatenate(pieces, axis=-1)

    # ---- projection + log_softmax (pad columns carry a -1e30 bias -> exp==0) ----
    logits = jnp.dot(prev_top.astype(jnp.bfloat16), proj_w,
                     preferred_element_type=jnp.float32) + proj_b
    m = jnp.max(logits, axis=-1, keepdims=True)
    lse = m + jnp.log(jnp.sum(jnp.exp(logits - m), axis=-1, keepdims=True))
    logp_ref[...] = logits - lse


def lstm_double_att_stack(x, att, prev_c, prev_h, params, dropout=0.0,
                          block_b=None):
    assert dropout == 0.0  # TODO(synk): F.dropout path not implemented
    B, input_size = x.shape
    L, _, R = prev_c.shape
    A = att.shape[1]
    P = params['i2h_w'].shape[0]
    out_size = params['proj_w'].shape[0]
    eps = 1e-5
    if L > 1:
        assert input_size == R, "layers > 0 add rnn_size activations to x"

    G = 4 * P * R
    PR = P * R
    AA = A * A
    AR = A * R
    s_real = 2 * L * R
    s_pad = _round_up(s_real, 128)
    out_pad = _round_up(out_size, 128)
    f32, bf16 = jnp.float32, jnp.bfloat16

    # ---- eval-mode BatchNorm -> affine scale / shift ----
    def bn_fold(name):
        sc = params[name + '_g'] / jnp.sqrt(params[name + '_v'] + eps)
        sh = params[name + '_b'] - params[name + '_m'] * sc
        return sc, sh

    h2a_sc, h2a_sh = bn_fold('bn_h2a')
    h2a1_sc, h2a1_sh = bn_fold('bn_h2a1')
    res_sc, res_sh = bn_fold('bn_res')
    res1_sc, res1_sh = bn_fold('bn_res1')

    # fold bn_h2a / bn_h2a1 into h2a / h2a1 (exact in eval mode), then expand
    # the A outputs to A*A lane-dense columns (column a repeated A times).
    def h2a_expand(wname, bname, sc, sh):
        w = (params[wname] * sc[:, None]).T              # (R, A)
        b = params[bname] * sc + sh                      # (A,)
        return (jnp.repeat(w, A, axis=1).astype(f32),    # (R, A*A)
                jnp.repeat(b, A).reshape(1, -1).astype(f32))

    h2a_w_rep, h2a_b_rep = h2a_expand('h2a_w', 'h2a_b', h2a_sc, h2a_sh)
    h2a1_w_rep, h2a1_b_rep = h2a_expand('h2a1_w', 'h2a1_b', h2a1_sc, h2a1_sh)

    # a2a / a2a1 as one block-diagonal matmul: (BT, A*R) @ (A*R, 2*A*A)
    eye_a = jnp.eye(A, dtype=f32)
    a2a_bd = jnp.concatenate(
        [jnp.kron(eye_a, params['a2a_w'].T.astype(f32)),
         jnp.kron(eye_a, params['a2a1_w'].T.astype(f32))], axis=1).astype(bf16)
    a2a_bias = jnp.concatenate(
        [jnp.tile(params['a2a_b'], A),
         jnp.tile(params['a2a1_b'], A)], axis=0).reshape(1, -1).astype(f32)

    # d2d / d2d1 reductions as block-diagonal (A*A, A) matrices (bias dropped:
    # a per-row constant shift is softmax-invariant, so this is exact).
    d2d_bd = jnp.kron(eye_a, params['d2d_w'].T.astype(f32))
    d2d1_bd = jnp.kron(eye_a, params['d2d1_w'].T.astype(f32))

    # constant matrices for the attention weighted sum (no 3-D relayouts):
    exp_w = jnp.kron(eye_a, jnp.ones((1, R), f32))                 # (A, A*R)
    seg_sum = jnp.kron(jnp.ones((A, 1), f32), jnp.eye(R, dtype=f32))  # (A*R, R)

    # gate weights: columns reordered to [in | forget | out | cand], each block
    # holding all P parallel cells contiguously -> one wide sigmoid / tanh.
    def reorder_gate(w_stack):                            # (P, 4R, D) -> (D, 4*P*R)
        cols = [w_stack[j].T[:, g * R:(g + 1) * R]
                for g in range(4) for j in range(P)]
        return jnp.concatenate(cols, axis=1)

    wi = reorder_gate(params['i2h_w']).astype(bf16)       # (input_size, G)
    wh = reorder_gate(params['h2h_w']).astype(bf16)       # (R, G)
    wa = reorder_gate(params['a2h_w']).astype(bf16)       # (R, G)
    bsum = params['i2h_b'] + params['h2h_b'] + params['a2h_b']     # (P, 4R)
    gate_b = jnp.concatenate(
        [bsum[j, g * R:(g + 1) * R] for g in range(4) for j in range(P)],
        axis=0).reshape(1, -1).astype(f32)

    # projection padded to a lane-dense output width.
    proj_w = jnp.zeros((R, out_pad), f32).at[:, :out_size].set(
        params['proj_w'].T).astype(bf16)
    proj_b = jnp.full((1, out_pad), -1e30, f32).at[0, :out_size].set(
        params['proj_b'])

    weight_args = [
        a2a_bd, a2a_bias,
        h2a_w_rep, h2a_b_rep, d2d_bd,
        h2a1_w_rep, h2a1_b_rep, d2d1_bd,
        exp_w, seg_sum,
        res_sc.reshape(1, -1), res_sh.reshape(1, -1),
        res1_sc.reshape(1, -1), res1_sh.reshape(1, -1),
        wi, wh, wa, gate_b,
        proj_w, proj_b,
    ]

    # data tiles: lane-dense layouts prepared in the wrapper (free plumbing)
    x_bf = x.astype(bf16)
    att_flat = att.reshape(B, AR).astype(bf16)
    st0 = jnp.concatenate(
        [s for l in range(L) for s in (prev_c[l], prev_h[l])], axis=-1)

    # ---- batch tile selection: biggest tile fitting per-generation VMEM ----
    try:
        kind = jax.devices()[0].device_kind.lower()
    except Exception:
        kind = ""
    is_v7 = ('v7' in kind) or ('7x' in kind)
    vmem_budget = (40 << 20) if is_v7 else (88 << 20)
    vmem_limit = (48 << 20) if is_v7 else (96 << 20)
    min_steps = 2 if is_v7 else 1          # keep both v7x TensorCores busy

    weight_bytes = 2 * sum(int(a.size) * a.dtype.itemsize for a in weight_args)
    per_row = 2 * (2 * input_size + 2 * AR + 4 * 2 * L * R     # double-buffered in
                   + 4 * s_pad + 4 * out_pad)                  # double-buffered out
    per_row += 4 * (2 * AA + 3 * AR + 3 * G + 16 * R + out_pad)  # live temporaries

    if block_b is not None:
        BT = min(block_b, B)
    else:
        cands = [bt for bt in range(16, B + 1, 16) if B % bt == 0] or [B]
        feasible = [bt for bt in cands
                    if bt * per_row + weight_bytes <= vmem_budget] or [cands[0]]
        preferred = [bt for bt in feasible if B // bt >= min_steps]
        BT = max(preferred) if preferred else max(feasible)
    assert B % BT == 0 and (BT % 16 == 0 or BT == B)
    grid = (B // BT,)

    def _wspec(a):
        return pl.BlockSpec(a.shape, lambda i: (0, 0))

    in_specs = (
        [pl.BlockSpec((BT, input_size), lambda i: (i, 0)),
         pl.BlockSpec((BT, AR), lambda i: (i, 0)),
         pl.BlockSpec((BT, 2 * L * R), lambda i: (i, 0))]
        + [_wspec(a) for a in weight_args]
    )
    out_specs = (
        pl.BlockSpec((BT, s_pad), lambda i: (i, 0)),
        pl.BlockSpec((BT, out_pad), lambda i: (i, 0)),
    )
    out_shape = (
        jax.ShapeDtypeStruct((B, s_pad), f32),
        jax.ShapeDtypeStruct((B, out_pad), f32),
    )

    # advisory cost estimate (weights fetched once, not per-tile)
    flops = 2 * B * AR * 2 * AA + 2 * B * input_size * G + 2 * B * R * out_pad
    per_attn = 2 * B * (R * AA + AA * A + A * AR + AR * R)
    flops += L * (2 * per_attn + 2 * 2 * B * R * G) + (L - 1) * 2 * B * R * G
    transc = L * B * (2 * AA + 2 * A + 5 * PR) + B * out_pad
    bytes_acc = (weight_bytes // 2 + int(x_bf.size) * 2 + int(att_flat.size) * 2
                 + int(st0.size) * 4 + B * (s_pad + out_pad) * 4)

    fn = pl.pallas_call(
        _lstm_double_att_kernel,
        grid=grid,
        in_specs=in_specs,
        out_specs=out_specs,
        out_shape=out_shape,
        compiler_params=pltpu.CompilerParams(
            dimension_semantics=("parallel",),
            vmem_limit_bytes=int(vmem_limit),
        ),
        cost_estimate=pl.CostEstimate(flops=int(flops),
                                      transcendentals=int(transc),
                                      bytes_accessed=int(bytes_acc)),
    )
    st_out, logp_pad = fn(x_bf, att_flat, st0, *weight_args)

    outputs = []
    for l in range(L):
        outputs.append(st_out[:, (2 * l) * R:(2 * l + 1) * R])
        outputs.append(st_out[:, (2 * l + 1) * R:(2 * l + 2) * R])
    return outputs, logp_pad[:, :out_size]


def reference_forward(x, att, prev_c, prev_h, p):
    """Pure-JAX mirror of the PyTorch forward (eval-mode BN, dropout == 0)."""
    L, B, R = prev_c.shape
    A = att.shape[1]
    P = p['i2h_w'].shape[0]
    eps = 1e-5

    def bn(v, name):
        return ((v - p[name + '_m']) / jnp.sqrt(p[name + '_v'] + eps)
                * p[name + '_g'] + p[name + '_b'])

    outputs = []
    for i in range(L):
        pc, ph = prev_c[i], prev_h[i]
        xt = x if i == 0 else x + outputs[-1]
        pav = jax.nn.relu(att.reshape(-1, R) @ p['a2a_w'].T + p['a2a_b']).reshape(B, A, A)
        pah = jax.nn.relu(bn(ph @ p['h2a_w'].T + p['h2a_b'], 'bn_h2a'))
        pdot = jnp.tanh(pav + pah[:, :, None])
        ps = (pdot.reshape(-1, A) @ p['d2d_w'].T + p['d2d_b']).reshape(B, A)
        pw = jax.nn.softmax(ps, axis=1)
        pres = jax.nn.relu(bn(jnp.einsum('bar,ba->br', att, pw), 'bn_res'))
        cs, hs = [], []
        for j in range(P):
            gates = (xt @ p['i2h_w'][j].T + p['i2h_b'][j]
                     + ph @ p['h2h_w'][j].T + p['h2h_b'][j]
                     + pres @ p['a2h_w'][j].T + p['a2h_b'][j])
            sig = jax.nn.sigmoid(gates[:, :3 * R])
            ig, fg, og = sig[:, :R], sig[:, R:2 * R], sig[:, 2 * R:3 * R]
            it = jnp.tanh(gates[:, 3 * R:])
            nc = fg * pc + ig * it
            nh = og * jnp.tanh(nc)
            cs.append(nc)
            hs.append(nh)
        nc = jnp.mean(jnp.stack(cs), axis=0)
        nh = jnp.mean(jnp.stack(hs), axis=0)
        av = jax.nn.relu(att.reshape(-1, R) @ p['a2a1_w'].T + p['a2a1_b']).reshape(B, A, A)
        ah = jax.nn.relu(bn(nh @ p['h2a1_w'].T + p['h2a1_b'], 'bn_h2a1'))
        dot = jnp.tanh(av + ah[:, :, None])
        s = (dot.reshape(-1, A) @ p['d2d1_w'].T + p['d2d1_b']).reshape(B, A)
        w = jax.nn.softmax(s, axis=1)
        ares = jax.nn.relu(bn(jnp.einsum('bar,ba->br', att, w), 'bn_res1'))
        top_h = ares + nh
        outputs += [nc, top_h]
    logits = outputs[-1] @ p['proj_w'].T + p['proj_b']
    return outputs, jax.nn.log_softmax(logits, axis=1)


if __name__ == "__main__":
    B, INPUT, RNN, ATT, OUT, LAYERS, PAR = 16, 32, 32, 16, 24, 2, 2

    key = jax.random.PRNGKey(0)
    ks = iter(jax.random.split(key, 64))

    def lin(out_f, in_f, scale=0.1):
        w = scale * jax.random.normal(next(ks), (out_f, in_f), jnp.float32)
        b = scale * jax.random.normal(next(ks), (out_f,), jnp.float32)
        return w, b

    p = {}
    p['a2a_w'], p['a2a_b'] = lin(ATT, RNN)
    p['h2a_w'], p['h2a_b'] = lin(ATT, RNN)
    p['d2d_w'], p['d2d_b'] = lin(1, ATT)
    p['a2a1_w'], p['a2a1_b'] = lin(ATT, RNN)
    p['h2a1_w'], p['h2a1_b'] = lin(ATT, RNN)
    p['d2d1_w'], p['d2d1_b'] = lin(1, ATT)
    p['proj_w'], p['proj_b'] = lin(OUT, RNN)

    i2h_w, i2h_b, h2h_w, h2h_b, a2h_w, a2h_b = [], [], [], [], [], []
    for _ in range(PAR):
        w, b = lin(4 * RNN, INPUT); i2h_w.append(w); i2h_b.append(b)
        w, b = lin(4 * RNN, RNN);   h2h_w.append(w); h2h_b.append(b)
        w, b = lin(4 * RNN, RNN);   a2h_w.append(w); a2h_b.append(b)
    p['i2h_w'], p['i2h_b'] = jnp.stack(i2h_w), jnp.stack(i2h_b)
    p['h2h_w'], p['h2h_b'] = jnp.stack(h2h_w), jnp.stack(h2h_b)
    p['a2h_w'], p['a2h_b'] = jnp.stack(a2h_w), jnp.stack(a2h_b)

    for name, n in [('bn_h2a', ATT), ('bn_h2a1', ATT), ('bn_res', RNN), ('bn_res1', RNN)]:
        p[name + '_g'] = 1.0 + 0.1 * jax.random.normal(next(ks), (n,), jnp.float32)
        p[name + '_b'] = 0.1 * jax.random.normal(next(ks), (n,), jnp.float32)
        p[name + '_m'] = 0.1 * jax.random.normal(next(ks), (n,), jnp.float32)
        p[name + '_v'] = 0.5 + jax.random.uniform(next(ks), (n,), jnp.float32)

    x = jax.random.normal(next(ks), (B, INPUT), jnp.float32)
    att = jax.random.normal(next(ks), (B, ATT, RNN), jnp.float32)
    prev_c = 0.1 * jax.random.normal(next(ks), (LAYERS, B, RNN), jnp.float32)
    prev_h = 0.1 * jax.random.normal(next(ks), (LAYERS, B, RNN), jnp.float32)

    outputs, logp = lstm_double_att_stack(x, att, prev_c, prev_h, p, dropout=0.0)
    jax.block_until_ready(logp)

    ref_outputs, ref_logp = reference_forward(x, att, prev_c, prev_h, p)
    for got, want in zip(outputs, ref_outputs):
        assert jnp.allclose(got, want, atol=2e-2, rtol=2e-2)
    assert jnp.allclose(logp, ref_logp, atol=2e-2, rtol=2e-2)

    print("KERNEL_OK")
</pallas_src>

<mosaic_0001>
module attributes {stable_mosaic.version = 11 : i64} {
  func.func @_lstm_double_att_kernel(%arg0: i32, %arg1: memref<16x32xbf16, #tpu.memory_space<vmem>>, %arg2: memref<16x512xbf16, #tpu.memory_space<vmem>>, %arg3: memref<16x128xf32, #tpu.memory_space<vmem>>, %arg4: memref<512x512xbf16, #tpu.memory_space<vmem>>, %arg5: memref<1x512xf32, #tpu.memory_space<vmem>>, %arg6: memref<32x256xf32, #tpu.memory_space<vmem>>, %arg7: memref<1x256xf32, #tpu.memory_space<vmem>>, %arg8: memref<256x16xf32, #tpu.memory_space<vmem>>, %arg9: memref<32x256xf32, #tpu.memory_space<vmem>>, %arg10: memref<1x256xf32, #tpu.memory_space<vmem>>, %arg11: memref<256x16xf32, #tpu.memory_space<vmem>>, %arg12: memref<16x512xf32, #tpu.memory_space<vmem>>, %arg13: memref<512x32xf32, #tpu.memory_space<vmem>>, %arg14: memref<1x32xf32, #tpu.memory_space<vmem>>, %arg15: memref<1x32xf32, #tpu.memory_space<vmem>>, %arg16: memref<1x32xf32, #tpu.memory_space<vmem>>, %arg17: memref<1x32xf32, #tpu.memory_space<vmem>>, %arg18: memref<32x256xbf16, #tpu.memory_space<vmem>>, %arg19: memref<32x256xbf16, #tpu.memory_space<vmem>>, %arg20: memref<32x256xbf16, #tpu.memory_space<vmem>>, %arg21: memref<1x256xf32, #tpu.memory_space<vmem>>, %arg22: memref<32x128xbf16, #tpu.memory_space<vmem>>, %arg23: memref<1x128xf32, #tpu.memory_space<vmem>>, %arg24: memref<16x128xf32, #tpu.memory_space<vmem>>, %arg25: memref<16x128xf32, #tpu.memory_space<vmem>>) attributes {dimension_semantics = [#tpu.dimension_semantics<parallel>], iteration_bounds = array<i64: 1>, scalar_prefetch = 0 : i64, scratch_operands = 0 : i64, tpu.core_type = #tpu.core_type<tc>, window_params = [{transform_indices = @transform_0, window_bounds = array<i64: 16, 32>}, {transform_indices = @transform_1, window_bounds = array<i64: 16, 512>}, {transform_indices = @transform_2, window_bounds = array<i64: 16, 128>}, {pipeline_mode = #tpu.pipeline_mode<synchronous>, transform_indices = @transform_3, window_bounds = array<i64: 512, 512>}, {pipeline_mode = #tpu.pipeline_mode<synchronous>, transform_indices = @transform_4, window_bounds = array<i64: 1, 512>}, {pipeline_mode = #tpu.pipeline_mode<synchronous>, transform_indices = @transform_5, window_bounds = array<i64: 32, 256>}, {pipeline_mode = #tpu.pipeline_mode<synchronous>, transform_indices = @transform_6, window_bounds = array<i64: 1, 256>}, {pipeline_mode = #tpu.pipeline_mode<synchronous>, transform_indices = @transform_7, window_bounds = array<i64: 256, 16>}, {pipeline_mode = #tpu.pipeline_mode<synchronous>, transform_indices = @transform_8, window_bounds = array<i64: 32, 256>}, {pipeline_mode = #tpu.pipeline_mode<synchronous>, transform_indices = @transform_9, window_bounds = array<i64: 1, 256>}, {pipeline_mode = #tpu.pipeline_mode<synchronous>, transform_indices = @transform_10, window_bounds = array<i64: 256, 16>}, {pipeline_mode = #tpu.pipeline_mode<synchronous>, transform_indices = @transform_11, window_bounds = array<i64: 16, 512>}, {pipeline_mode = #tpu.pipeline_mode<synchronous>, transform_indices = @transform_12, window_bounds = array<i64: 512, 32>}, {pipeline_mode = #tpu.pipeline_mode<synchronous>, transform_indices = @transform_13, window_bounds = array<i64: 1, 32>}, {pipeline_mode = #tpu.pipeline_mode<synchronous>, transform_indices = @transform_14, window_bounds = array<i64: 1, 32>}, {pipeline_mode = #tpu.pipeline_mode<synchronous>, transform_indices = @transform_15, window_bounds = array<i64: 1, 32>}, {pipeline_mode = #tpu.pipeline_mode<synchronous>, transform_indices = @transform_16, window_bounds = array<i64: 1, 32>}, {pipeline_mode = #tpu.pipeline_mode<synchronous>, transform_indices = @transform_17, window_bounds = array<i64: 32, 256>}, {pipeline_mode = #tpu.pipeline_mode<synchronous>, transform_indices = @transform_18, window_bounds = array<i64: 32, 256>}, {pipeline_mode = #tpu.pipeline_mode<synchronous>, transform_indices = @transform_19, window_bounds = array<i64: 32, 256>}, {pipeline_mode = #tpu.pipeline_mode<synchronous>, transform_indices = @transform_20, window_bounds = array<i64: 1, 256>}, {pipeline_mode = #tpu.pipeline_mode<synchronous>, transform_indices = @transform_21, window_bounds = array<i64: 32, 128>}, {pipeline_mode = #tpu.pipeline_mode<synchronous>, transform_indices = @transform_22, window_bounds = array<i64: 1, 128>}, {transform_indices = @transform_23, window_bounds = array<i64: 16, 128>}, {transform_indices = @transform_24, window_bounds = array<i64: 16, 128>}]} {
    %c0 = arith.constant 0 : index
    %c0_0 = arith.constant 0 : index
    %0 = vector.load %arg4[%c0, %c0_0] : memref<512x512xbf16, #tpu.memory_space<vmem>>, vector<512x512xbf16>
    %c0_1 = arith.constant 0 : index
    %c0_2 = arith.constant 0 : index
    %1 = vector.load %arg5[%c0_1, %c0_2] : memref<1x512xf32, #tpu.memory_space<vmem>>, vector<1x512xf32>
    %c0_3 = arith.constant 0 : index
    %c0_4 = arith.constant 0 : index
    %2 = vector.load %arg6[%c0_3, %c0_4] : memref<32x256xf32, #tpu.memory_space<vmem>>, vector<32x256xf32>
    %c0_5 = arith.constant 0 : index
    %c0_6 = arith.constant 0 : index
    %3 = vector.load %arg7[%c0_5, %c0_6] : memref<1x256xf32, #tpu.memory_space<vmem>>, vector<1x256xf32>
    %c0_7 = arith.constant 0 : index
    %c0_8 = arith.constant 0 : index
    %4 = vector.load %arg8[%c0_7, %c0_8] : memref<256x16xf32, #tpu.memory_space<vmem>>, vector<256x16xf32>
    %c0_9 = arith.constant 0 : index
    %c0_10 = arith.constant 0 : index
    %5 = vector.load %arg9[%c0_9, %c0_10] : memref<32x256xf32, #tpu.memory_space<vmem>>, vector<32x256xf32>
    %c0_11 = arith.constant 0 : index
    %c0_12 = arith.constant 0 : index
    %6 = vector.load %arg10[%c0_11, %c0_12] : memref<1x256xf32, #tpu.memory_space<vmem>>, vector<1x256xf32>
    %c0_13 = arith.constant 0 : index
    %c0_14 = arith.constant 0 : index
    %7 = vector.load %arg11[%c0_13, %c0_14] : memref<256x16xf32, #tpu.memory_space<vmem>>, vector<256x16xf32>
    %c0_15 = arith.constant 0 : index
    %c0_16 = arith.constant 0 : index
    %8 = vector.load %arg12[%c0_15, %c0_16] : memref<16x512xf32, #tpu.memory_space<vmem>>, vector<16x512xf32>
    %c0_17 = arith.constant 0 : index
    %c0_18 = arith.constant 0 : index
    %9 = vector.load %arg13[%c0_17, %c0_18] : memref<512x32xf32, #tpu.memory_space<vmem>>, vector<512x32xf32>
    %c0_19 = arith.constant 0 : index
    %c0_20 = arith.constant 0 : index
    %10 = vector.load %arg14[%c0_19, %c0_20] : memref<1x32xf32, #tpu.memory_space<vmem>>, vector<1x32xf32>
    %c0_21 = arith.constant 0 : index
    %c0_22 = arith.constant 0 : index
    %11 = vector.load %arg15[%c0_21, %c0_22] : memref<1x32xf32, #tpu.memory_space<vmem>>, vector<1x32xf32>
    %c0_23 = arith.constant 0 : index
    %c0_24 = arith.constant 0 : index
    %12 = vector.load %arg16[%c0_23, %c0_24] : memref<1x32xf32, #tpu.memory_space<vmem>>, vector<1x32xf32>
    %c0_25 = arith.constant 0 : index
    %c0_26 = arith.constant 0 : index
    %13 = vector.load %arg17[%c0_25, %c0_26] : memref<1x32xf32, #tpu.memory_space<vmem>>, vector<1x32xf32>
    %c0_27 = arith.constant 0 : index
    %c0_28 = arith.constant 0 : index
    %14 = vector.load %arg18[%c0_27, %c0_28] : memref<32x256xbf16, #tpu.memory_space<vmem>>, vector<32x256xbf16>
    %c0_29 = arith.constant 0 : index
    %c0_30 = arith.constant 0 : index
    %15 = vector.load %arg19[%c0_29, %c0_30] : memref<32x256xbf16, #tpu.memory_space<vmem>>, vector<32x256xbf16>
    %c0_31 = arith.constant 0 : index
    %c0_32 = arith.constant 0 : index
    %16 = vector.load %arg20[%c0_31, %c0_32] : memref<32x256xbf16, #tpu.memory_space<vmem>>, vector<32x256xbf16>
    %c0_33 = arith.constant 0 : index
    %c0_34 = arith.constant 0 : index
    %17 = vector.load %arg21[%c0_33, %c0_34] : memref<1x256xf32, #tpu.memory_space<vmem>>, vector<1x256xf32>
    %c0_35 = arith.constant 0 : index
    %c0_36 = arith.constant 0 : index
    %18 = vector.load %arg22[%c0_35, %c0_36] : memref<32x128xbf16, #tpu.memory_space<vmem>>, vector<32x128xbf16>
    %c0_37 = arith.constant 0 : index
    %c0_38 = arith.constant 0 : index
    %19 = vector.load %arg23[%c0_37, %c0_38] : memref<1x128xf32, #tpu.memory_space<vmem>>, vector<1x128xf32>
    %c0_39 = arith.constant 0 : index
    %c0_40 = arith.constant 0 : index
    %20 = vector.load %arg2[%c0_39, %c0_40] : memref<16x512xbf16, #tpu.memory_space<vmem>>, vector<16x512xbf16>
    %cst = arith.constant dense<0.000000e+00> : vector<16x512xf32>
    %21 = tpu.matmul %20, %0, %cst {dimension_numbers = #tpu.dot_dimension_numbers<[1], [0], [0], [1], [0, 0, 1, 1], [], []>} : vector<16x512xbf16>, vector<512x512xbf16>, vector<16x512xf32> -> vector<16x512xf32>
    %22 = vector.broadcast %1 : vector<1x512xf32> to vector<16x512xf32>
    %23 = arith.addf %21, %22 : vector<16x512xf32>
    %cst_41 = arith.constant 0.000000e+00 : f32
    %24 = vector.broadcast %cst_41 : f32 to vector<16x512xf32>
    %25 = arith.maximumf %23, %24 : vector<16x512xf32>
    %26 = vector.extract_strided_slice %25 {offsets = [0, 0], sizes = [16, 256], strides = [1, 1]} : vector<16x512xf32> to vector<16x256xf32>
    %27 = vector.extract_strided_slice %25 {offsets = [0, 256], sizes = [16, 256], strides = [1, 1]} : vector<16x512xf32> to vector<16x256xf32>
    %c0_42 = arith.constant 0 : index
    %c0_43 = arith.constant 0 : index
    %28 = vector.load %arg3[%c0_42, %c0_43] : memref<16x128xf32, #tpu.memory_space<vmem>>, vector<16x128xf32>
    %c0_44 = arith.constant 0 : index
    %c0_45 = arith.constant 0 : index
    %29 = vector.load %arg1[%c0_44, %c0_45] : memref<16x32xbf16, #tpu.memory_space<vmem>>, vector<16x32xbf16>
    %cst_46 = arith.constant dense<0.000000e+00> : vector<16x256xf32>
    %30 = tpu.matmul %29, %14, %cst_46 {dimension_numbers = #tpu.dot_dimension_numbers<[1], [0], [0], [1], [0, 0, 1, 1], [], []>} : vector<16x32xbf16>, vector<32x256xbf16>, vector<16x256xf32> -> vector<16x256xf32>
    %31 = vector.broadcast %17 : vector<1x256xf32> to vector<16x256xf32>
    %32 = arith.addf %30, %31 : vector<16x256xf32>
    %33 = vector.extract_strided_slice %28 {offsets = [0, 0], sizes = [16, 32], strides = [1, 1]} : vector<16x128xf32> to vector<16x32xf32>
    %34 = vector.extract_strided_slice %28 {offsets = [0, 32], sizes = [16, 32], strides = [1, 1]} : vector<16x128xf32> to vector<16x32xf32>
    %cst_47 = arith.constant dense<0.000000e+00> : vector<16x256xf32>
    %35 = tpu.matmul %34, %2, %cst_47 {dimension_numbers = #tpu.dot_dimension_numbers<[1], [0], [0], [1], [0, 0, 1, 1], [], []>} : vector<16x32xf32>, vector<32x256xf32>, vector<16x256xf32> -> vector<16x256xf32>
    %36 = vector.broadcast %3 : vector<1x256xf32> to vector<16x256xf32>
    %37 = arith.addf %35, %36 : vector<16x256xf32>
    %cst_48 = arith.constant 0.000000e+00 : f32
    %38 = vector.broadcast %cst_48 : f32 to vector<16x256xf32>
    %39 = arith.maximumf %37, %38 : vector<16x256xf32>
    %40 = arith.addf %26, %39 : vector<16x256xf32>
    %41 = math.tanh %40 : vector<16x256xf32>
    %cst_49 = arith.constant dense<0.000000e+00> : vector<16x16xf32>
    %42 = tpu.matmul %41, %4, %cst_49 {dimension_numbers = #tpu.dot_dimension_numbers<[1], [0], [0], [1], [0, 0, 1, 1], [], []>} : vector<16x256xf32>, vector<256x16xf32>, vector<16x16xf32> -> vector<16x16xf32>
    %cst_50 = arith.constant dense<0xFF800000> : vector<16xf32>
    %43 = vector.multi_reduction <maximumf>, %42, %cst_50 [1] : vector<16x16xf32> to vector<16xf32>
    %44 = vector.shape_cast %43 : vector<16xf32> to vector<16x1xf32>
    %45 = vector.broadcast %44 : vector<16x1xf32> to vector<16x16xf32>
    %46 = arith.subf %42, %45 : vector<16x16xf32>
    %47 = math.exp %46 : vector<16x16xf32>
    %cst_51 = arith.constant dense<0.000000e+00> : vector<16xf32>
    %48 = vector.multi_reduction <add>, %47, %cst_51 [1] : vector<16x16xf32> to vector<16xf32>
    %49 = vector.shape_cast %48 : vector<16xf32> to vector<16x1xf32>
    %50 = tpu.reciprocal %49 {approx = true} : vector<16x1xf32> -> vector<16x1xf32>
    %51 = vector.broadcast %50 : vector<16x1xf32> to vector<16x16xf32>
    %52 = arith.mulf %47, %51 : vector<16x16xf32>
    %cst_52 = arith.constant dense<0.000000e+00> : vector<16x512xf32>
    %53 = tpu.matmul %52, %8, %cst_52 {dimension_numbers = #tpu.dot_dimension_numbers<[1], [0], [0], [1], [0, 0, 1, 1], [], []>} : vector<16x16xf32>, vector<16x512xf32>, vector<16x512xf32> -> vector<16x512xf32>
    %54 = arith.extf %20 : vector<16x512xbf16> to vector<16x512xf32>
    %55 = arith.mulf %53, %54 : vector<16x512xf32>
    %cst_53 = arith.constant dense<0.000000e+00> : vector<16x32xf32>
    %56 = tpu.matmul %55, %9, %cst_53 {dimension_numbers = #tpu.dot_dimension_numbers<[1], [0], [0], [1], [0, 0, 1, 1], [], []>} : vector<16x512xf32>, vector<512x32xf32>, vector<16x32xf32> -> vector<16x32xf32>
    %57 = vector.broadcast %10 : vector<1x32xf32> to vector<16x32xf32>
    %58 = arith.mulf %56, %57 : vector<16x32xf32>
    %59 = vector.broadcast %11 : vector<1x32xf32> to vector<16x32xf32>
    %60 = arith.addf %58, %59 : vector<16x32xf32>
    %cst_54 = arith.constant 0.000000e+00 : f32
    %61 = vector.broadcast %cst_54 : f32 to vector<16x32xf32>
    %62 = arith.maximumf %60, %61 : vector<16x32xf32>
    %63 = arith.truncf %34 : vector<16x32xf32> to vector<16x32xbf16>
    %cst_55 = arith.constant dense<0.000000e+00> : vector<16x256xf32>
    %64 = tpu.matmul %63, %15, %cst_55 {dimension_numbers = #tpu.dot_dimension_numbers<[1], [0], [0], [1], [0, 0, 1, 1], [], []>} : vector<16x32xbf16>, vector<32x256xbf16>, vector<16x256xf32> -> vector<16x256xf32>
    %65 = arith.addf %32, %64 : vector<16x256xf32>
    %66 = arith.truncf %62 : vector<16x32xf32> to vector<16x32xbf16>
    %cst_56 = arith.constant dense<0.000000e+00> : vector<16x256xf32>
    %67 = tpu.matmul %66, %16, %cst_56 {dimension_numbers = #tpu.dot_dimension_numbers<[1], [0], [0], [1], [0, 0, 1, 1], [], []>} : vector<16x32xbf16>, vector<32x256xbf16>, vector<16x256xf32> -> vector<16x256xf32>
    %68 = arith.addf %65, %67 : vector<16x256xf32>
    %69 = vector.extract_strided_slice %68 {offsets = [0, 0], sizes = [16, 192], strides = [1, 1]} : vector<16x256xf32> to vector<16x192xf32>
    %70 = arith.negf %69 : vector<16x192xf32>
    %71 = math.exp %70 : vector<16x192xf32>
    %cst_57 = arith.constant 1.000000e+00 : f32
    %72 = vector.broadcast %cst_57 : f32 to vector<16x192xf32>
    %73 = arith.addf %72, %71 : vector<16x192xf32>
    %74 = arith.divf %72, %73 : vector<16x192xf32>
    %75 = vector.extract_strided_slice %68 {offsets = [0, 192], sizes = [16, 64], strides = [1, 1]} : vector<16x256xf32> to vector<16x64xf32>
    %76 = math.tanh %75 : vector<16x64xf32>
    %77 = vector.extract_strided_slice %74 {offsets = [0, 0], sizes = [16, 64], strides = [1, 1]} : vector<16x192xf32> to vector<16x64xf32>
    %78 = vector.extract_strided_slice %74 {offsets = [0, 64], sizes = [16, 64], strides = [1, 1]} : vector<16x192xf32> to vector<16x64xf32>
    %79 = vector.extract_strided_slice %74 {offsets = [0, 128], sizes = [16, 64], strides = [1, 1]} : vector<16x192xf32> to vector<16x64xf32>
    %80 = tpu.concatenate %33, %33 in 1 : vector<16x32xf32>, vector<16x32xf32> -> vector<16x64xf32>
    %81 = arith.mulf %78, %80 : vector<16x64xf32>
    %82 = arith.mulf %77, %76 : vector<16x64xf32>
    %83 = arith.addf %81, %82 : vector<16x64xf32>
    %84 = math.tanh %83 : vector<16x64xf32>
    %85 = arith.mulf %79, %84 : vector<16x64xf32>
    %86 = vector.extract_strided_slice %83 {offsets = [0, 0], sizes = [16, 32], strides = [1, 1]} : vector<16x64xf32> to vector<16x32xf32>
    %87 = vector.extract_strided_slice %85 {offsets = [0, 0], sizes = [16, 32], strides = [1, 1]} : vector<16x64xf32> to vector<16x32xf32>
    %88 = vector.extract_strided_slice %83 {offsets = [0, 32], sizes = [16, 32], strides = [1, 1]} : vector<16x64xf32> to vector<16x32xf32>
    %89 = arith.addf %86, %88 : vector<16x32xf32>
    %90 = vector.extract_strided_slice %85 {offsets = [0, 32], sizes = [16, 32], strides = [1, 1]} : vector<16x64xf32> to vector<16x32xf32>
    %91 = arith.addf %87, %90 : vector<16x32xf32>
    %cst_58 = arith.constant 5.000000e-01 : f32
    %92 = vector.broadcast %cst_58 : f32 to vector<16x32xf32>
    %93 = arith.mulf %89, %92 : vector<16x32xf32>
    %cst_59 = arith.constant 5.000000e-01 : f32
    %94 = vector.broadcast %cst_59 : f32 to vector<16x32xf32>
    %95 = arith.mulf %91, %94 : vector<16x32xf32>
    %cst_60 = arith.constant dense<0.000000e+00> : vector<16x256xf32>
    %96 = tpu.matmul %95, %5, %cst_60 {dimension_numbers = #tpu.dot_dimension_numbers<[1], [0], [0], [1], [0, 0, 1, 1], [], []>} : vector<16x32xf32>, vector<32x256xf32>, vector<16x256xf32> -> vector<16x256xf32>
    %97 = vector.broadcast %6 : vector<1x256xf32> to vector<16x256xf32>
    %98 = arith.addf %96, %97 : vector<16x256xf32>
    %cst_61 = arith.constant 0.000000e+00 : f32
    %99 = vector.broadcast %cst_61 : f32 to vector<16x256xf32>
    %100 = arith.maximumf %98, %99 : vector<16x256xf32>
    %101 = arith.addf %27, %100 : vector<16x256xf32>
    %102 = math.tanh %101 : vector<16x256xf32>
    %cst_62 = arith.constant dense<0.000000e+00> : vector<16x16xf32>
    %103 = tpu.matmul %102, %7, %cst_62 {dimension_numbers = #tpu.dot_dimension_numbers<[1], [0], [0], [1], [0, 0, 1, 1], [], []>} : vector<16x256xf32>, vector<256x16xf32>, vector<16x16xf32> -> vector<16x16xf32>
    %cst_63 = arith.constant dense<0xFF800000> : vector<16xf32>
    %104 = vector.multi_reduction <maximumf>, %103, %cst_63 [1] : vector<16x16xf32> to vector<16xf32>
    %105 = vector.shape_cast %104 : vector<16xf32> to vector<16x1xf32>
    %106 = vector.broadcast %105 : vector<16x1xf32> to vector<16x16xf32>
    %107 = arith.subf %103, %106 : vector<16x16xf32>
    %108 = math.exp %107 : vector<16x16xf32>
    %cst_64 = arith.constant dense<0.000000e+00> : vector<16xf32>
    %109 = vector.multi_reduction <add>, %108, %cst_64 [1] : vector<16x16xf32> to vector<16xf32>
    %110 = vector.shape_cast %109 : vector<16xf32> to vector<16x1xf32>
    %111 = tpu.reciprocal %110 {approx = true} : vector<16x1xf32> -> vector<16x1xf32>
    %112 = vector.broadcast %111 : vector<16x1xf32> to vector<16x16xf32>
    %113 = arith.mulf %108, %112 : vector<16x16xf32>
    %cst_65 = arith.constant dense<0.000000e+00> : vector<16x512xf32>
    %114 = tpu.matmul %113, %8, %cst_65 {dimension_numbers = #tpu.dot_dimension_numbers<[1], [0], [0], [1], [0, 0, 1, 1], [], []>} : vector<16x16xf32>, vector<16x512xf32>, vector<16x512xf32> -> vector<16x512xf32>
    %115 = arith.extf %20 : vector<16x512xbf16> to vector<16x512xf32>
    %116 = arith.mulf %114, %115 : vector<16x512xf32>
    %cst_66 = arith.constant dense<0.000000e+00> : vector<16x32xf32>
    %117 = tpu.matmul %116, %9, %cst_66 {dimension_numbers = #tpu.dot_dimension_numbers<[1], [0], [0], [1], [0, 0, 1, 1], [], []>} : vector<16x512xf32>, vector<512x32xf32>, vector<16x32xf32> -> vector<16x32xf32>
    %118 = vector.broadcast %12 : vector<1x32xf32> to vector<16x32xf32>
    %119 = arith.mulf %117, %118 : vector<16x32xf32>
    %120 = vector.broadcast %13 : vector<1x32xf32> to vector<16x32xf32>
    %121 = arith.addf %119, %120 : vector<16x32xf32>
    %cst_67 = arith.constant 0.000000e+00 : f32
    %122 = vector.broadcast %cst_67 : f32 to vector<16x32xf32>
    %123 = arith.maximumf %121, %122 : vector<16x32xf32>
    %124 = arith.addf %123, %95 : vector<16x32xf32>
    %125 = vector.extract_strided_slice %28 {offsets = [0, 64], sizes = [16, 32], strides = [1, 1]} : vector<16x128xf32> to vector<16x32xf32>
    %126 = vector.extract_strided_slice %28 {offsets = [0, 96], sizes = [16, 32], strides = [1, 1]} : vector<16x128xf32> to vector<16x32xf32>
    %cst_68 = arith.constant dense<0.000000e+00> : vector<16x256xf32>
    %127 = tpu.matmul %126, %2, %cst_68 {dimension_numbers = #tpu.dot_dimension_numbers<[1], [0], [0], [1], [0, 0, 1, 1], [], []>} : vector<16x32xf32>, vector<32x256xf32>, vector<16x256xf32> -> vector<16x256xf32>
    %128 = vector.broadcast %3 : vector<1x256xf32> to vector<16x256xf32>
    %129 = arith.addf %127, %128 : vector<16x256xf32>
    %cst_69 = arith.constant 0.000000e+00 : f32
    %130 = vector.broadcast %cst_69 : f32 to vector<16x256xf32>
    %131 = arith.maximumf %129, %130 : vector<16x256xf32>
    %132 = arith.addf %26, %131 : vector<16x256xf32>
    %133 = math.tanh %132 : vector<16x256xf32>
    %cst_70 = arith.constant dense<0.000000e+00> : vector<16x16xf32>
    %134 = tpu.matmul %133, %4, %cst_70 {dimension_numbers = #tpu.dot_dimension_numbers<[1], [0], [0], [1], [0, 0, 1, 1], [], []>} : vector<16x256xf32>, vector<256x16xf32>, vector<16x16xf32> -> vector<16x16xf32>
    %cst_71 = arith.constant dense<0xFF800000> : vector<16xf32>
    %135 = vector.multi_reduction <maximumf>, %134, %cst_71 [1] : vector<16x16xf32> to vector<16xf32>
    %136 = vector.shape_cast %135 : vector<16xf32> to vector<16x1xf32>
    %137 = vector.broadcast %136 : vector<16x1xf32> to vector<16x16xf32>
    %138 = arith.subf %134, %137 : vector<16x16xf32>
    %139 = math.exp %138 : vector<16x16xf32>
    %cst_72 = arith.constant dense<0.000000e+00> : vector<16xf32>
    %140 = vector.multi_reduction <add>, %139, %cst_72 [1] : vector<16x16xf32> to vector<16xf32>
    %141 = vector.shape_cast %140 : vector<16xf32> to vector<16x1xf32>
    %142 = tpu.reciprocal %141 {approx = true} : vector<16x1xf32> -> vector<16x1xf32>
    %143 = vector.broadcast %142 : vector<16x1xf32> to vector<16x16xf32>
    %144 = arith.mulf %139, %143 : vector<16x16xf32>
    %cst_73 = arith.constant dense<0.000000e+00> : vector<16x512xf32>
    %145 = tpu.matmul %144, %8, %cst_73 {dimension_numbers = #tpu.dot_dimension_numbers<[1], [0], [0], [1], [0, 0, 1, 1], [], []>} : vector<16x16xf32>, vector<16x512xf32>, vector<16x512xf32> -> vector<16x512xf32>
    %146 = arith.extf %20 : vector<16x512xbf16> to vector<16x512xf32>
    %147 = arith.mulf %145, %146 : vector<16x512xf32>
    %cst_74 = arith.constant dense<0.000000e+00> : vector<16x32xf32>
    %148 = tpu.matmul %147, %9, %cst_74 {dimension_numbers = #tpu.dot_dimension_numbers<[1], [0], [0], [1], [0, 0, 1, 1], [], []>} : vector<16x512xf32>, vector<512x32xf32>, vector<16x32xf32> -> vector<16x32xf32>
    %149 = vector.broadcast %10 : vector<1x32xf32> to vector<16x32xf32>
    %150 = arith.mulf %148, %149 : vector<16x32xf32>
    %151 = vector.broadcast %11 : vector<1x32xf32> to vector<16x32xf32>
    %152 = arith.addf %150, %151 : vector<16x32xf32>
    %cst_75 = arith.constant 0.000000e+00 : f32
    %153 = vector.broadcast %cst_75 : f32 to vector<16x32xf32>
    %154 = arith.maximumf %152, %153 : vector<16x32xf32>
    %155 = arith.truncf %126 : vector<16x32xf32> to vector<16x32xbf16>
    %cst_76 = arith.constant dense<0.000000e+00> : vector<16x256xf32>
    %156 = tpu.matmul %155, %15, %cst_76 {dimension_numbers = #tpu.dot_dimension_numbers<[1], [0], [0], [1], [0, 0, 1, 1], [], []>} : vector<16x32xbf16>, vector<32x256xbf16>, vector<16x256xf32> -> vector<16x256xf32>
    %157 = arith.addf %32, %156 : vector<16x256xf32>
    %158 = arith.truncf %154 : vector<16x32xf32> to vector<16x32xbf16>
    %cst_77 = arith.constant dense<0.000000e+00> : vector<16x256xf32>
    %159 = tpu.matmul %158, %16, %cst_77 {dimension_numbers = #tpu.dot_dimension_numbers<[1], [0], [0], [1], [0, 0, 1, 1], [], []>} : vector<16x32xbf16>, vector<32x256xbf16>, vector<16x256xf32> -> vector<16x256xf32>
    %160 = arith.addf %157, %159 : vector<16x256xf32>
    %161 = arith.truncf %124 : vector<16x32xf32> to vector<16x32xbf16>
    %cst_78 = arith.constant dense<0.000000e+00> : vector<16x256xf32>
    %162 = tpu.matmul %161, %14, %cst_78 {dimension_numbers = #tpu.dot_dimension_numbers<[1], [0], [0], [1], [0, 0, 1, 1], [], []>} : vector<16x32xbf16>, vector<32x256xbf16>, vector<16x256xf32> -> vector<16x256xf32>
    %163 = arith.addf %160, %162 : vector<16x256xf32>
    %164 = vector.extract_strided_slice %163 {offsets = [0, 0], sizes = [16, 192], strides = [1, 1]} : vector<16x256xf32> to vector<16x192xf32>
    %165 = arith.negf %164 : vector<16x192xf32>
    %166 = math.exp %165 : vector<16x192xf32>
    %cst_79 = arith.constant 1.000000e+00 : f32
    %167 = vector.broadcast %cst_79 : f32 to vector<16x192xf32>
    %168 = arith.addf %167, %166 : vector<16x192xf32>
    %169 = arith.divf %167, %168 : vector<16x192xf32>
    %170 = vector.extract_strided_slice %163 {offsets = [0, 192], sizes = [16, 64], strides = [1, 1]} : vector<16x256xf32> to vector<16x64xf32>
    %171 = math.tanh %170 : vector<16x64xf32>
    %172 = vector.extract_strided_slice %169 {offsets = [0, 0], sizes = [16, 64], strides = [1, 1]} : vector<16x192xf32> to vector<16x64xf32>
    %173 = vector.extract_strided_slice %169 {offsets = [0, 64], sizes = [16, 64], strides = [1, 1]} : vector<16x192xf32> to vector<16x64xf32>
    %174 = vector.extract_strided_slice %169 {offsets = [0, 128], sizes = [16, 64], strides = [1, 1]} : vector<16x192xf32> to vector<16x64xf32>
    %175 = tpu.concatenate %125, %125 in 1 : vector<16x32xf32>, vector<16x32xf32> -> vector<16x64xf32>
    %176 = arith.mulf %173, %175 : vector<16x64xf32>
    %177 = arith.mulf %172, %171 : vector<16x64xf32>
    %178 = arith.addf %176, %177 : vector<16x64xf32>
    %179 = math.tanh %178 : vector<16x64xf32>
    %180 = arith.mulf %174, %179 : vector<16x64xf32>
    %181 = vector.extract_strided_slice %178 {offsets = [0, 0], sizes = [16, 32], strides = [1, 1]} : vector<16x64xf32> to vector<16x32xf32>
    %182 = vector.extract_strided_slice %180 {offsets = [0, 0], sizes = [16, 32], strides = [1, 1]} : vector<16x64xf32> to vector<16x32xf32>
    %183 = vector.extract_strided_slice %178 {offsets = [0, 32], sizes = [16, 32], strides = [1, 1]} : vector<16x64xf32> to vector<16x32xf32>
    %184 = arith.addf %181, %183 : vector<16x32xf32>
    %185 = vector.extract_strided_slice %180 {offsets = [0, 32], sizes = [16, 32], strides = [1, 1]} : vector<16x64xf32> to vector<16x32xf32>
    %186 = arith.addf %182, %185 : vector<16x32xf32>
    %cst_80 = arith.constant 5.000000e-01 : f32
    %187 = vector.broadcast %cst_80 : f32 to vector<16x32xf32>
    %188 = arith.mulf %184, %187 : vector<16x32xf32>
    %cst_81 = arith.constant 5.000000e-01 : f32
    %189 = vector.broadcast %cst_81 : f32 to vector<16x32xf32>
    %190 = arith.mulf %186, %189 : vector<16x32xf32>
    %cst_82 = arith.constant dense<0.000000e+00> : vector<16x256xf32>
    %191 = tpu.matmul %190, %5, %cst_82 {dimension_numbers = #tpu.dot_dimension_numbers<[1], [0], [0], [1], [0, 0, 1, 1], [], []>} : vector<16x32xf32>, vector<32x256xf32>, vector<16x256xf32> -> vector<16x256xf32>
    %192 = vector.broadcast %6 : vector<1x256xf32> to vector<16x256xf32>
    %193 = arith.addf %191, %192 : vector<16x256xf32>
    %cst_83 = arith.constant 0.000000e+00 : f32
    %194 = vector.broadcast %cst_83 : f32 to vector<16x256xf32>
    %195 = arith.maximumf %193, %194 : vector<16x256xf32>
    %196 = arith.addf %27, %195 : vector<16x256xf32>
    %197 = math.tanh %196 : vector<16x256xf32>
    %cst_84 = arith.constant dense<0.000000e+00> : vector<16x16xf32>
    %198 = tpu.matmul %197, %7, %cst_84 {dimension_numbers = #tpu.dot_dimension_numbers<[1], [0], [0], [1], [0, 0, 1, 1], [], []>} : vector<16x256xf32>, vector<256x16xf32>, vector<16x16xf32> -> vector<16x16xf32>
    %cst_85 = arith.constant dense<0xFF800000> : vector<16xf32>
    %199 = vector.multi_reduction <maximumf>, %198, %cst_85 [1] : vector<16x16xf32> to vector<16xf32>
    %200 = vector.shape_cast %199 : vector<16xf32> to vector<16x1xf32>
    %201 = vector.broadcast %200 : vector<16x1xf32> to vector<16x16xf32>
    %202 = arith.subf %198, %201 : vector<16x16xf32>
    %203 = math.exp %202 : vector<16x16xf32>
    %cst_86 = arith.constant dense<0.000000e+00> : vector<16xf32>
    %204 = vector.multi_reduction <add>, %203, %cst_86 [1] : vector<16x16xf32> to vector<16xf32>
    %205 = vector.shape_cast %204 : vector<16xf32> to vector<16x1xf32>
    %206 = tpu.reciprocal %205 {approx = true} : vector<16x1xf32> -> vector<16x1xf32>
    %207 = vector.broadcast %206 : vector<16x1xf32> to vector<16x16xf32>
    %208 = arith.mulf %203, %207 : vector<16x16xf32>
    %cst_87 = arith.constant dense<0.000000e+00> : vector<16x512xf32>
    %209 = tpu.matmul %208, %8, %cst_87 {dimension_numbers = #tpu.dot_dimension_numbers<[1], [0], [0], [1], [0, 0, 1, 1], [], []>} : vector<16x16xf32>, vector<16x512xf32>, vector<16x512xf32> -> vector<16x512xf32>
    %210 = arith.extf %20 : vector<16x512xbf16> to vector<16x512xf32>
    %211 = arith.mulf %209, %210 : vector<16x512xf32>
    %cst_88 = arith.constant dense<0.000000e+00> : vector<16x32xf32>
    %212 = tpu.matmul %211, %9, %cst_88 {dimension_numbers = #tpu.dot_dimension_numbers<[1], [0], [0], [1], [0, 0, 1, 1], [], []>} : vector<16x512xf32>, vector<512x32xf32>, vector<16x32xf32> -> vector<16x32xf32>
    %213 = vector.broadcast %12 : vector<1x32xf32> to vector<16x32xf32>
    %214 = arith.mulf %212, %213 : vector<16x32xf32>
    %215 = vector.broadcast %13 : vector<1x32xf32> to vector<16x32xf32>
    %216 = arith.addf %214, %215 : vector<16x32xf32>
    %cst_89 = arith.constant 0.000000e+00 : f32
    %217 = vector.broadcast %cst_89 : f32 to vector<16x32xf32>
    %218 = arith.maximumf %216, %217 : vector<16x32xf32>
    %219 = arith.addf %218, %190 : vector<16x32xf32>
    %220 = tpu.concatenate %93, %124, %188, %219 in 1 : vector<16x32xf32>, vector<16x32xf32>, vector<16x32xf32>, vector<16x32xf32> -> vector<16x128xf32>
    %c0_90 = arith.constant 0 : index
    %c0_91 = arith.constant 0 : index
    %221 = vector.load %arg24[%c0_90, %c0_91] : memref<16x128xf32, #tpu.memory_space<vmem>>, vector<16x128xf32>
    tpu.vector_store %arg24[%c0_90, %c0_91], %220 {strides = array<i32>} : memref<16x128xf32, #tpu.memory_space<vmem>>, vector<16x128xf32>,
    %222 = arith.truncf %219 : vector<16x32xf32> to vector<16x32xbf16>
    %cst_92 = arith.constant dense<0.000000e+00> : vector<16x128xf32>
    %223 = tpu.matmul %222, %18, %cst_92 {dimension_numbers = #tpu.dot_dimension_numbers<[1], [0], [0], [1], [0, 0, 1, 1], [], []>} : vector<16x32xbf16>, vector<32x128xbf16>, vector<16x128xf32> -> vector<16x128xf32>
    %224 = vector.broadcast %19 : vector<1x128xf32> to vector<16x128xf32>
    %225 = arith.addf %223, %224 : vector<16x128xf32>
    %cst_93 = arith.constant dense<0xFF800000> : vector<16xf32>
    %226 = vector.multi_reduction <maximumf>, %225, %cst_93 [1] : vector<16x128xf32> to vector<16xf32>
    %227 = vector.shape_cast %226 : vector<16xf32> to vector<16x1xf32>
    %228 = vector.broadcast %227 : vector<16x1xf32> to vector<16x128xf32>
    %229 = arith.subf %225, %228 : vector<16x128xf32>
    %230 = math.exp %229 : vector<16x128xf32>
    %cst_94 = arith.constant dense<0.000000e+00> : vector<16xf32>
    %231 = vector.multi_reduction <add>, %230, %cst_94 [1] : vector<16x128xf32> to vector<16xf32>
    %232 = vector.shape_cast %231 : vector<16xf32> to vector<16x1xf32>
    %233 = math.log %232 : vector<16x1xf32>
    %234 = arith.addf %227, %233 : vector<16x1xf32>
    %235 = vector.broadcast %234 : vector<16x1xf32> to vector<16x128xf32>
    %236 = arith.subf %225, %235 : vector<16x128xf32>
    %c0_95 = arith.constant 0 : index
    %c0_96 = arith.constant 0 : index
    %237 = vector.load %arg25[%c0_95, %c0_96] : memref<16x128xf32, #tpu.memory_space<vmem>>, vector<16x128xf32>
    tpu.vector_store %arg25[%c0_95, %c0_96], %236 {strides = array<i32>} : memref<16x128xf32, #tpu.memory_space<vmem>>, vector<16x128xf32>,
    return
  }
  func.func @transform_0(%arg0: i32) -> (i32, i32) {
    %c0_i32 = arith.constant 0 : i32
    %c0_i32_0 = arith.constant 0 : i32
    return %arg0, %c0_i32 : i32, i32
  }
  func.func @transform_1(%arg0: i32) -> (i32, i32) {
    %c0_i32 = arith.constant 0 : i32
    %c0_i32_0 = arith.constant 0 : i32
    return %arg0, %c0_i32 : i32, i32
  }
  func.func @transform_2(%arg0: i32) -> (i32, i32) {
    %c0_i32 = arith.constant 0 : i32
    %c0_i32_0 = arith.constant 0 : i32
    return %arg0, %c0_i32 : i32, i32
  }
  func.func @transform_3(%arg0: i32) -> (i32, i32) {
    %c0_i32 = arith.constant 0 : i32
    %c0_i32_0 = arith.constant 0 : i32
    %c0_i32_1 = arith.constant 0 : i32
    return %c0_i32, %c0_i32_0 : i32, i32
  }
  func.func @transform_4(%arg0: i32) -> (i32, i32) {
    %c0_i32 = arith.constant 0 : i32
    %c0_i32_0 = arith.constant 0 : i32
    %c0_i32_1 = arith.constant 0 : i32
    return %c0_i32, %c0_i32_0 : i32, i32
  }
  func.func @transform_5(%arg0: i32) -> (i32, i32) {
    %c0_i32 = arith.constant 0 : i32
    %c0_i32_0 = arith.constant 0 : i32
    %c0_i32_1 = arith.constant 0 : i32
    return %c0_i32, %c0_i32_0 : i32, i32
  }
  func.func @transform_6(%arg0: i32) -> (i32, i32) {
    %c0_i32 = arith.constant 0 : i32
    %c0_i32_0 = arith.constant 0 : i32
    %c0_i32_1 = arith.constant 0 : i32
    return %c0_i32, %c0_i32_0 : i32, i32
  }
  func.func @transform_7(%arg0: i32) -> (i32, i32) {
    %c0_i32 = arith.constant 0 : i32
    %c0_i32_0 = arith.constant 0 : i32
    %c0_i32_1 = arith.constant 0 : i32
    return %c0_i32, %c0_i32_0 : i32, i32
  }
  func.func @transform_8(%arg0: i32) -> (i32, i32) {
    %c0_i32 = arith.constant 0 : i32
    %c0_i32_0 = arith.constant 0 : i32
    %c0_i32_1 = arith.constant 0 : i32
    return %c0_i32, %c0_i32_0 : i32, i32
  }
  func.func @transform_9(%arg0: i32) -> (i32, i32) {
    %c0_i32 = arith.constant 0 : i32
    %c0_i32_0 = arith.constant 0 : i32
    %c0_i32_1 = arith.constant 0 : i32
    return %c0_i32, %c0_i32_0 : i32, i32
  }
  func.func @transform_10(%arg0: i32) -> (i32, i32) {
    %c0_i32 = arith.constant 0 : i32
    %c0_i32_0 = arith.constant 0 : i32
    %c0_i32_1 = arith.constant 0 : i32
    return %c0_i32, %c0_i32_0 : i32, i32
  }
  func.func @transform_11(%arg0: i32) -> (i32, i32) {
    %c0_i32 = arith.constant 0 : i32
    %c0_i32_0 = arith.constant 0 : i32
    %c0_i32_1 = arith.constant 0 : i32
    return %c0_i32, %c0_i32_0 : i32, i32
  }
  func.func @transform_12(%arg0: i32) -> (i32, i32) {
    %c0_i32 = arith.constant 0 : i32
    %c0_i32_0 = arith.constant 0 : i32
    %c0_i32_1 = arith.constant 0 : i32
    return %c0_i32, %c0_i32_0 : i32, i32
  }
  func.func @transform_13(%arg0: i32) -> (i32, i32) {
    %c0_i32 = arith.constant 0 : i32
    %c0_i32_0 = arith.constant 0 : i32
    %c0_i32_1 = arith.constant 0 : i32
    return %c0_i32, %c0_i32_0 : i32, i32
  }
  func.func @transform_14(%arg0: i32) -> (i32, i32) {
    %c0_i32 = arith.constant 0 : i32
    %c0_i32_0 = arith.constant 0 : i32
    %c0_i32_1 = arith.constant 0 : i32
    return %c0_i32, %c0_i32_0 : i32, i32
  }
  func.func @transform_15(%arg0: i32) -> (i32, i32) {
    %c0_i32 = arith.constant 0 : i32
    %c0_i32_0 = arith.constant 0 : i32
    %c0_i32_1 = arith.constant 0 : i32
    return %c0_i32, %c0_i32_0 : i32, i32
  }
  func.func @transform_16(%arg0: i32) -> (i32, i32) {
    %c0_i32 = arith.constant 0 : i32
    %c0_i32_0 = arith.constant 0 : i32
    %c0_i32_1 = arith.constant 0 : i32
    return %c0_i32, %c0_i32_0 : i32, i32
  }
  func.func @transform_17(%arg0: i32) -> (i32, i32) {
    %c0_i32 = arith.constant 0 : i32
    %c0_i32_0 = arith.constant 0 : i32
    %c0_i32_1 = arith.constant 0 : i32
    return %c0_i32, %c0_i32_0 : i32, i32
  }
  func.func @transform_18(%arg0: i32) -> (i32, i32) {
    %c0_i32 = arith.constant 0 : i32
    %c0_i32_0 = arith.constant 0 : i32
    %c0_i32_1 = arith.constant 0 : i32
    return %c0_i32, %c0_i32_0 : i32, i32
  }
  func.func @transform_19(%arg0: i32) -> (i32, i32) {
    %c0_i32 = arith.constant 0 : i32
    %c0_i32_0 = arith.constant 0 : i32
    %c0_i32_1 = arith.constant 0 : i32
    return %c0_i32, %c0_i32_0 : i32, i32
  }
  func.func @transform_20(%arg0: i32) -> (i32, i32) {
    %c0_i32 = arith.constant 0 : i32
    %c0_i32_0 = arith.constant 0 : i32
    %c0_i32_1 = arith.constant 0 : i32
    return %c0_i32, %c0_i32_0 : i32, i32
  }
  func.func @transform_21(%arg0: i32) -> (i32, i32) {
    %c0_i32 = arith.constant 0 : i32
    %c0_i32_0 = arith.constant 0 : i32
    %c0_i32_1 = arith.constant 0 : i32
    return %c0_i32, %c0_i32_0 : i32, i32
  }
  func.func @transform_22(%arg0: i32) -> (i32, i32) {
    %c0_i32 = arith.constant 0 : i32
    %c0_i32_0 = arith.constant 0 : i32
    %c0_i32_1 = arith.constant 0 : i32
    return %c0_i32, %c0_i32_0 : i32, i32
  }
  func.func @transform_23(%arg0: i32) -> (i32, i32) {
    %c0_i32 = arith.constant 0 : i32
    %c0_i32_0 = arith.constant 0 : i32
    return %arg0, %c0_i32 : i32, i32
  }
  func.func @transform_24(%arg0: i32) -> (i32, i32) {
    %c0_i32 = arith.constant 0 : i32
    %c0_i32_0 = arith.constant 0 : i32
    return %arg0, %c0_i32 : i32, i32
  }
}

</mosaic_0001>

<bundles_post_ra>
// kernel: tpu_custom_call.1
= control target key start
LH: loop header
LB: loop body
LE: loop exit
PB: predicated region body
PF: predicated region fallthrough
CT: control target
= control target key end

     0   :  { %s8191_s0 = inlined_call_operand.hbm [shape: bf16[16,32], index: 0, kind: input, shape index: {}]   ;;  %s8192_s1 = inlined_call_operand.hbm [shape: bf16[16,512], index: 1, kind: input, shape index: {}]   ;;  %s8193_s2 = inlined_call_operand.hbm [shape: f32[16,128], index: 2, kind: input, shape index: {}]   ;;  %s8194_s3 = inlined_call_operand.vmem [shape: bf16[512,512], index: 3, kind: input, shape index: {}]   ;;  %s8195_s4 = inlined_call_operand.vmem [shape: f32[1,512], index: 4, kind: input, shape index: {}]   ;;  %s8196_s5 = inlined_call_operand.vmem [shape: f32[32,256], index: 5, kind: input, shape index: {}]   ;;  %s8197_s6 = inlined_call_operand.vmem [shape: f32[1,256], index: 6, kind: input, shape index: {}]   ;;  %s8198_s7 = inlined_call_operand.vmem [shape: f32[256,16], index: 7, kind: input, shape index: {}]   ;;  %s8199_s8 = inlined_call_operand.hbm [shape: f32[32,256], index: 8, kind: input, shape index: {}]   ;;  %s8200_s9 = inlined_call_operand.vmem [shape: f32[1,256], index: 9, kind: input, shape index: {}]   ;;  %s8201_s10 = inlined_call_operand.vmem [shape: f32[256,16], index: 10, kind: input, shape index: {}]   ;;  %s8202_s11 = inlined_call_operand.hbm [shape: f32[16,512], index: 11, kind: input, shape index: {}]   ;;  %s8203_s12 = inlined_call_operand.vmem [shape: f32[512,32], index: 12, kind: input, shape index: {}]   ;;  %s8204_s13 = inlined_call_operand.vmem [shape: f32[1,32], index: 13, kind: input, shape index: {}]   ;;  %s8205_s14 = inlined_call_operand.hbm [shape: f32[1,32], index: 14, kind: input, shape index: {}]   ;;  %s8206_s15 = inlined_call_operand.hbm [shape: f32[1,32], index: 15, kind: input, shape index: {}]   ;;  %s8207_s16 = inlined_call_operand.hbm [shape: f32[1,32], index: 16, kind: input, shape index: {}]   ;;  %s8208_s17 = inlined_call_operand.hbm [shape: bf16[32,256], index: 17, kind: input, shape index: {}]   ;;  %s8209_s18 = inlined_call_operand.hbm [shape: bf16[32,256], index: 18, kind: input, shape index: {}]   ;;  %s8210_s19 = inlined_call_operand.hbm [shape: bf16[32,256], index: 19, kind: input, shape index: {}]   ;;  %s8211_s20 = inlined_call_operand.hbm [shape: f32[1,256], index: 20, kind: input, shape index: {}]   ;;  %s8212_s21 = inlined_call_operand.vmem [shape: bf16[32,128], index: 21, kind: input, shape index: {}]   ;;  %s8213_s22 = inlined_call_operand.vmem [shape: f32[1,128], index: 22, kind: input, shape index: {}]   ;;  %s8214_s23 = inlined_call_operand.hbm [shape: f32[16,128], index: 23, kind: output, shape index: {0}]   ;;  %s8215_s24 = inlined_call_operand.hbm [shape: f32[16,128], index: 24, kind: output, shape index: {1}]  }
   0x1   :  { %8385 = sst [smem:[#allocation116_spill]] %s8191_s0 }
   0x2   :  { %8386 = sst [smem:[#allocation117_spill]] %s8192_s1 }
   0x3   :  { %8387 = sst [smem:[#allocation118_spill]] %s8193_s2 }
   0x4   :  { %8388 = sst [smem:[#allocation119_spill]] %s8194_s3 }
   0x5   :  { %8389 = sst [smem:[#allocation120_spill]] %s8195_s4 }
   0x6   :  { %8390 = sst [smem:[#allocation121_spill]] %s8196_s5 }
   0x7   :  { %8391 = sst [smem:[#allocation122_spill]] %s8197_s6 }
   0x8   :  { %8392 = sst [smem:[#allocation123_spill]] %s8198_s7 }
   0x9   :  { %8393 = sst [smem:[#allocation124_spill]] %s8199_s8 }
   0xa   :  { %30 = vsyncpa [#allocation3], 0 }
   0xb   :  { %31 = vsyncpa [#allocation6], 0 }
   0xc   :  { %32 = vsyncpa [#allocation9], 0 }
   0xd   :  { %33 = vsyncpa [#allocation12], 0 }
   0xe   :  { %34 = vsyncpa [#allocation15], 0 }
   0xf   :  { %35 = vsyncpa [#allocation18], 0 }
  0x10   :  { %36 = vsyncpa [#allocation21], 0 }
  0x11   :  { %37 = vsyncpa [#allocation4], 0 }
  0x12   :  { %38 = vsyncpa [#allocation24], 0  ;;  %s5740_s5 = smov [#allocation5]  }
  0x13   :  { %s56_s26 = sshll.u32 %s5740_s5, 4  ;;  %s57_s26 = int_to_ptr.vmem [resolvable:$true] %s56_s26 }
  0x14   :  { %s5450_s27 = scalar_lea.vmem %s57_s26, 512  ;;  %p5455_p1 = scmp.lt.s32.totalorder %s57_s26, %s57_s26 }
  0x15   :  { %p5451_p0 = scmp.ne.s32.totalorder %s57_s26, %s5450_s27  ;;  %p5456_p2 = scmp.lt.s32.totalorder %s5450_s27, %s5450_s27 }
  0x17   :  { %p5457_p3 = por %p5456_p2, %p5455_p1 }
  0x19   :  { %p5458_p4 = pnand %p5457_p3, %p5451_p0 }
  0x1b   :  { %5461 = shalt.err (!%p5458_p4)
}
  0x1c   :  { %s5741_s28 = smov 256   ;;  %s5742_s6 = smov 16  }
  0x1d   :  { %s8394_s0 = sld [smem:[#allocation117_spill]]  ;;  %s5743_s7 = smov [#allocation8]  }
  0x1e   :  { %s90_s30 = sshll.u32 %s5743_s7, 4  ;;  %s5744_s3 = smov [#allocation11]   ;;  %s91_s30 = int_to_ptr.vmem [resolvable:$true] %s90_s30 }
  0x1f   :  { %s123_s25 = sshll.u32 %s5744_s3, 4  ;;  %s5470_s8 = scalar_lea.vmem %s91_s30, 1024  ;;  %s124_s25 = int_to_ptr.vmem [resolvable:$true] %s123_s25 }
  0x20   :  { %p5471_p5 = scmp.ne.s32.totalorder %s91_s30, %s5470_s8  ;;  %p5475_p6 = scmp.lt.s32.totalorder %s91_s30, %s91_s30 }
  0x21   :  { %p5476_p7 = scmp.lt.s32.totalorder %s5470_s8, %s5470_s8 }
  0x23   :  { %62 = dma.hbm_to_vmem [thread:$0]  %s8394_s0, 512, %s57_s26, [#allocation6], %s5741_s28, %s5741_s28, %s5742_s6  }
  0x24   :  { %p5477_p8 = por %p5476_p7, %p5475_p6 }
  0x26   :  { %p5478_p9 = pnand %p5477_p8, %p5471_p5 }
  0x28   :  { %5481 = shalt.err (!%p5478_p9)
}
  0x29   :  { %s8395_s5 = sld [smem:[#allocation124_spill]]  ;;  %s5490_s27 = scalar_lea.vmem %s124_s25, 16 }
  0x2a   :  { %p5491_p10 = scmp.ne.s32.totalorder %s124_s25, %s5490_s27  ;;  %s5494_s26 = scalar_lea.vmem %s124_s25, 32 }
  0x2b   :  { %p5495_p11 = scmp.lt.s32.totalorder %s124_s25, %s124_s25  ;;  %p5496_p12 = scmp.lt.s32.totalorder %s5494_s26, %s5490_s27 }
  0x2d   :  { %p5497_p13 = por %p5496_p12, %p5495_p11 }
  0x2f   :  { %96 = dma.hbm_to_vmem [thread:$0]  %s8395_s5, 1024, %s91_s30, [#allocation9], %s5741_s28, %s5741_s28, %s5742_s6  }
  0x30   :  { %p5498_p0 = pnand %p5497_p13, %p5491_p10 }
  0x32   :  { %5501 = shalt.err (!%p5498_p0)
}
  0x33   :  { %126 = dma.hbm_to_vmem [thread:$0]  %s8205_s14, 16, %s124_s25, [#allocation12]  }
  0x34   :  { %s5745_s0 = smov [#allocation14]  }
  0x35   :  { %s143_s7 = sshll.u32 %s5745_s0, 4  ;;  %s144_s7 = int_to_ptr.vmem [resolvable:$true] %s143_s7 }
  0x36   :  { %s5510_s3 = scalar_lea.vmem %s144_s7, 16  ;;  %s5514_s8 = scalar_lea.vmem %s144_s7, 32 }
  0x37   :  { %p5511_p1 = scmp.ne.s32.totalorder %s144_s7, %s5510_s3  ;;  %p5515_p2 = scmp.lt.s32.totalorder %s144_s7, %s144_s7 }
  0x38   :  { %p5516_p3 = scmp.lt.s32.totalorder %s5514_s8, %s5510_s3 }
  0x3a   :  { %p5517_p4 = por %p5516_p3, %p5515_p2 }
  0x3c   :  { %p5518_p5 = pnand %p5517_p4, %p5511_p1 }
  0x3e   :  { %5521 = shalt.err (!%p5518_p5)
}
  0x3f   :  { %146 = dma.hbm_to_vmem [thread:$0]  %s8207_s16, 16, %s144_s7, [#allocation15]  }
  0x40   :  { %s5746_s30 = smov [#allocation17]   ;;  %s5747_s1 = smov [#allocation2]  }
  0x41   :  { %s164_s4 = sshll.u32 %s5746_s30, 4  ;;  %s44_s5 = sshll.u32 %s5747_s1, 4  ;;  %s165_s4 = int_to_ptr.vmem [resolvable:$true] %s164_s4  ;;  %s45_s5 = int_to_ptr.vmem [resolvable:$true] %s44_s5 }
  0x42   :  { %s5530_s14 = scalar_lea.vmem %s165_s4, 512  ;;  %p5535_p7 = scmp.lt.s32.totalorder %s165_s4, %s165_s4 }
  0x43   :  { %p5531_p6 = scmp.ne.s32.totalorder %s165_s4, %s5530_s14  ;;  %p5536_p8 = scmp.lt.s32.totalorder %s5530_s14, %s5530_s14 }
  0x45   :  { %p5537_p9 = por %p5536_p8, %p5535_p7 }
  0x47   :  { %p5538_p10 = pnand %p5537_p9, %p5531_p6 }
  0x49   :  { %5541 = shalt.err (!%p5538_p10)
}
  0x4a   :  { %s5748_s25 = smov 128   ;;  %s5749_s27 = smov 8  }
  0x4b   :  { %170 = dma.hbm_to_vmem [thread:$0]  %s8209_s18, 512, %s165_s4, [#allocation18], %s5748_s25, %s5748_s25, %s5749_s27  }
  0x4c   :  { %s5550_s2 = scalar_lea.vmem %s45_s5, 128  ;;  %p5555_p12 = scmp.lt.s32.totalorder %s45_s5, %s45_s5 }
  0x4d   :  { %p5551_p11 = scmp.ne.s32.totalorder %s45_s5, %s5550_s2  ;;  %p5556_p13 = scmp.lt.s32.totalorder %s5550_s2, %s5550_s2 }
  0x4f   :  { %p5557_p0 = por %p5556_p13, %p5555_p12 }
  0x51   :  { %p5558_p1 = pnand %p5557_p0, %p5551_p11 }
  0x53   :  { %5561 = shalt.err (!%p5558_p1)
}
  0x54   :  { %s5750_s29 = smov 64   ;;  %s5751_s0 = smov 4  }
  0x55   :  { %s8396_s8 = sld [smem:[#allocation116_spill]]  ;;  %s5752_s28 = smov [#allocation7]  }
  0x56   :  { %s68_s6 = sshll.u32 %s5752_s28, 4  ;;  %s5753_s30 = smov [#allocation10]   ;;  %s69_s6 = int_to_ptr.vmem [resolvable:$true] %s68_s6 }
  0x57   :  { %s106_s1 = sshll.u32 %s5753_s30, 4  ;;  %s5570_s18 = scalar_lea.vmem %s69_s6, 256  ;;  %s107_s1 = int_to_ptr.vmem [resolvable:$true] %s106_s1 }
  0x58   :  { %p5571_p2 = scmp.ne.s32.totalorder %s69_s6, %s5570_s18  ;;  %p5575_p3 = scmp.lt.s32.totalorder %s69_s6, %s69_s6 }
  0x59   :  { %p5576_p4 = scmp.lt.s32.totalorder %s5570_s18, %s5570_s18 }
  0x5b   :  { %50 = dma.hbm_to_vmem [thread:$0]  %s8396_s8, 128, %s45_s5, [#allocation3], %s5750_s29, %s5750_s29, %s5751_s0  }
  0x5c   :  { %p5577_p5 = por %p5576_p4, %p5575_p3 }
  0x5e   :  { %p5578_p6 = pnand %p5577_p5, %p5571_p2 }
  0x60   :  { %5581 = shalt.err (!%p5578_p6)
}
  0x61   :  { %s8397_s26 = sld [smem:[#allocation118_spill]]  ;;  %s5590_s5 = scalar_lea.vmem %s107_s1, 1024 }
  0x62   :  { %p5591_p7 = scmp.ne.s32.totalorder %s107_s1, %s5590_s5  ;;  %p5595_p8 = scmp.lt.s32.totalorder %s107_s1, %s107_s1 }
  0x63   :  { %p5596_p9 = scmp.lt.s32.totalorder %s5590_s5, %s5590_s5 }
  0x65   :  { %p5597_p10 = por %p5596_p9, %p5595_p8 }
  0x67   :  { %74 = dma.hbm_to_vmem [thread:$0]  %s8397_s26, 256, %s69_s6, [#allocation6], %s5748_s25, %s5748_s25, %s5749_s27  }
  0x68   :  { %p5598_p11 = pnand %p5597_p10, %p5591_p7 }
  0x6a   :  { %5601 = shalt.err (!%p5598_p11)
}
  0x6b   :  { %s5754_s16 = smov 512   ;;  %s5755_s2 = smov 32  }
  0x6c   :  { %112 = dma.hbm_to_vmem [thread:$0]  %s8202_s11, 1024, %s107_s1, [#allocation9], %s5754_s16, %s5754_s16, %s5755_s2  }
  0x6d   :  { %s5756_s3 = smov [#allocation13]   ;;  %s5757_s28 = smov [#allocation16]  }
  0x6e   :  { %s133_s8 = sshll.u32 %s5756_s3, 4  ;;  %s152_s30 = sshll.u32 %s5757_s28, 4  ;;  %s134_s8 = int_to_ptr.vmem [resolvable:$true] %s133_s8  ;;  %s153_s30 = int_to_ptr.vmem [resolvable:$true] %s152_s30 }
  0x6f   :  { %s5610_s6 = scalar_lea.vmem %s134_s8, 16  ;;  %s5614_s18 = scalar_lea.vmem %s134_s8, 32 }
  0x70   :  { %p5611_p12 = scmp.ne.s32.totalorder %s134_s8, %s5610_s6  ;;  %p5615_p13 = scmp.lt.s32.totalorder %s134_s8, %s134_s8 }
  0x71   :  { %p5616_p0 = scmp.lt.s32.totalorder %s5614_s18, %s5610_s6 }
  0x73   :  { %p5617_p1 = por %p5616_p0, %p5615_p13 }
  0x75   :  { %p5618_p2 = pnand %p5617_p1, %p5611_p12 }
  0x77   :  { %5621 = shalt.err (!%p5618_p2)
}
  0x78   :  { %136 = dma.hbm_to_vmem [thread:$0]  %s8206_s15, 16, %s134_s8, [#allocation12]  }
  0x79   :  { %s5630_s26 = scalar_lea.vmem %s153_s30, 512  ;;  %p5635_p4 = scmp.lt.s32.totalorder %s153_s30, %s153_s30 }
  0x7a   :  { %p5631_p3 = scmp.ne.s32.totalorder %s153_s30, %s5630_s26  ;;  %p5636_p5 = scmp.lt.s32.totalorder %s5630_s26, %s5630_s26 }
  0x7c   :  { %p5637_p6 = por %p5636_p5, %p5635_p4 }
  0x7e   :  { %p5638_p7 = pnand %p5637_p6, %p5631_p3 }
  0x80   :  { %5641 = shalt.err (!%p5638_p7)
}
  0x81   :  { %158 = dma.hbm_to_vmem [thread:$0]  %s8208_s17, 512, %s153_s30, [#allocation15], %s5748_s25, %s5748_s25, %s5749_s27  }
  0x82   :  { %s5758_s5 = smov [#allocation19]   ;;  %s5759_s0 = smov [#allocation20]  }
  0x83   :  { %s176_s16 = sshll.u32 %s5758_s5, 4  ;;  %s189_s7 = sshll.u32 %s5759_s0, 4  ;;  %s177_s16 = int_to_ptr.vmem [resolvable:$true] %s176_s16  ;;  %s190_s7 = int_to_ptr.vmem [resolvable:$true] %s189_s7 }
  0x84   :  { %s5650_s15 = scalar_lea.vmem %s177_s16, 512  ;;  %p5655_p9 = scmp.lt.s32.totalorder %s177_s16, %s177_s16 }
  0x85   :  { %p5651_p8 = scmp.ne.s32.totalorder %s177_s16, %s5650_s15  ;;  %p5656_p10 = scmp.lt.s32.totalorder %s5650_s15, %s5650_s15 }
  0x87   :  { %p5657_p11 = por %p5656_p10, %p5655_p9 }
  0x89   :  { %p5658_p12 = pnand %p5657_p11, %p5651_p8 }
  0x8b   :  { %5661 = shalt.err (!%p5658_p12)
}
  0x8c   :  { %182 = dma.hbm_to_vmem [thread:$0]  %s8210_s19, 512, %s177_s16, [#allocation18], %s5748_s25, %s5748_s25, %s5749_s27  }
  0x8d   :  { %s5670_s17 = scalar_lea.vmem %s190_s7, 32  ;;  %p5675_p0 = scmp.lt.s32.totalorder %s190_s7, %s190_s7 }
  0x8e   :  { %p5671_p13 = scmp.ne.s32.totalorder %s190_s7, %s5670_s17  ;;  %p5676_p1 = scmp.lt.s32.totalorder %s5670_s17, %s5670_s17 }
  0x90   :  { %p5677_p2 = por %p5676_p1, %p5675_p0 }
  0x92   :  { %p5678_p3 = pnand %p5677_p2, %p5671_p13 }
  0x94   :  { %5681 = shalt.err (!%p5678_p3)
}
  0x95   :  { %192 = dma.hbm_to_vmem [thread:$0]  %s8211_s20, 32, %s190_s7, [#allocation21]  }
  0x96   :  { %5722 = dma.done.wait [#allocation3], 128  }
  0x97   :  { %5723 = vsyncadd [#allocation3], 4294967168 }
  0x98   :  { %5724 = dma.done.wait [#allocation6], 768  }
  0x99   :  { %5725 = vsyncadd [#allocation6], 4294966528 }
  0x9a   :  { %5726 = dma.done.wait [#allocation9], 2048  }
  0x9b   :  { %5727 = vsyncadd [#allocation9], 4294965248 }
  0x9c   :  { %5728 = dma.done.wait [#allocation12], 32  }
  0x9d   :  { %5729 = vsyncadd [#allocation12], 4294967264 }
  0x9e   :  { %5730 = dma.done.wait [#allocation15], 528  }
  0x9f   :  { %5731 = vsyncadd [#allocation15], 4294966768 }
  0xa0   :  { %5732 = dma.done.wait [#allocation18], 1024  }
  0xa1   :  { %5733 = vsyncadd [#allocation18], 4294966272 }
  0xa2   :  { %5734 = dma.done.wait [#allocation21], 32  }
  0xa3   :  { %5735 = vsyncadd [#allocation21], 4294967264  ;;  %s8398_s18 = sld [smem:[#allocation119_spill]]  ;;  %v1404_v20 = vld [vmem:[#allocation7] sm:$0xff]  ;;  %s5760_s5 = smov 96   ;;  %v1405_v24 = vld [vmem:[#allocation7 + $0x8] sm:$0xff] }
  0xa4   :  { %1504 = vrot.lane.b32.xlu0 %v1404_v20, %s5760_s5  ;;  %v539_v50 = vld [vmem:[#allocation5] sm:$0xff]  ;;  %v541_v51 = vld [vmem:[#allocation5 + $0x10] sm:$0xff]  ;;  %v540_v53 = vld [vmem:[#allocation5 + $0x8] sm:$0xff]  ;;  %s8399_s6 = sld [smem:[#allocation121_spill]]  ;;  %vm1444_vm0 = vcmask 261120   ;;  %vm1676_vm1 = vcmask 130048  }
  0xa5   :  { %v4278_v52 = vcombine.high %v539_v50, %v541_v51  ;;  %v542_v54 = vld [vmem:[#allocation5 + $0x18] sm:$0xff]  ;;  %s8402_s19 = sld [smem:[#allocation123_spill]]  ;;  %vm5763_vm2 = vmmov 0   ;;  %vm4143_vm3 = vcmask 523264   ;;  %vm4146_vm4 = vcmask 785408  }
  0xa6   :  { %v4280_v57 = vcombine.high %v540_v53, %v542_v54  ;;  %s8403_s4 = sld [smem:[#allocation120_spill]] }
  0xa7   :  { %1256 = vmatprep.mubr.bf16.mxu0 %v4278_v52  ;;  %s8404_s26 = sld [smem:[#allocation122_spill]] }
  0xa8   :  { %1506 = vrot.lane.b32.xlu0 %v1405_v24, %s5760_s5  ;;  %1299 = vmatprep.mubr.bf16.mxu1 %v4280_v57 }
  0xa9   :  { %v4961_v0 = vld [vmem:[%s8398_s18 + $0xe4] ss:$16 sps:$4 sm:$0xff]   ;;  %v4965_v2 = vld [vmem:[%s8398_s18 + $0xe0] ss:$16 sps:$4 sm:$0xff]   ;;  %v5073_v20 = vld [vmem:[%s8398_s18 + $0xa8] ss:$16 sps:$4 sm:$0xff]  }
  0xaa   :  { %v4963_v1 = vld [vmem:[%s8398_s18 + $0x2e4] ss:$16 sps:$4 sm:$0xff]   ;;  %1224 = vmatprep.subr.bf16.mxu0 %v4961_v0  ;;  %v4966_v3 = vld [vmem:[%s8398_s18 + $0x2e0] ss:$16 sps:$4 sm:$0xff]   ;;  %v5079_v24 = vld [vmem:[%s8398_s18 + $0x88] ss:$16 sps:$4 sm:$0xff]  }
  0xab   :  { %1267 = vmatprep.subr.bf16.mxu1 %v4963_v1  ;;  %v4967_v4 = vld [vmem:[%s8398_s18 + $0xc4] ss:$16 sps:$4 sm:$0xff]   ;;  %1225 = vmatpush1.bf16.msra.mxu0 %v4965_v2  ;;  %v4971_v6 = vld [vmem:[%s8398_s18 + $0xc0] ss:$16 sps:$4 sm:$0xff]  }
  0xac   :  { %1268 = vmatpush1.bf16.msra.mxu1 %v4966_v3  ;;  %v4969_v5 = vld [vmem:[%s8398_s18 + $0x2c4] ss:$16 sps:$4 sm:$0xff]   ;;  %1226 = vmatprep.subr.bf16.mxu0 %v4967_v4  ;;  %v4972_v7 = vld [vmem:[%s8398_s18 + $0x2c0] ss:$16 sps:$4 sm:$0xff]  }
  0xad   :  { %1269 = vmatprep.subr.bf16.mxu1 %v4969_v5  ;;  %v4973_v8 = vld [vmem:[%s8398_s18 + $0xa4] ss:$16 sps:$4 sm:$0xff]   ;;  %v4977_v10 = vld [vmem:[%s8398_s18 + $0xa0] ss:$16 sps:$4 sm:$0xff]  }
  0xae   :  { %v4975_v9 = vld [vmem:[%s8398_s18 + $0x2a4] ss:$16 sps:$4 sm:$0xff]   ;;  %v4978_v11 = vld [vmem:[%s8398_s18 + $0x2a0] ss:$16 sps:$4 sm:$0xff]  }
  0xaf   :  { %1227 = vmatpush1.bf16.msra.mxu0 %v4971_v6  ;;  %v4979_v12 = vld [vmem:[%s8398_s18 + $0x84] ss:$16 sps:$4 sm:$0xff]   ;;  %v4983_v14 = vld [vmem:[%s8398_s18 + $0x80] ss:$16 sps:$4 sm:$0xff]  }
  0xb0   :  { %1270 = vmatpush1.bf16.msra.mxu1 %v4972_v7  ;;  %1228 = vmatprep.subr.bf16.mxu0 %v4973_v8  ;;  %v4981_v13 = vld [vmem:[%s8398_s18 + $0x284] ss:$16 sps:$4 sm:$0xff]   ;;  %v4984_v15 = vld [vmem:[%s8398_s18 + $0x280] ss:$16 sps:$4 sm:$0xff]   ;;  %v5063_v8 = vld [vmem:[%s8398_s18 + $0xec] ss:$16 sps:$4 sm:$0xff]  }
  0xb1   :  { %1271 = vmatprep.subr.bf16.mxu1 %v4975_v9  ;;  %v4985_v16 = vld [vmem:[%s8398_s18 + $0x64] ss:$16 sps:$4 sm:$0xff]   ;;  %v4989_v18 = vld [vmem:[%s8398_s18 + $0x60] ss:$16 sps:$4 sm:$0xff]   ;;  %v5066_v9 = vld [vmem:[%s8398_s18 + $0x2ec] ss:$16 sps:$4 sm:$0xff]  }
  0xb2   :  { %v4987_v17 = vld [vmem:[%s8398_s18 + $0x264] ss:$16 sps:$4 sm:$0xff]   ;;  %v4990_v19 = vld [vmem:[%s8398_s18 + $0x260] ss:$16 sps:$4 sm:$0xff]  }
  0xb3   :  { %1229 = vmatpush1.bf16.msra.mxu0 %v4977_v10  ;;  %v4991_v21 = vld [vmem:[%s8398_s18 + $0x44] ss:$16 sps:$4 sm:$0xff]   ;;  %v4995_v23 = vld [vmem:[%s8398_s18 + $0x40] ss:$16 sps:$4 sm:$0xff]   ;;  %v6142_v10 = vcombine.low %v539_v50, %v541_v51  ;;  %v5123_v50 = vld [vmem:[%s8398_s18 + $0x1ac] ss:$16 sps:$4 sm:$0xff]  }
  0xb4   :  { %1272 = vmatpush1.bf16.msra.mxu1 %v4978_v11  ;;  %1230 = vmatprep.subr.bf16.mxu0 %v4979_v12  ;;  %v4993_v22 = vld [vmem:[%s8398_s18 + $0x244] ss:$16 sps:$4 sm:$0xff]   ;;  %v4996_v25 = vld [vmem:[%s8398_s18 + $0x240] ss:$16 sps:$4 sm:$0xff]   ;;  %v6144_v11 = vcombine.low %v540_v53, %v542_v54  ;;  %v5061_v12 = vld [vmem:[%s8398_s18 + $0xe8] ss:$16 sps:$4 sm:$0xff]  }
  0xb5   :  { %1273 = vmatprep.subr.bf16.mxu1 %v4981_v13  ;;  %v4997_v26 = vld [vmem:[%s8398_s18 + $0x24] ss:$16 sps:$4 sm:$0xff]   ;;  %v5001_v28 = vld [vmem:[%s8398_s18 + $0x20] ss:$16 sps:$4 sm:$0xff]   ;;  %v5064_v13 = vld [vmem:[%s8398_s18 + $0x2e8] ss:$16 sps:$4 sm:$0xff]  }
  0xb6   :  { %v4999_v27 = vld [vmem:[%s8398_s18 + $0x224] ss:$16 sps:$4 sm:$0xff]   ;;  %v5002_v29 = vld [vmem:[%s8398_s18 + $0x220] ss:$16 sps:$4 sm:$0xff]   ;;  %v5126_v51 = vld [vmem:[%s8398_s18 + $0x3ac] ss:$16 sps:$4 sm:$0xff]  }
  0xb7   :  { %1231 = vmatpush1.bf16.msra.mxu0 %v4983_v14  ;;  %v5003_v30 = vld [vmem:[%s8398_s18 + $0x4] ss:$16 sps:$4 sm:$0xff]   ;;  %v5007_v32 = vld [vmem:[%s8398_s18] ss:$16 sps:$4 sm:$0xff]   ;;  %v5069_v14 = vld [vmem:[%s8398_s18 + $0xcc] ss:$16 sps:$4 sm:$0xff]  }
  0xb8   :  { %1274 = vmatpush1.bf16.msra.mxu1 %v4984_v15  ;;  %1232 = vmatprep.subr.bf16.mxu0 %v4985_v16  ;;  %v5005_v31 = vld [vmem:[%s8398_s18 + $0x204] ss:$16 sps:$4 sm:$0xff]   ;;  %v5008_v33 = vld [vmem:[%s8398_s18 + $0x200] ss:$16 sps:$4 sm:$0xff]   ;;  %v5072_v15 = vld [vmem:[%s8398_s18 + $0x2cc] ss:$16 sps:$4 sm:$0xff]  }
  0xb9   :  { %1275 = vmatprep.subr.bf16.mxu1 %v4987_v17  ;;  %v5009_v34 = vld [vmem:[%s8398_s18 + $0x1e4] ss:$16 sps:$4 sm:$0xff]   ;;  %v5013_v36 = vld [vmem:[%s8398_s18 + $0x1e0] ss:$16 sps:$4 sm:$0xff]   ;;  %v5067_v16 = vld [vmem:[%s8398_s18 + $0xc8] ss:$16 sps:$4 sm:$0xff]  }
  0xba   :  { %v5011_v35 = vld [vmem:[%s8398_s18 + $0x3e4] ss:$16 sps:$4 sm:$0xff]   ;;  %v5014_v37 = vld [vmem:[%s8398_s18 + $0x3e0] ss:$16 sps:$4 sm:$0xff]   ;;  %v5070_v17 = vld [vmem:[%s8398_s18 + $0x2c8] ss:$16 sps:$4 sm:$0xff]  }
  0xbb   :  { %1233 = vmatpush1.bf16.msra.mxu0 %v4989_v18  ;;  %v5015_v38 = vld [vmem:[%s8398_s18 + $0x1c4] ss:$16 sps:$4 sm:$0xff]   ;;  %v5019_v40 = vld [vmem:[%s8398_s18 + $0x1c0] ss:$16 sps:$4 sm:$0xff]   ;;  %v5075_v18 = vld [vmem:[%s8398_s18 + $0xac] ss:$16 sps:$4 sm:$0xff]  }
  0xbc   :  { %1276 = vmatpush1.bf16.msra.mxu1 %v4990_v19  ;;  %1234 = vmatprep.subr.bf16.mxu0 %v4991_v21  ;;  %v5017_v39 = vld [vmem:[%s8398_s18 + $0x3c4] ss:$16 sps:$4 sm:$0xff]   ;;  %v5020_v41 = vld [vmem:[%s8398_s18 + $0x3c0] ss:$16 sps:$4 sm:$0xff]   ;;  %v5078_v19 = vld [vmem:[%s8398_s18 + $0x2ac] ss:$16 sps:$4 sm:$0xff]  }
  0xbd   :  { %1277 = vmatprep.subr.bf16.mxu1 %v4993_v22  ;;  %v5021_v42 = vld [vmem:[%s8398_s18 + $0x1a4] ss:$16 sps:$4 sm:$0xff]   ;;  %v5025_v44 = vld [vmem:[%s8398_s18 + $0x1a0] ss:$16 sps:$4 sm:$0xff]   ;;  %v5076_v21 = vld [vmem:[%s8398_s18 + $0x2a8] ss:$16 sps:$4 sm:$0xff]  }
  0xbe   :  { %v5023_v43 = vld [vmem:[%s8398_s18 + $0x3a4] ss:$16 sps:$4 sm:$0xff]   ;;  %v5026_v45 = vld [vmem:[%s8398_s18 + $0x3a0] ss:$16 sps:$4 sm:$0xff]   ;;  %v5081_v22 = vld [vmem:[%s8398_s18 + $0x8c] ss:$16 sps:$4 sm:$0xff]  }
  0xbf   :  { %1235 = vmatpush1.bf16.msra.mxu0 %v4995_v23  ;;  %v5027_v46 = vld [vmem:[%s8398_s18 + $0x184] ss:$16 sps:$4 sm:$0xff]   ;;  %v5031_v48 = vld [vmem:[%s8398_s18 + $0x180] ss:$16 sps:$4 sm:$0xff]   ;;  %v5084_v23 = vld [vmem:[%s8398_s18 + $0x28c] ss:$16 sps:$4 sm:$0xff]  }
  0xc0   :  { %1278 = vmatpush1.bf16.msra.mxu1 %v4996_v25  ;;  %1236 = vmatprep.subr.bf16.mxu0 %v4997_v26  ;;  %v5029_v47 = vld [vmem:[%s8398_s18 + $0x384] ss:$16 sps:$4 sm:$0xff]   ;;  %v5032_v49 = vld [vmem:[%s8398_s18 + $0x380] ss:$16 sps:$4 sm:$0xff]   ;;  %v5082_v25 = vld [vmem:[%s8398_s18 + $0x288] ss:$16 sps:$4 sm:$0xff]  }
  0xc1   :  { %1279 = vmatprep.subr.bf16.mxu1 %v4999_v27  ;;  %v5033_v55 = vld [vmem:[%s8398_s18 + $0x164] ss:$16 sps:$4 sm:$0xff]   ;;  %v5037_v58 = vld [vmem:[%s8398_s18 + $0x160] ss:$16 sps:$4 sm:$0xff]   ;;  %v5087_v26 = vld [vmem:[%s8398_s18 + $0x6c] ss:$16 sps:$4 sm:$0xff]  }
  0xc2   :  { %v5035_v56 = vld [vmem:[%s8398_s18 + $0x364] ss:$16 sps:$4 sm:$0xff]   ;;  %v5038_v59 = vld [vmem:[%s8398_s18 + $0x360] ss:$16 sps:$4 sm:$0xff]   ;;  %v5090_v27 = vld [vmem:[%s8398_s18 + $0x26c] ss:$16 sps:$4 sm:$0xff]  }
  0xc3   :  { %1237 = vmatpush1.bf16.msra.mxu0 %v5001_v28  ;;  %v5039_v60 = vld [vmem:[%s8398_s18 + $0x144] ss:$16 sps:$4 sm:$0xff]   ;;  %v5043_v62 = vld [vmem:[%s8398_s18 + $0x140] ss:$16 sps:$4 sm:$0xff]   ;;  %v5085_v28 = vld [vmem:[%s8398_s18 + $0x68] ss:$16 sps:$4 sm:$0xff]  }
  0xc4   :  { %1280 = vmatpush1.bf16.msra.mxu1 %v5002_v29  ;;  %1238 = vmatprep.subr.bf16.mxu0 %v5003_v30  ;;  %v5041_v61 = vld [vmem:[%s8398_s18 + $0x344] ss:$16 sps:$4 sm:$0xff]   ;;  %v5044_v63 = vld [vmem:[%s8398_s18 + $0x340] ss:$16 sps:$4 sm:$0xff]   ;;  %v5088_v29 = vld [vmem:[%s8398_s18 + $0x268] ss:$16 sps:$4 sm:$0xff]  }
  0xc5   :  { %1281 = vmatprep.subr.bf16.mxu1 %v5005_v31  ;;  %v5045_v0 = vld [vmem:[%s8398_s18 + $0x124] ss:$16 sps:$4 sm:$0xff]   ;;  %v5049_v2 = vld [vmem:[%s8398_s18 + $0x120] ss:$16 sps:$4 sm:$0xff]   ;;  %v5093_v30 = vld [vmem:[%s8398_s18 + $0x4c] ss:$16 sps:$4 sm:$0xff]  }
  0xc6   :  { %v5047_v1 = vld [vmem:[%s8398_s18 + $0x324] ss:$16 sps:$4 sm:$0xff]   ;;  %v5050_v3 = vld [vmem:[%s8398_s18 + $0x320] ss:$16 sps:$4 sm:$0xff]   ;;  %v5096_v31 = vld [vmem:[%s8398_s18 + $0x24c] ss:$16 sps:$4 sm:$0xff]  }
  0xc7   :  { %1239 = vmatpush1.bf16.msra.mxu0 %v5007_v32  ;;  %v5051_v4 = vld [vmem:[%s8398_s18 + $0x104] ss:$16 sps:$4 sm:$0xff]   ;;  %v5055_v6 = vld [vmem:[%s8398_s18 + $0x100] ss:$16 sps:$4 sm:$0xff]   ;;  %v5091_v32 = vld [vmem:[%s8398_s18 + $0x48] ss:$16 sps:$4 sm:$0xff]  }
  0xc8   :  { %1282 = vmatpush1.bf16.msra.mxu1 %v5008_v33  ;;  %1240 = vmatprep.subr.bf16.mxu0 %v5009_v34  ;;  %v5053_v5 = vld [vmem:[%s8398_s18 + $0x304] ss:$16 sps:$4 sm:$0xff]   ;;  %v5056_v7 = vld [vmem:[%s8398_s18 + $0x300] ss:$16 sps:$4 sm:$0xff]   ;;  %v5094_v33 = vld [vmem:[%s8398_s18 + $0x248] ss:$16 sps:$4 sm:$0xff]  }
  0xc9   :  { %1283 = vmatprep.subr.bf16.mxu1 %v5011_v35  ;;  %v5099_v34 = vld [vmem:[%s8398_s18 + $0x2c] ss:$16 sps:$4 sm:$0xff]   ;;  %v5124_v53 = vld [vmem:[%s8398_s18 + $0x3a8] ss:$16 sps:$4 sm:$0xff]  }
  0xca   :  { %v5102_v35 = vld [vmem:[%s8398_s18 + $0x22c] ss:$16 sps:$4 sm:$0xff]  }
  0xcb   :  { %1241 = vmatpush2.bf16.msra.mxu0 %v5013_v36  ;;  %v5097_v36 = vld [vmem:[%s8398_s18 + $0x28] ss:$16 sps:$4 sm:$0xff]   ;;  %v5129_v54 = vld [vmem:[%s8398_s18 + $0x18c] ss:$16 sps:$4 sm:$0xff]  }
  0xcc   :  { %1284 = vmatpush2.bf16.msra.mxu1 %v5014_v37  ;;  %1242 = vmatprep.subr.bf16.mxu0 %v5015_v38  ;;  %v5100_v37 = vld [vmem:[%s8398_s18 + $0x228] ss:$16 sps:$4 sm:$0xff]   ;;  %v5105_v38 = vld [vmem:[%s8398_s18 + $0xc] ss:$16 sps:$4 sm:$0xff]  }
  0xcd   :  { %1285 = vmatprep.subr.bf16.mxu1 %v5017_v39  ;;  %v5108_v39 = vld [vmem:[%s8398_s18 + $0x20c] ss:$16 sps:$4 sm:$0xff]  }
  0xcf   :  { %1243 = vmatpush2.bf16.msra.mxu0 %v5019_v40  ;;  %v5103_v40 = vld [vmem:[%s8398_s18 + $0x8] ss:$16 sps:$4 sm:$0xff]  }
  0xd0   :  { %1286 = vmatpush2.bf16.msra.mxu1 %v5020_v41  ;;  %1244 = vmatprep.subr.bf16.mxu0 %v5021_v42  ;;  %v5106_v41 = vld [vmem:[%s8398_s18 + $0x208] ss:$16 sps:$4 sm:$0xff]   ;;  %v5111_v42 = vld [vmem:[%s8398_s18 + $0x1ec] ss:$16 sps:$4 sm:$0xff]  }
  0xd1   :  { %1287 = vmatprep.subr.bf16.mxu1 %v5023_v43  ;;  %v5114_v43 = vld [vmem:[%s8398_s18 + $0x3ec] ss:$16 sps:$4 sm:$0xff]  }
  0xd3   :  { %1245 = vmatpush2.bf16.msra.mxu0 %v5025_v44  ;;  %v5109_v44 = vld [vmem:[%s8398_s18 + $0x1e8] ss:$16 sps:$4 sm:$0xff]  }
  0xd4   :  { %1288 = vmatpush2.bf16.msra.mxu1 %v5026_v45  ;;  %1246 = vmatprep.subr.bf16.mxu0 %v5027_v46  ;;  %v5112_v45 = vld [vmem:[%s8398_s18 + $0x3e8] ss:$16 sps:$4 sm:$0xff]   ;;  %v5117_v46 = vld [vmem:[%s8398_s18 + $0x1cc] ss:$16 sps:$4 sm:$0xff]  }
  0xd5   :  { %1289 = vmatprep.subr.bf16.mxu1 %v5029_v47  ;;  %v5120_v47 = vld [vmem:[%s8398_s18 + $0x3cc] ss:$16 sps:$4 sm:$0xff]  }
  0xd7   :  { %1247 = vmatpush2.bf16.msra.mxu0 %v5031_v48  ;;  %v5115_v48 = vld [vmem:[%s8398_s18 + $0x1c8] ss:$16 sps:$4 sm:$0xff]  }
  0xd8   :  { %1290 = vmatpush2.bf16.msra.mxu1 %v5032_v49  ;;  %1248 = vmatprep.subr.bf16.mxu0 %v5033_v55  ;;  %v5118_v49 = vld [vmem:[%s8398_s18 + $0x3c8] ss:$16 sps:$4 sm:$0xff]   ;;  %v5132_v55 = vld [vmem:[%s8398_s18 + $0x38c] ss:$16 sps:$4 sm:$0xff]  }
  0xd9   :  { %1291 = vmatprep.subr.bf16.mxu1 %v5035_v56  ;;  %v5127_v56 = vld [vmem:[%s8398_s18 + $0x188] ss:$16 sps:$4 sm:$0xff]  }
  0xdb   :  { %1249 = vmatpush2.bf16.msra.mxu0 %v5037_v58  ;;  %v5135_v58 = vld [vmem:[%s8398_s18 + $0x16c] ss:$16 sps:$4 sm:$0xff]  }
  0xdc   :  { %1292 = vmatpush2.bf16.msra.mxu1 %v5038_v59  ;;  %1250 = vmatprep.subr.bf16.mxu0 %v5039_v60  ;;  %v5138_v59 = vld [vmem:[%s8398_s18 + $0x36c] ss:$16 sps:$4 sm:$0xff]   ;;  %v5133_v60 = vld [vmem:[%s8398_s18 + $0x168] ss:$16 sps:$4 sm:$0xff]  }
  0xdd   :  { %1293 = vmatprep.subr.bf16.mxu1 %v5041_v61  ;;  %v5136_v61 = vld [vmem:[%s8398_s18 + $0x368] ss:$16 sps:$4 sm:$0xff]  }
  0xdf   :  { %1251 = vmatpush2.bf16.msra.mxu0 %v5043_v62  ;;  %v5141_v62 = vld [vmem:[%s8398_s18 + $0x14c] ss:$16 sps:$4 sm:$0xff]  }
  0xe0   :  { %1294 = vmatpush2.bf16.msra.mxu1 %v5044_v63  ;;  %1252 = vmatprep.subr.bf16.mxu0 %v5045_v0  ;;  %v5144_v63 = vld [vmem:[%s8398_s18 + $0x34c] ss:$16 sps:$4 sm:$0xff]   ;;  %v5139_v0 = vld [vmem:[%s8398_s18 + $0x148] ss:$16 sps:$4 sm:$0xff]  }
  0xe1   :  { %1295 = vmatprep.subr.bf16.mxu1 %v5047_v1  ;;  %v5142_v1 = vld [vmem:[%s8398_s18 + $0x348] ss:$16 sps:$4 sm:$0xff]  }
  0xe3   :  { %1253 = vmatpush2.bf16.msra.mxu0 %v5049_v2  ;;  %v5147_v2 = vld [vmem:[%s8398_s18 + $0x12c] ss:$16 sps:$4 sm:$0xff]  }
  0xe4   :  { %1296 = vmatpush2.bf16.msra.mxu1 %v5050_v3  ;;  %1254 = vmatprep.subr.bf16.mxu0 %v5051_v4  ;;  %v5150_v3 = vld [vmem:[%s8398_s18 + $0x32c] ss:$16 sps:$4 sm:$0xff]   ;;  %v5145_v4 = vld [vmem:[%s8398_s18 + $0x128] ss:$16 sps:$4 sm:$0xff]  }
  0xe5   :  { %1297 = vmatprep.subr.bf16.mxu1 %v5053_v5  ;;  %v5148_v5 = vld [vmem:[%s8398_s18 + $0x328] ss:$16 sps:$4 sm:$0xff]  }
  0xe7   :  { %1255 = vmatpush2.bf16.msra.mxu0 %v5055_v6  ;;  %v5153_v6 = vld [vmem:[%s8398_s18 + $0x10c] ss:$16 sps:$4 sm:$0xff]  }
  0xe8   :  { %1298 = vmatpush2.bf16.msra.mxu1 %v5056_v7  ;;  %1310 = vmatprep.subr.bf16.mxu0 %v5063_v8  ;;  %v5156_v7 = vld [vmem:[%s8398_s18 + $0x30c] ss:$16 sps:$4 sm:$0xff]   ;;  %v5151_v8 = vld [vmem:[%s8398_s18 + $0x108] ss:$16 sps:$4 sm:$0xff]  }
  0xe9   :  { %1353 = vmatprep.subr.bf16.mxu1 %v5066_v9  ;;  %v5154_v9 = vld [vmem:[%s8398_s18 + $0x308] ss:$16 sps:$4 sm:$0xff]  }
  0xea   :  { %1257 = vmatmul.mubr.bf16.vlgmr.msra.gmra.mxu0 %v6142_v10 }
  0xeb   :  { %1300 = vmatmul.mubr.bf16.vlgmr.msra.gmra.mxu1 %v6144_v11  ;;  %1311 = vmatpush1.bf16.msra.mxu0 %v5061_v12  ;;  %v370_v12 = vld [vmem:[%s8399_s6 + $0x38] sm:$0xff] }
  0xec   :  { %1354 = vmatpush1.bf16.msra.mxu1 %v5064_v13  ;;  %1312 = vmatprep.subr.bf16.mxu0 %v5069_v14  ;;  %v369_v13 = vld [vmem:[%s8399_s6 + $0x30] sm:$0xff]  ;;  %v368_v14 = vld [vmem:[%s8399_s6 + $0x28] sm:$0xff] }
  0xed   :  { %1355 = vmatprep.subr.bf16.mxu1 %v5072_v15  ;;  %1342 = vmatprep.mubr.bf16.mxu0 %v4278_v52  ;;  %v5121_v52 = vld [vmem:[%s8398_s18 + $0x1a8] ss:$16 sps:$4 sm:$0xff]   ;;  %v367_v15 = vld [vmem:[%s8399_s6 + $0x20] sm:$0xff] }
  0xee   :  { %1385 = vmatprep.mubr.bf16.mxu1 %v4280_v57  ;;  %v5130_v57 = vld [vmem:[%s8398_s18 + $0x388] ss:$16 sps:$4 sm:$0xff]  }
  0xef   :  { %1313 = vmatpush1.bf16.msra.mxu0 %v5067_v16  ;;  %v366_v16 = vld [vmem:[%s8399_s6 + $0x18] sm:$0xff] }
  0xf0   :  { %1356 = vmatpush1.bf16.msra.mxu1 %v5070_v17  ;;  %1314 = vmatprep.subr.bf16.mxu0 %v5075_v18  ;;  %v8223_v17 = vmov 0.0   ;;  %v365_v18 = vld [vmem:[%s8399_s6 + $0x10] sm:$0xff] }
  0xf1   :  { %1357 = vmatprep.subr.bf16.mxu1 %v5078_v19  ;;  %v363_v19 = vld [vmem:[%s8399_s6] sm:$0xff] }
  0xf3   :  { %1315 = vmatpush1.bf16.msra.mxu0 %v5073_v20 }
  0xf4   :  { %1358 = vmatpush1.bf16.msra.mxu1 %v5076_v21  ;;  %1316 = vmatprep.subr.bf16.mxu0 %v5081_v22  ;;  %v5157_v21 = vld [vmem:[#allocation16 + $0x10] ss:$8 sps:$4 sm:$0xff]   ;;  %v5159_v22 = vld [vmem:[#allocation16 + $0x14] ss:$8 sps:$4 sm:$0xff]  }
  0xf5   :  { %1359 = vmatprep.subr.bf16.mxu1 %v5084_v23  ;;  %v5162_v23 = vld [vmem:[#allocation16 + $0x4] ss:$8 sps:$4 sm:$0xff]  }
  0xf7   :  { %1317 = vmatpush1.bf16.msra.mxu0 %v5079_v24  ;;  %v8225_v24 = vmov 0  }
  0xf8   :  { %1360 = vmatpush1.bf16.msra.mxu1 %v5082_v25  ;;  %1318 = vmatprep.subr.bf16.mxu0 %v5087_v26  ;;  %v5160_v25 = vld [vmem:[#allocation16] ss:$8 sps:$4 sm:$0xff]  }
  0xf9   :  { %1361 = vmatprep.subr.bf16.mxu1 %v5090_v27  ;;  %v5163_v26 = vld [vmem:[#allocation2] sm:$0xff]   ;;  %v403_v27 = vld [vmem:[%s8402_s19 + $0xf8] sm:$0xff] }
  0xfb   :  { %1319 = vmatpush1.bf16.msra.mxu0 %v5085_v28  ;;  %v387_v28 = vld [vmem:[%s8402_s19 + $0x78] sm:$0xff] }
  0xfc   :  { %1362 = vmatpush1.bf16.msra.mxu1 %v5088_v29  ;;  %1320 = vmatprep.subr.bf16.mxu0 %v5093_v30  ;;  %v402_v29 = vld [vmem:[%s8402_s19 + $0xf0] sm:$0xff] }
  0xfd   :  { %1363 = vmatprep.subr.bf16.mxu1 %v5096_v31  ;;  %v386_v30 = vld [vmem:[%s8402_s19 + $0x70] sm:$0xff]  ;;  %v401_v31 = vld [vmem:[%s8402_s19 + $0xe8] sm:$0xff] }
  0xff   :  { %1321 = vmatpush1.bf16.msra.mxu0 %v5091_v32  ;;  %v385_v32 = vld [vmem:[%s8402_s19 + $0x68] sm:$0xff] }
 0x100   :  { %1364 = vmatpush1.bf16.msra.mxu1 %v5094_v33  ;;  %1322 = vmatprep.subr.bf16.mxu0 %v5099_v34  ;;  %v400_v33 = vld [vmem:[%s8402_s19 + $0xe0] sm:$0xff] }
 0x101   :  { %1365 = vmatprep.subr.bf16.mxu1 %v5102_v35  ;;  %v384_v34 = vld [vmem:[%s8402_s19 + $0x60] sm:$0xff]  ;;  %v399_v35 = vld [vmem:[%s8402_s19 + $0xd8] sm:$0xff] }
 0x103   :  { %1323 = vmatpush1.bf16.msra.mxu0 %v5097_v36  ;;  %v383_v36 = vld [vmem:[%s8402_s19 + $0x58] sm:$0xff] }
 0x104   :  { %1366 = vmatpush1.bf16.msra.mxu1 %v5100_v37  ;;  %1324 = vmatprep.subr.bf16.mxu0 %v5105_v38  ;;  %v398_v37 = vld [vmem:[%s8402_s19 + $0xd0] sm:$0xff] }
 0x105   :  { %1367 = vmatprep.subr.bf16.mxu1 %v5108_v39  ;;  %v382_v38 = vld [vmem:[%s8402_s19 + $0x50] sm:$0xff]  ;;  %v397_v39 = vld [vmem:[%s8402_s19 + $0xc8] sm:$0xff] }
 0x107   :  { %1325 = vmatpush1.bf16.msra.mxu0 %v5103_v40  ;;  %v381_v40 = vld [vmem:[%s8402_s19 + $0x48] sm:$0xff] }
 0x108   :  { %1368 = vmatpush1.bf16.msra.mxu1 %v5106_v41  ;;  %1326 = vmatprep.subr.bf16.mxu0 %v5111_v42  ;;  %v396_v41 = vld [vmem:[%s8402_s19 + $0xc0] sm:$0xff] }
 0x109   :  { %1369 = vmatprep.subr.bf16.mxu1 %v5114_v43  ;;  %v380_v42 = vld [vmem:[%s8402_s19 + $0x40] sm:$0xff]  ;;  %v395_v43 = vld [vmem:[%s8402_s19 + $0xb8] sm:$0xff] }
 0x10b   :  { %1327 = vmatpush2.bf16.msra.mxu0 %v5109_v44  ;;  %v379_v44 = vld [vmem:[%s8402_s19 + $0x38] sm:$0xff] }
 0x10c   :  { %1370 = vmatpush2.bf16.msra.mxu1 %v5112_v45  ;;  %1328 = vmatprep.subr.bf16.mxu0 %v5117_v46  ;;  %v394_v45 = vld [vmem:[%s8402_s19 + $0xb0] sm:$0xff] }
 0x10d   :  { %1371 = vmatprep.subr.bf16.mxu1 %v5120_v47  ;;  %v378_v46 = vld [vmem:[%s8402_s19 + $0x30] sm:$0xff]  ;;  %v393_v47 = vld [vmem:[%s8402_s19 + $0xa8] sm:$0xff] }
 0x10f   :  { %1329 = vmatpush2.bf16.msra.mxu0 %v5115_v48  ;;  %v377_v48 = vld [vmem:[%s8402_s19 + $0x28] sm:$0xff] }
 0x110   :  { %1372 = vmatpush2.bf16.msra.mxu1 %v5118_v49  ;;  %1330 = vmatprep.subr.bf16.mxu0 %v5123_v50  ;;  %v392_v49 = vld [vmem:[%s8402_s19 + $0xa0] sm:$0xff] }
 0x111   :  { %1373 = vmatprep.subr.bf16.mxu1 %v5126_v51  ;;  %v376_v50 = vld [vmem:[%s8402_s19 + $0x20] sm:$0xff]  ;;  %v391_v51 = vld [vmem:[%s8402_s19 + $0x98] sm:$0xff] }
 0x113   :  { %1331 = vmatpush2.bf16.msra.mxu0 %v5121_v52  ;;  %v375_v52 = vld [vmem:[%s8402_s19 + $0x18] sm:$0xff] }
 0x114   :  { %1374 = vmatpush2.bf16.msra.mxu1 %v5124_v53  ;;  %1332 = vmatprep.subr.bf16.mxu0 %v5129_v54  ;;  %v390_v53 = vld [vmem:[%s8402_s19 + $0x90] sm:$0xff] }
 0x115   :  { %1375 = vmatprep.subr.bf16.mxu1 %v5132_v55  ;;  %v374_v54 = vld [vmem:[%s8402_s19 + $0x10] sm:$0xff]  ;;  %v389_v55 = vld [vmem:[%s8402_s19 + $0x88] sm:$0xff] }
 0x117   :  { %1333 = vmatpush2.bf16.msra.mxu0 %v5127_v56  ;;  %v373_v56 = vld [vmem:[%s8402_s19 + $0x8] sm:$0xff] }
 0x118   :  { %1376 = vmatpush2.bf16.msra.mxu1 %v5130_v57  ;;  %1334 = vmatprep.subr.bf16.mxu0 %v5135_v58  ;;  %v388_v57 = vld [vmem:[%s8402_s19 + $0x80] sm:$0xff] }
 0x119   :  { %1377 = vmatprep.subr.bf16.mxu1 %v5138_v59  ;;  %v372_v58 = vld [vmem:[%s8402_s19] sm:$0xff] }
 0x11b   :  { %1335 = vmatpush2.bf16.msra.mxu0 %v5133_v60 }
 0x11c   :  { %1378 = vmatpush2.bf16.msra.mxu1 %v5136_v61  ;;  %1336 = vmatprep.subr.bf16.mxu0 %v5141_v62  ;;  %v544_v61 = vlaneseq }
 0x11d   :  { %1379 = vmatprep.subr.bf16.mxu1 %v5144_v63 }
 0x11f   :  { %1337 = vmatpush2.bf16.msra.mxu0 %v5139_v0  ;;  %v545_v0 = vshrl.u32 %v544_v61, 7 }
 0x120   :  { %1380 = vmatpush2.bf16.msra.mxu1 %v5142_v1  ;;  %1338 = vmatprep.subr.bf16.mxu0 %v5147_v2 }
 0x121   :  { %1381 = vmatprep.subr.bf16.mxu1 %v5150_v3  ;;  %v554_v1 = vsub.s32 2, %v545_v0 }
 0x123   :  { %1339 = vmatpush2.bf16.msra.mxu0 %v5145_v4  ;;  %v558_v4 = vsub.s32 3, %v545_v0 }
 0x124   :  { %1382 = vmatpush2.bf16.msra.mxu1 %v5148_v5  ;;  %1340 = vmatprep.subr.bf16.mxu0 %v5153_v6  ;;  %v362_v5 = vld [vmem:[%s8403_s4] sm:$0xf]  ;;  %v6472_v6 = vsub.s32 0, %v545_v0 }
 0x125   :  { %1383 = vmatprep.subr.bf16.mxu1 %v5156_v7  ;;  %v6474_v7 = vsub.s32 1, %v545_v0 }
 0x127   :  { %1341 = vmatpush2.bf16.msra.mxu0 %v5151_v8  ;;  %v555_v8 = vrot.slane %v362_v5, %v554_v1 }
 0x128   :  { %1384 = vmatpush2.bf16.msra.mxu1 %v5154_v9  ;;  %1460 = vmatprep.subr.bf16.mxu0 %v5159_v22  ;;  %v371_v22 = vld [vmem:[%s8404_s26] sm:$0x3] }
 0x129   :  { %1536 = vmatprep.subr.mxu1 %v370_v12 }
 0x12a   :  { %1343 = vmatmul.mubr.bf16.vlgmr.msra.gmra.mxu0 %v6142_v10  ;;  %v364_v10 = vld [vmem:[%s8399_s6 + $0x8] sm:$0xff] }
 0x12b   :  { %1386 = vmatmul.mubr.bf16.vlgmr.msra.gmra.mxu1 %v6144_v11  ;;  %v6358_v11 = vpop.permute.xlu0 %1504  ;;  %1480 = vmatprep.mubr.bf16.mxu0 %v8225_v24  ;;  %v6781_v24 = vld [vmem:[%s8203_s12 + $0x40] sm:$0xff] }
 0x12c   :  { %1537 = vmatpush1.msra.mxu1 %v369_v13  ;;  %1576 = vmatprep.mubr.f32.mxu1 %v8223_v17  ;;  %8400 = vst [vmem:[#allocation34_spill] sm:$0xff] %v6358_v11  ;;  %v559_v13 = vrot.slane %v362_v5, %v558_v4  ;;  %8432 = vst [vmem:[#allocation63_spill] sm:$0xff] %v6781_v24 }
 0x12d   :  { %1538 = vmatprep.subr.mxu1 %v368_v14  ;;  %1461 = vmatpush1.bf16.msra.mxu0 %v5157_v21  ;;  %v547_v14 = vrot.slane %v362_v5, %v6472_v6 }
 0x12e   :  { %1539 = vmatpush1.msra.mxu1 %v367_v15  ;;  %1462 = vmatprep.subr.bf16.mxu0 %v5162_v23 }
 0x12f   :  { %1540 = vmatprep.subr.mxu1 %v366_v16  ;;  %v6365_v20 = vpop.permute.xlu0 %1506 }
 0x130   :  { %1541 = vmatpush1.msra.mxu1 %v365_v18  ;;  %8401 = vst [vmem:[#allocation35_spill] sm:$0xff] %v6365_v20  ;;  %v551_v18 = vrot.slane %v362_v5, %v6474_v7 }
 0x131   :  { %1542 = vmatprep.subr.mxu1 %v364_v10  ;;  %1463 = vmatpush1.bf16.msra.mxu0 %v5160_v25 }
 0x132   :  { %1543 = vmatpush1.msra.mxu1 %v363_v19  ;;  %4468 = vmatprep.subr.mxu0 %v403_v27 }
 0x133   :  { %4415 = vmatmul.mubr.msk.f32.vlgmr.msra.gmra.mxu1 %vm1444_vm0, %v6358_v11  ;;  %v6793_v11 = vld [vmem:[%s8203_s12 + $0x38] sm:$0xff] }
 0x134   :  { %1582 = vmatprep.mubr.f32.mxu1 %v8223_v17  ;;  %4414 = vmatmul.mubr.msk.bf16.vlgmr.msra.gmra.mxu0 %vm1444_vm0, %v5163_v26  ;;  %8434 = vst [vmem:[#allocation65_spill] sm:$0xff] %v6793_v11 }
 0x135   :  { %4469 = vmatpush3.msra.mxu0 %v387_v28 }
 0x136   :  { %4470 = vmatprep.subr.mxu0 %v402_v29 }
 0x137   :  { %4416 = vmatmul.mubr.msk.f32.gmra.mxu1 %vm1444_vm0, %v6365_v20  ;;  %4471 = vmatpush3.msra.mxu0 %v386_v30  ;;  %v6787_v20 = vld [vmem:[%s8203_s12 + $0xb8] sm:$0xff] }
 0x138   :  { %1769 = vmatprep.mubr.f32.mxu1 %v8223_v17  ;;  %4472 = vmatprep.subr.mxu0 %v401_v31  ;;  %8433 = vst [vmem:[#allocation64_spill] sm:$0xff] %v6787_v20 }
 0x139   :  { %4473 = vmatpush3.msra.mxu0 %v385_v32  ;;  %v6486_v32 = vrot.slane %v371_v22, %v6472_v6 }
 0x13a   :  { %4474 = vmatprep.subr.mxu0 %v400_v33 }
 0x13b   :  { %4475 = vmatpush3.msra.mxu0 %v384_v34  ;;  %8405 = vst [vmem:[#allocation36_spill] sm:$0xff] %v6486_v32 }
 0x13c   :  { %4476 = vmatprep.subr.mxu0 %v399_v35 }
 0x13d   :  { %4477 = vmatpush3.msra.mxu0 %v383_v36 }
 0x13e   :  { %4478 = vmatprep.subr.mxu0 %v398_v37  ;;  %v6491_v37 = vrot.slane %v371_v22, %v6474_v7 }
 0x13f   :  { %4479 = vmatpush3.msra.mxu0 %v382_v38 }
 0x140   :  { %4480 = vmatprep.subr.mxu0 %v397_v39  ;;  %8406 = vst [vmem:[#allocation37_spill] sm:$0xff] %v6491_v37 }
 0x141   :  { %4481 = vmatpush3.msra.mxu0 %v381_v40 }
 0x142   :  { %4482 = vmatprep.subr.mxu0 %v396_v41 }
 0x143   :  { %4483 = vmatpush3.msra.mxu0 %v380_v42 }
 0x144   :  { %4484 = vmatprep.subr.mxu0 %v395_v43 }
 0x145   :  { %4485 = vmatpush3.msra.mxu0 %v379_v44 }
 0x146   :  { %4486 = vmatprep.subr.mxu0 %v394_v45 }
 0x147   :  { %4487 = vmatpush3.msra.mxu0 %v378_v46 }
 0x148   :  { %4488 = vmatprep.subr.mxu0 %v393_v47 }
 0x149   :  { %4489 = vmatpush3.msra.mxu0 %v377_v48 }
 0x14a   :  { %4490 = vmatprep.subr.mxu0 %v392_v49 }
 0x14b   :  { %4491 = vmatpush3.msra.mxu0 %v376_v50 }
 0x14c   :  { %4492 = vmatprep.subr.mxu0 %v391_v51 }
 0x14d   :  { %4493 = vmatpush3.msra.mxu0 %v375_v52 }
 0x14e   :  { %4494 = vmatprep.subr.mxu0 %v390_v53 }
 0x14f   :  { %4495 = vmatpush3.msra.mxu0 %v374_v54 }
 0x150   :  { %4496 = vmatprep.subr.mxu0 %v389_v55 }
 0x151   :  { %4497 = vmatpush3.msra.mxu0 %v373_v56 }
 0x152   :  { %4498 = vmatprep.subr.mxu0 %v388_v57 }
 0x153   :  { %4499 = vmatpush3.msra.mxu0 %v372_v58 }
 0x1aa   :  { %v1258_v59 = vpop.f32.mrf.mxu0 }
 0x1ab   :  { %v1301_v60 = vpop.f32.mrf.mxu1  ;;  %v1259_v26 = vadd.f32 %v1258_v59, %v547_v14 }
 0x1ac   :  { %v1260_v62 = vpop.f32.mrf.mxu0 }
 0x1ad   :  { %v1303_v63 = vpop.f32.mrf.mxu1  ;;  %v1261_v29 = vadd.f32 %v1260_v62, %v551_v18  ;;  %v6493_v38 = vadd.f32 %v1301_v60, %v1259_v26  ;;  %v6513_v60 = vld [vmem:[#allocation20] sm:$0x3] }
 0x1ae   :  { %v1262_v2 = vpop.f32.mrf.mxu0  ;;  %v1412_v1 = vrot.slane %v6513_v60, %v6472_v6 }
 0x1af   :  { %v1305_v3 = vpop.f32.mrf.mxu1  ;;  %8407 = vst [vmem:[#allocation38_spill] sm:$0xff] %v6493_v38  ;;  %v1263_v39 = vadd.f32 %v1262_v2, %v547_v14  ;;  %v6495_v41 = vadd.f32 %v1303_v63, %v1261_v29  ;;  %v8222_v48 = vmax.f32 %v6493_v38, 0.0  ;;  %v6823_v38 = vld [vmem:[%s8203_s12 + $0xa0] sm:$0xff] }
 0x1b0   :  { %v1264_v9 = vpop.f32.mrf.mxu0  ;;  %8439 = vst [vmem:[#allocation70_spill] sm:$0xff] %v6823_v38 }
 0x1b1   :  { %v1307_v12 = vpop.f32.mrf.mxu1  ;;  %8408 = vst [vmem:[#allocation39_spill] sm:$0xff] %v6495_v41  ;;  %v1265_v42 = vadd.f32 %v1264_v9, %v551_v18  ;;  %v6502_v49 = vadd.f32 %v1305_v3, %v1263_v39  ;;  %v8221_v51 = vmax.f32 %v6495_v41, 0.0  ;;  %v6817_v41 = vld [vmem:[%s8203_s12 + $0x28] sm:$0xff] }
 0x1b2   :  { %8438 = vst [vmem:[#allocation69_spill] sm:$0xff] %v6817_v41 }
 0x1b3   :  { %8409 = vst [vmem:[#allocation40_spill] sm:$0xff] %v6502_v49  ;;  %v6505_v52 = vadd.f32 %v1307_v12, %v1265_v42  ;;  %v8220_v61 = vmax.f32 %v6502_v49, 0.0  ;;  %v6811_v49 = vld [vmem:[%s8203_s12 + $0xa8] sm:$0xff] }
 0x1b4   :  { %8437 = vst [vmem:[#allocation68_spill] sm:$0xff] %v6811_v49 }
 0x1b5   :  { %8410 = vst [vmem:[#allocation41_spill] sm:$0xff] %v6505_v52  ;;  %v8219_v62 = vmax.f32 %v6505_v52, 0.0  ;;  %v6805_v52 = vld [vmem:[%s8203_s12 + $0x30] sm:$0xff] }
 0x1b6   :  { %8436 = vst [vmem:[#allocation67_spill] sm:$0xff] %v6805_v52 }
 0x1ea   :  { %v1344_v15 = vpop.f32.mrf.mxu0 }
 0x1eb   :  { %v1387_v16 = vpop.f32.mrf.mxu1  ;;  %v1345_v10 = vadd.f32 %v1344_v15, %v555_v8 }
 0x1ec   :  { %v1346_v19 = vpop.f32.mrf.mxu0 }
 0x1ed   :  { %v1389_v21 = vpop.f32.mrf.mxu1  ;;  %v6481_v23 = vadd.f32 %v1387_v16, %v1345_v10  ;;  %v1347_v25 = vadd.f32 %v1346_v19, %v559_v13 }
 0x1ee   :  { %v1348_v27 = vpop.f32.mrf.mxu0 }
 0x1ef   :  { %v1391_v28 = vpop.f32.mrf.mxu1  ;;  %v6483_v30 = vadd.f32 %v1389_v21, %v1347_v25  ;;  %v1349_v31 = vadd.f32 %v1348_v27, %v555_v8 }
 0x1f0   :  { %v1350_v33 = vpop.f32.mrf.mxu0 }
 0x1f1   :  { %v1393_v34 = vpop.f32.mrf.mxu1  ;;  %v6488_v35 = vadd.f32 %v1391_v28, %v1349_v31  ;;  %v1351_v36 = vadd.f32 %v1350_v33, %v559_v13 }
 0x1f3   :  { %v1578_v40 = vpop.f32.mrf.mxu1  ;;  %v6497_v43 = vadd.f32 %v1393_v34, %v1351_v36 }
 0x1f4   :  { %v1579_v44 = vadd.f32 %v1578_v40, %v6486_v32  ;;  %v1482_v3 = vpop.f32.mrf.mxu0 }
 0x1f5   :  { %v1580_v45 = vpop.f32.mrf.mxu1  ;;  %v6523_v4 = vadd.f32 %v1482_v3, %v1412_v1  ;;  %v6610_v3 = vld [vmem:[%s8203_s12 + $0x160] sm:$0xff] }
 0x1f6   :  { %v1589_v46 = vmax.f32 %v1579_v44, 0.0  ;;  %v1581_v47 = vadd.f32 %v1580_v45, %v6491_v37  ;;  %v6525_v5 = vpop.f32.mrf.mxu0  ;;  %v6538_v45 = vld [vmem:[#allocation10 + $0x28] sm:$0xff] }
 0x1f7   :  { %v1584_v50 = vpop.f32.mrf.mxu1  ;;  %8411 = vst [vmem:[#allocation42_spill] sm:$0xff] %v6523_v4  ;;  %1733 = vmatprep.subr.mxu1 %v6538_v45 }
 0x1f8   :  { %v1590_v53 = vmax.f32 %v1581_v47, 0.0  ;;  %v1585_v54 = vadd.f32 %v1584_v50, %v6486_v32  ;;  %v1593_v55 = vadd.f32 %v1589_v46, %v8222_v48  ;;  %v1486_v8 = vpop.f32.mrf.mxu0  ;;  %v6541_v46 = vld [vmem:[#allocation10 + $0x20] sm:$0xff]  ;;  %v6544_v47 = vld [vmem:[#allocation10 + $0x8] sm:$0xff]  ;;  %v6769_v48 = vld [vmem:[%s8203_s12 + $0x48] sm:$0xff] }
 0x1f9   :  { %v1586_v56 = vpop.f32.mrf.mxu1  ;;  %v6527_v9 = vadd.f32 %v1486_v8, %v1412_v1  ;;  %1734 = vmatpush1.msra.mxu1 %v6541_v46  ;;  %v6547_v50 = vld [vmem:[#allocation10] sm:$0xff]  ;;  %v6598_v1 = vld [vmem:[%s8203_s12 + $0x168] sm:$0xff]  ;;  %8430 = vst [vmem:[#allocation61_spill] sm:$0xff] %v6769_v48 }
 0x1fa   :  { %v1594_v57 = vadd.f32 %v1590_v53, %v8221_v51  ;;  %v1591_v58 = vmax.f32 %v1585_v54, 0.0  ;;  %v1587_v59 = vadd.f32 %v1586_v56, %v6491_v37  ;;  %v6529_v16 = vpop.f32.mrf.mxu0  ;;  %1735 = vmatprep.subr.mxu1 %v6544_v47  ;;  %v6550_v53 = vld [vmem:[#allocation10 + $0x38] sm:$0xff]  ;;  %v6553_v54 = vld [vmem:[#allocation7] sm:$0xff]  ;;  %v6616_v8 = vld [vmem:[%s8203_s12 + $0x1d8] sm:$0xff] }
 0x1fb   :  { %8412 = vst [vmem:[#allocation43_spill] sm:$0xff] %v6527_v9  ;;  %1736 = vmatpush1.msra.mxu1 %v6547_v50  ;;  %v6763_v51 = vld [vmem:[%s8203_s12 + $0xc8] sm:$0xff]  ;;  %v6829_v37 = vld [vmem:[%s8203_s12 + $0x20] sm:$0xff]  ;;  %v6835_v32 = vld [vmem:[%s8203_s12 + $0x98] sm:$0xff] }
 0x1fc   :  { %5178 = vtanh.f32 %v1594_v57  ;;  %v1592_v63 = vmax.f32 %v1587_v59, 0.0  ;;  %v1595_v0 = vadd.f32 %v1591_v58, %v8220_v61  ;;  %1810 = vmatprep.subr.mxu1 %v6550_v53  ;;  %v6566_v57 = vld [vmem:[%s8203_s12 + $0x1f8] sm:$0xff]  ;;  %v6578_v59 = vld [vmem:[%s8203_s12 + $0x1f0] sm:$0xff]  ;;  %8429 = vst [vmem:[#allocation60_spill] sm:$0xff] %v6763_v51  ;;  %8440 = vst [vmem:[#allocation71_spill] sm:$0xff] %v6829_v37 }
 0x1fd   :  { %5180 = vtanh.f32 %v1593_v55  ;;  %v6555_v55 = vld [vmem:[#allocation7 + $0x8] sm:$0xff]  ;;  %4544 = vmatprep.subr.mxu0 %v6566_v57  ;;  %v6572_v58 = vld [vmem:[%s8203_s12 + $0x178] sm:$0xff]  ;;  %8441 = vst [vmem:[#allocation72_spill] sm:$0xff] %v6835_v32 }
 0x1fe   :  { %v1596_v2 = vadd.f32 %v1592_v63, %v8219_v62  ;;  %v6559_v56 = vpack.c.bf16 %v6555_v55, %v6553_v54  ;;  %v6586_v63 = vld [vmem:[%s8203_s12 + $0x170] sm:$0xff] }
 0x1ff   :  { %v6751_v62 = vld [vmem:[%s8203_s12 + $0xd0] sm:$0xff] }
 0x200   :  { %5182 = vtanh.f32 %v1596_v2  ;;  %8413 = vst [vmem:[#allocation44_spill] sm:$0xff] %v6559_v56  ;;  %v6604_v2 = vld [vmem:[%s8203_s12 + $0x1e0] sm:$0xff]  ;;  %8427 = vst [vmem:[#allocation58_spill] sm:$0xff] %v6751_v62  ;;  %v6757_v61 = vld [vmem:[%s8203_s12 + $0x50] sm:$0xff] }
 0x201   :  { %5184 = vtanh.f32 %v1595_v0  ;;  %v6592_v0 = vld [vmem:[%s8203_s12 + $0x1e8] sm:$0xff]  ;;  %8428 = vst [vmem:[#allocation59_spill] sm:$0xff] %v6757_v61 }
 0x209   :  { %v5179_v12 = vpop.eup %5178 }
 0x20a   :  { %v5181_v13 = vpop.eup %5180  ;;  %1665 = vmatprep.mubr.f32.mxu0 %v5179_v12  ;;  %v6622_v12 = vld [vmem:[%s8203_s12 + $0x158] sm:$0xff] }
 0x20b   :  { %1666 = vmatmul.mubr.f32.vlgmr.msra.gmra.mxu0 %v5181_v13  ;;  %v6628_v13 = vld [vmem:[%s8203_s12 + $0x1d0] sm:$0xff] }
 0x20c   :  { %4545 = vmatpush3.msra.mxu0 %v6572_v58 }
 0x20d   :  { %v5183_v14 = vpop.eup %5182  ;;  %4546 = vmatprep.subr.mxu0 %v6578_v59 }
 0x20e   :  { %v5185_v15 = vpop.eup %5184  ;;  %1670 = vmatprep.mubr.f32.mxu0 %v5183_v14  ;;  %4547 = vmatpush3.msra.mxu0 %v6586_v63  ;;  %v6634_v14 = vld [vmem:[%s8203_s12 + $0x150] sm:$0xff] }
 0x20f   :  { %1671 = vmatmul.mubr.f32.gmra.mxu0 %v5185_v15  ;;  %4548 = vmatprep.subr.mxu0 %v6592_v0  ;;  %v6640_v15 = vld [vmem:[%s8203_s12 + $0x1c8] sm:$0xff] }
 0x210   :  { %4549 = vmatpush3.msra.mxu0 %v6598_v1 }
 0x211   :  { %4550 = vmatprep.subr.mxu0 %v6604_v2 }
 0x212   :  { %4551 = vmatpush3.msra.mxu0 %v6610_v3 }
 0x213   :  { %4552 = vmatprep.subr.mxu0 %v6616_v8 }
 0x214   :  { %4553 = vmatpush3.msra.mxu0 %v6622_v12 }
 0x215   :  { %4554 = vmatprep.subr.mxu0 %v6628_v13 }
 0x216   :  { %4555 = vmatpush3.msra.mxu0 %v6634_v14 }
 0x217   :  { %4556 = vmatprep.subr.mxu0 %v6640_v15 }
 0x2cb   :  { %v4500_v18 = vpop.f32.mrf.mxu0 }
 0x2cd   :  { %v4501_v10 = vpop.f32.mrf.mxu0 }
 0x2ce   :  { %v4502_v19 = vadd.f32 %v4501_v10, %v4500_v18  ;;  %v6646_v18 = vld [vmem:[%s8203_s12 + $0x148] sm:$0xff]  ;;  %v6652_v10 = vld [vmem:[%s8203_s12 + $0x1c0] sm:$0xff] }
 0x2cf   :  { %v4503_v21 = vpop.f32.mrf.mxu0  ;;  %4557 = vmatpush3.msra.mxu0 %v6646_v18 }
 0x2d0   :  { %v1677_v22 = vsel %vm1676_vm1, %v4502_v19, -inf  ;;  %4558 = vmatprep.subr.mxu0 %v6652_v10 }
 0x2d1   :  { %v4504_v25 = vpop.f32.mrf.mxu0  ;;  %1678 = vmax.xlane.f32.xlu1 %v1677_v22  ;;  %v6670_v22 = vld [vmem:[%s8203_s12 + $0x138] sm:$0xff] }
 0x2d2   :  { %v4505_v26 = vadd.f32 %v4504_v25, %v4503_v21  ;;  %v6664_v21 = vld [vmem:[%s8203_s12 + $0x1b8] sm:$0xff] }
 0x2d4   :  { %v1680_v27 = vsel %vm1676_vm1, %v4505_v26, -inf }
 0x2d5   :  { %1681 = vmax.xlane.f32.xlu1 %v1680_v27 }
 0x35a   :  { %v1679_v28 = vpop.xlane.xlu1 %1678 }
 0x35b   :  { %v1683_v29 = vsub.f32 %v4502_v19, %v1679_v28  ;;  %v6658_v19 = vld [vmem:[%s8203_s12 + $0x140] sm:$0xff] }
 0x35c   :  { %4559 = vmatpush3.msra.mxu0 %v6658_v19 }
 0x35d   :  { %v1685_v31 = vmul.f32 1.442695, %v1683_v29  ;;  %4560 = vmatprep.subr.mxu0 %v6664_v21  ;;  %v6673_v29 = vld [vmem:[#allocation10 + $0x30] sm:$0xff] }
 0x35e   :  { %v1682_v33 = vpop.xlane.xlu1 %1681  ;;  %4561 = vmatpush3.msra.mxu0 %v6670_v22  ;;  %8414 = vst [vmem:[#allocation45_spill] sm:$0xff] %v6673_v29 }
 0x35f   :  { %5186 = vpow2.f32 %v1685_v31  ;;  %v1684_v34 = vsub.f32 %v4505_v26, %v1682_v33  ;;  %v6675_v31 = vld [vmem:[#allocation10 + $0x18] sm:$0xff]  ;;  %v6678_v33 = vld [vmem:[#allocation10 + $0x10] sm:$0xff] }
 0x360   :  { %8415 = vst [vmem:[#allocation46_spill] sm:$0xff] %v6675_v31  ;;  %8416 = vst [vmem:[#allocation47_spill] sm:$0xff] %v6678_v33 }
 0x361   :  { %v1687_v36 = vmul.f32 1.442695, %v1684_v34 }
 0x363   :  { %5188 = vpow2.f32 %v1687_v36  ;;  %v6685_v36 = vld [vmem:[%s8203_s12 + $0xf8] sm:$0xff] }
 0x364   :  { %8417 = vst [vmem:[#allocation48_spill] sm:$0xff] %v6685_v36 }
 0x36c   :  { %v5187_v39 = vpop.eup %5186 }
 0x36d   :  { %v1689_v40 = vsel %vm1676_vm1, %v5187_v39, 0.0 }
 0x36e   :  { %1690 = vadd.xlane.f32.xlu0 %v1689_v40  ;;  %v6696_v40 = vld [vmem:[%s8203_s12 + $0x78] sm:$0xff] }
 0x36f   :  { %8418 = vst [vmem:[#allocation49_spill] sm:$0xff] %v6696_v40 }
 0x370   :  { %v6534_v42 = vpop.eup %5188 }
 0x371   :  { %v1692_v44 = vsel %vm1676_vm1, %v6534_v42, 0.0 }
 0x372   :  { %1693 = vadd.xlane.f32.xlu1 %v1692_v44  ;;  %v6701_v44 = vld [vmem:[%s8203_s12 + $0xf0] sm:$0xff] }
 0x373   :  { %8419 = vst [vmem:[#allocation50_spill] sm:$0xff] %v6701_v44 }
 0x383   :  { %2045 = vrot.lane.b32.xlu1 %v6559_v56, %s5760_s5  ;;  %v6799_v56 = vld [vmem:[%s8203_s12 + $0xb0] sm:$0xff] }
 0x384   :  { %8435 = vst [vmem:[#allocation66_spill] sm:$0xff] %v6799_v56 }
 0x387   :  { %2214 = vrot.lane.b32.xlu1 %v6553_v54, %s5755_s2 }
 0x3f7   :  { %v1691_v25 = vpop.xlane.xlu0 %1690 }
 0x3f8   :  { %5190 = vrcp.f32 %v1691_v25  ;;  %v6714_v25 = vld [vmem:[%s8203_s12 + $0xe8] sm:$0xff] }
 0x3f9   :  { %8421 = vst [vmem:[#allocation52_spill] sm:$0xff] %v6714_v25 }
 0x3fb   :  { %v1694_v26 = vpop.xlane.xlu1 %1693 }
 0x3fc   :  { %5192 = vrcp.f32 %v1694_v26  ;;  %v6720_v26 = vld [vmem:[%s8203_s12 + $0x68] sm:$0xff] }
 0x3fd   :  { %8422 = vst [vmem:[#allocation53_spill] sm:$0xff] %v6720_v26 }
 0x405   :  { %v5191_v27 = vpop.eup %5190 }
 0x406   :  { %v1697_v28 = vmul.f32 %v5191_v27, %v5187_v39  ;;  %v6726_v27 = vld [vmem:[%s8203_s12 + $0xe0] sm:$0xff] }
 0x407   :  { %8423 = vst [vmem:[#allocation54_spill] sm:$0xff] %v6726_v27 }
 0x408   :  { %4417 = vmatmul.mubr.msk.f32.vlgmr.msra.gmra.mxu1 %vm1676_vm1, %v1697_v28 }
 0x409   :  { %v5193_v34 = vpop.eup %5192  ;;  %1811 = vmatpush1.msra.mxu1 %v6673_v29  ;;  %1775 = vmatprep.mubr.f32.mxu1 %v8223_v17 }
 0x40a   :  { %v1698_v39 = vmul.f32 %v5193_v34, %v6534_v42  ;;  %1812 = vmatprep.subr.mxu1 %v6675_v31  ;;  %v6707_v42 = vld [vmem:[%s8203_s12 + $0x70] sm:$0xff]  ;;  %v6739_v34 = vld [vmem:[%s8203_s12 + $0xd8] sm:$0xff]  ;;  %v5169_v31 = vld [vmem:[#allocation17 + $0x4] ss:$8 sps:$4 sm:$0xff]  }
 0x40b   :  { %1813 = vmatpush1.msra.mxu1 %v6678_v33  ;;  %8420 = vst [vmem:[#allocation51_spill] sm:$0xff] %v6707_v42  ;;  %8425 = vst [vmem:[#allocation56_spill] sm:$0xff] %v6739_v34 }
 0x40c   :  { %4418 = vmatmul.mubr.msk.f32.gmra.mxu1 %vm1676_vm1, %v1698_v39  ;;  %4506 = vmatprep.subr.mxu1 %v6685_v36 }
 0x40d   :  { %1846 = vmatprep.mubr.f32.mxu1 %v8223_v17 }
 0x410   :  { %4419 = vmatmul.mubr.msk.f32.vlgmr.msra.gmra.mxu1 %vm1676_vm1, %v1697_v28  ;;  %v6733_v28 = vld [vmem:[%s8203_s12 + $0x60] sm:$0xff] }
 0x411   :  { %1852 = vmatprep.mubr.f32.mxu1 %v8223_v17  ;;  %4507 = vmatpush3.msra.mxu1 %v6696_v40  ;;  %8424 = vst [vmem:[#allocation55_spill] sm:$0xff] %v6733_v28  ;;  %v6775_v17 = vld [vmem:[%s8203_s12 + $0xc0] sm:$0xff] }
 0x412   :  { %4508 = vmatprep.subr.mxu1 %v6701_v44  ;;  %8431 = vst [vmem:[#allocation62_spill] sm:$0xff] %v6775_v17  ;;  %v5164_v44 = vld [vmem:[#allocation17 + $0x10] ss:$8 sps:$4 sm:$0xff]  }
 0x413   :  { %4509 = vmatpush3.msra.mxu1 %v6707_v42 }
 0x414   :  { %4420 = vmatmul.mubr.msk.f32.gmra.mxu1 %vm1676_vm1, %v1698_v39  ;;  %4510 = vmatprep.subr.mxu1 %v6714_v25  ;;  %v6745_v39 = vld [vmem:[%s8203_s12 + $0x58] sm:$0xff] }
 0x415   :  { %4511 = vmatpush3.msra.mxu1 %v6720_v26  ;;  %8426 = vst [vmem:[#allocation57_spill] sm:$0xff] %v6745_v39  ;;  %v5301_v25 = vld [vmem:[#allocation5 + $0x10] sm:$0xff] }
 0x416   :  { %4512 = vmatprep.subr.mxu1 %v6726_v27  ;;  %v6971_v42 = vunpack.c.h.bf16 %v5301_v25  ;;  %v6974_v33 = vunpack.c.l.bf16 %v5301_v25 }
 0x417   :  { %4513 = vmatpush3.msra.mxu1 %v6733_v28 }
 0x418   :  { %4514 = vmatprep.subr.mxu1 %v6739_v34  ;;  %8460 = vst [vmem:[#allocation91_spill] sm:$0xff] %v6971_v42  ;;  %8461 = vst [vmem:[#allocation92_spill] sm:$0xff] %v6974_v33 }
 0x419   :  { %4515 = vmatpush3.msra.mxu1 %v6745_v39 }
 0x41a   :  { %4516 = vmatprep.subr.mxu1 %v6751_v62  ;;  %v5300_v62 = vld [vmem:[#allocation5] sm:$0xff] }
 0x41b   :  { %4517 = vmatpush3.msra.mxu1 %v6757_v61  ;;  %v6963_v61 = vld [vmem:[%s8203_s12 + $0x100] sm:$0xff]  ;;  %v6966_v39 = vunpack.c.h.bf16 %v5300_v62  ;;  %v6968_v28 = vunpack.c.l.bf16 %v5300_v62  ;;  %v5302_v62 = vld [vmem:[#allocation5 + $0x8] sm:$0xff] }
 0x41c   :  { %4518 = vmatprep.subr.mxu1 %v6763_v51  ;;  %v6957_v51 = vld [vmem:[%s8203_s12 + $0x180] sm:$0xff]  ;;  %8457 = vst [vmem:[#allocation88_spill] sm:$0xff] %v6963_v61 }
 0x41d   :  { %4519 = vmatpush3.msra.mxu1 %v6769_v48  ;;  %v6951_v48 = vld [vmem:[%s8203_s12 + $0x108] sm:$0xff]  ;;  %8456 = vst [vmem:[#allocation87_spill] sm:$0xff] %v6957_v51  ;;  %8458 = vst [vmem:[#allocation89_spill] sm:$0xff] %v6966_v39 }
 0x41e   :  { %4520 = vmatprep.subr.mxu1 %v6775_v17  ;;  %v6939_v17 = vld [vmem:[%s8203_s12 + $0x110] sm:$0xff]  ;;  %8455 = vst [vmem:[#allocation86_spill] sm:$0xff] %v6951_v48  ;;  %8459 = vst [vmem:[#allocation90_spill] sm:$0xff] %v6968_v28 }
 0x41f   :  { %4521 = vmatpush3.msra.mxu1 %v6781_v24  ;;  %v6927_v24 = vld [vmem:[%s8203_s12 + $0x118] sm:$0xff]  ;;  %8453 = vst [vmem:[#allocation84_spill] sm:$0xff] %v6939_v17 }
 0x420   :  { %4522 = vmatprep.subr.mxu1 %v6787_v20  ;;  %v5166_v20 = vld [vmem:[#allocation17 + $0x14] ss:$8 sps:$4 sm:$0xff]   ;;  %8451 = vst [vmem:[#allocation82_spill] sm:$0xff] %v6927_v24 }
 0x421   :  { %4523 = vmatpush3.msra.mxu1 %v6793_v11  ;;  %v6914_v11 = vld [vmem:[%s8203_s12 + $0x120] sm:$0xff] }
 0x422   :  { %4524 = vmatprep.subr.mxu1 %v6799_v56  ;;  %v6902_v56 = vld [vmem:[%s8203_s12 + $0x1a0] sm:$0xff]  ;;  %8449 = vst [vmem:[#allocation80_spill] sm:$0xff] %v6914_v11 }
 0x423   :  { %4525 = vmatpush3.msra.mxu1 %v6805_v52  ;;  %v6841_v52 = vld [vmem:[%s8203_s12 + $0x18] sm:$0xff] }
 0x424   :  { %4526 = vmatprep.subr.mxu1 %v6811_v49  ;;  %8442 = vst [vmem:[#allocation73_spill] sm:$0xff] %v6841_v52  ;;  %v6890_v49 = vld [vmem:[%s8203_s12 + $0x128] sm:$0xff] }
 0x425   :  { %4527 = vmatpush3.msra.mxu1 %v6817_v41  ;;  %v6849_v41 = vld [vmem:[%s8203_s12 + $0x90] sm:$0xff] }
 0x426   :  { %4528 = vmatprep.subr.mxu1 %v6823_v38  ;;  %8443 = vst [vmem:[#allocation74_spill] sm:$0xff] %v6849_v41  ;;  %v6854_v38 = vld [vmem:[%s8203_s12 + $0x1b0] sm:$0xff] }
 0x427   :  { %4529 = vmatpush3.msra.mxu1 %v6829_v37  ;;  %4562 = vmatprep.subr.mxu0 %v6854_v38  ;;  %v6878_v37 = vld [vmem:[%s8203_s12 + $0x1a8] sm:$0xff] }
 0x428   :  { %4530 = vmatprep.subr.mxu1 %v6835_v32  ;;  %v6861_v32 = vld [vmem:[%s8203_s12 + $0x10] sm:$0xff] }
 0x429   :  { %4531 = vmatpush3.msra.mxu1 %v6841_v52  ;;  %8444 = vst [vmem:[#allocation75_spill] sm:$0xff] %v6861_v32  ;;  %v6866_v52 = vld [vmem:[%s8203_s12 + $0x130] sm:$0xff] }
 0x42a   :  { %4532 = vmatprep.subr.mxu1 %v6849_v41  ;;  %4563 = vmatpush3.msra.mxu0 %v6866_v52  ;;  %v6873_v41 = vld [vmem:[%s8203_s12 + $0x88] sm:$0xff] }
 0x42b   :  { %4533 = vmatpush3.msra.mxu1 %v6861_v32  ;;  %8445 = vst [vmem:[#allocation76_spill] sm:$0xff] %v6873_v41  ;;  %4564 = vmatprep.subr.mxu0 %v6878_v37  ;;  %v6885_v32 = vld [vmem:[%s8203_s12 + $0x8] sm:$0xff] }
 0x42c   :  { %4534 = vmatprep.subr.mxu1 %v6873_v41  ;;  %8446 = vst [vmem:[#allocation77_spill] sm:$0xff] %v6885_v32  ;;  %4565 = vmatpush3.msra.mxu0 %v6890_v49  ;;  %v6897_v41 = vld [vmem:[%s8203_s12 + $0x80] sm:$0xff] }
 0x42d   :  { %4535 = vmatpush3.msra.mxu1 %v6885_v32  ;;  %8447 = vst [vmem:[#allocation78_spill] sm:$0xff] %v6897_v41  ;;  %4566 = vmatprep.subr.mxu0 %v6902_v56  ;;  %v6909_v32 = vld [vmem:[%s8203_s12] sm:$0xff] }
 0x42e   :  { %4536 = vmatprep.subr.mxu1 %v6897_v41  ;;  %8448 = vst [vmem:[#allocation79_spill] sm:$0xff] %v6909_v32  ;;  %4567 = vmatpush3.msra.mxu0 %v6914_v11  ;;  %v6921_v41 = vld [vmem:[%s8203_s12 + $0x198] sm:$0xff] }
 0x42f   :  { %4537 = vmatpush3.msra.mxu1 %v6909_v32  ;;  %8450 = vst [vmem:[#allocation81_spill] sm:$0xff] %v6921_v41  ;;  %4568 = vmatprep.subr.mxu0 %v6921_v41  ;;  %v6933_v32 = vld [vmem:[%s8203_s12 + $0x190] sm:$0xff] }
 0x430   :  { %2082 = vmatprep.subr.bf16.mxu1 %v5166_v20  ;;  %4569 = vmatpush3.msra.mxu0 %v6927_v24  ;;  %8452 = vst [vmem:[#allocation83_spill] sm:$0xff] %v6933_v32  ;;  %v6945_v20 = vld [vmem:[%s8203_s12 + $0x188] sm:$0xff] }
 0x431   :  { %4570 = vmatprep.subr.mxu0 %v6933_v32  ;;  %8454 = vst [vmem:[#allocation85_spill] sm:$0xff] %v6945_v20 }
 0x432   :  { %4571 = vmatpush3.msra.mxu0 %v6939_v17 }
 0x433   :  { %4572 = vmatprep.subr.mxu0 %v6945_v20  ;;  %v6980_v20 = vunpack.c.l.bf16 %v5302_v62 }
 0x434   :  { %4573 = vmatpush3.msra.mxu0 %v6951_v48 }
 0x435   :  { %4574 = vmatprep.subr.mxu0 %v6957_v51  ;;  %v6977_v51 = vunpack.c.h.bf16 %v5302_v62  ;;  %8463 = vst [vmem:[#allocation94_spill] sm:$0xff] %v6980_v20 }
 0x436   :  { %4575 = vmatpush3.msra.mxu0 %v6963_v61 }
 0x437   :  { %8462 = vst [vmem:[#allocation93_spill] sm:$0xff] %v6977_v51 }
 0x4c8   :  { %v1771_v34 = vpop.f32.mrf.mxu1 }
 0x4c9   :  { %v1867_v40 = vmul.f32 %v6968_v28, %v1771_v34 }
 0x4ca   :  { %v1773_v27 = vpop.f32.mrf.mxu1 }
 0x4cb   :  { %v1868_v26 = vmul.f32 %v6966_v39, %v1773_v27  ;;  %v5167_v27 = vld [vmem:[#allocation17] ss:$8 sps:$4 sm:$0xff]  }
 0x4cc   :  { %v1777_v36 = vpop.f32.mrf.mxu1 }
 0x4cd   :  { %1939 = vmatprep.mubr.f32.mxu1 %v1868_v26  ;;  %v1871_v39 = vmul.f32 %v6974_v33, %v1777_v36 }
 0x4ce   :  { %v1779_v29 = vpop.f32.mrf.mxu1  ;;  %1940 = vmatmul.mubr.f32.vlgmr.msra.gmra.mxu1 %v1867_v40  ;;  %v8464_v40 = vmov 0  }
 0x4cf   :  { %v1872_v61 = vmul.f32 %v6971_v42, %v1779_v29  ;;  %2083 = vmatpush1.bf16.msra.mxu1 %v5164_v44  ;;  %v2046_v29 = vpop.permute.xlu1 %2045  ;;  %v5303_v44 = vld [vmem:[#allocation5 + $0x18] sm:$0xff] }
 0x4d0   :  { %v1848_v48 = vpop.f32.mrf.mxu1  ;;  %2084 = vmatprep.subr.bf16.mxu1 %v5169_v31  ;;  %v6984_v34 = vunpack.c.h.bf16 %v5303_v44  ;;  %v6987_v36 = vunpack.c.l.bf16 %v5303_v44 }
 0x4d1   :  { %1944 = vmatprep.mubr.f32.mxu1 %v1872_v61  ;;  %v1869_v42 = vmul.f32 %v6980_v20, %v1848_v48  ;;  %v5170_v48 = vld [vmem:[#allocation19 + $0x10] ss:$8 sps:$4 sm:$0xff]  }
 0x4d2   :  { %v1850_v25 = vpop.f32.mrf.mxu1  ;;  %1945 = vmatmul.mubr.f32.gmra.mxu1 %v1871_v39  ;;  %8465 = vst [vmem:[#allocation95_spill] sm:$0xff] %v6984_v34  ;;  %8466 = vst [vmem:[#allocation96_spill] sm:$0xff] %v6987_v36  ;;  %v8467_v39 = vmov 0.0  }
 0x4d3   :  { %v1870_v26 = vmul.f32 %v6977_v51, %v1850_v25  ;;  %2085 = vmatpush1.bf16.msra.mxu1 %v5167_v27  ;;  %2102 = vmatprep.mubr.bf16.mxu1 %v8464_v40  ;;  %v5172_v27 = vld [vmem:[#allocation19 + $0x14] ss:$8 sps:$4 sm:$0xff]   ;;  %v5175_v25 = vld [vmem:[#allocation19 + $0x4] ss:$8 sps:$4 sm:$0xff]  }
 0x4d4   :  { %v1854_v28 = vpop.f32.mrf.mxu1  ;;  %2153 = vmatprep.subr.bf16.mxu1 %v5172_v27 }
 0x4d5   :  { %2014 = vmatprep.mubr.f32.mxu0 %v1870_v26  ;;  %v1873_v31 = vmul.f32 %v6987_v36, %v1854_v28  ;;  %v5173_v26 = vld [vmem:[#allocation19] ss:$8 sps:$4 sm:$0xff]  }
 0x4d6   :  { %v1856_v62 = vpop.f32.mrf.mxu1  ;;  %2015 = vmatmul.mubr.f32.vlgmr.msra.gmra.mxu0 %v1869_v42  ;;  %4427 = vmatmul.mubr.msk.bf16.vlgmr.msra.gmra.mxu1 %vm1444_vm0, %v2046_v29 }
 0x4d7   :  { %v1874_v61 = vmul.f32 %v6984_v34, %v1856_v62  ;;  %2173 = vmatprep.mubr.bf16.mxu1 %v8464_v40  ;;  %2154 = vmatpush1.bf16.msra.mxu1 %v5170_v48 }
 0x4d8   :  { %2155 = vmatprep.subr.bf16.mxu1 %v5175_v25  ;;  %v4422_v25 = vld [vmem:[#allocation11] ss:$0 sm:$0xff] }
 0x4d9   :  { %2019 = vmatprep.mubr.f32.mxu0 %v1874_v61  ;;  %v4421_v61 = vld [vmem:[%s8204_s13] ss:$0 sm:$0xff] }
 0x4da   :  { %2020 = vmatmul.mubr.f32.gmra.mxu0 %v1873_v31 }
 0x4db   :  { %2369 = vmatprep.mubr.f32.mxu0 %v8467_v39  ;;  %2156 = vmatpush1.bf16.msra.mxu1 %v5173_v26 }
 0x58e   :  { %v4538_v42 = vpop.f32.mrf.mxu1 }
 0x590   :  { %v4539_v29 = vpop.f32.mrf.mxu1 }
 0x591   :  { %v4540_v40 = vadd.f32 %v4539_v29, %v4538_v42 }
 0x592   :  { %v4541_v44 = vpop.f32.mrf.mxu1 }
 0x594   :  { %v4542_v28 = vpop.f32.mrf.mxu1 }
 0x595   :  { %v4543_v48 = vadd.f32 %v4542_v28, %v4541_v44 }
 0x596   :  { %v4576_v62 = vpop.f32.mrf.mxu0 }
 0x598   :  { %v4577_v34 = vpop.f32.mrf.mxu0 }
 0x599   :  { %v4578_v20 = vadd.f32 %v4577_v34, %v4576_v62  ;;  %v2104_v34 = vpop.f32.mrf.mxu1 }
 0x59a   :  { %v4579_v31 = vpop.f32.mrf.mxu0 }
 0x59b   :  { %v2017_v36 = vadd.f32 %v4578_v20, %v4540_v40  ;;  %v2106_v29 = vpop.f32.mrf.mxu1  ;;  %v1416_v20 = vrot.slane %v6513_v60, %v6474_v7 }
 0x59c   :  { %v4580_v27 = vpop.f32.mrf.mxu0 }
 0x59d   :  { %v2031_v51 = vmul.f32 %v4421_v61, %v2017_v36  ;;  %v4581_v33 = vadd.f32 %v4580_v27, %v4579_v31  ;;  %v2108_v62 = vpop.f32.mrf.mxu1  ;;  %v7001_v36 = vadd.f32 %v6525_v5, %v1416_v20 }
 0x59f   :  { %v2022_v26 = vadd.f32 %v4581_v33, %v4543_v48  ;;  %v2039_v17 = vadd.f32 %v4422_v25, %v2031_v51  ;;  %v2110_v40 = vpop.f32.mrf.mxu1  ;;  %8468 = vst [vmem:[#allocation97_spill] sm:$0xff] %v7001_v36  ;;  %v2113_v33 = vadd.f32 %v2104_v34, %v6523_v4  ;;  %v7011_v48 = vpop.permute.xlu1 %2214  ;;  %v7228_v4 = vld [vmem:[%s8201_s10 + $0x80] sm:$0xff] }
 0x5a0   :  { %8485 = vst [vmem:[#allocation114_spill] sm:$0xff] %v7228_v4 }
 0x5a1   :  { %v2032_v32 = vmul.f32 %v4421_v61, %v2022_v26  ;;  %v2041_v41 = vmax.f32 %v2039_v17, 0.0 }
 0x5a3   :  { %v2040_v24 = vadd.f32 %v4422_v25, %v2032_v32  ;;  %v2114_v32 = vadd.f32 %v2106_v29, %v7001_v36  ;;  %v7222_v36 = vld [vmem:[%s8201_s10 + $0x8] sm:$0xff] }
 0x5a4   :  { %8484 = vst [vmem:[#allocation113_spill] sm:$0xff] %v7222_v36 }
 0x5a5   :  { %v2042_v11 = vmax.f32 %v2040_v24, 0.0 }
 0x5a7   :  { %v2117_v42 = vpack.c.bf16 %v2042_v11, %v2041_v41  ;;  %v7006_v11 = vadd.f32 %v6529_v16, %v1416_v20  ;;  %v2115_v41 = vadd.f32 %v2108_v62, %v6527_v9  ;;  %v2220_v16 = vsel %vm1444_vm0, %v6553_v54, %v7011_v48  ;;  %v7216_v9 = vld [vmem:[%s8201_s10 + $0x88] sm:$0xff] }
 0x5a8   :  { %8483 = vst [vmem:[#allocation112_spill] sm:$0xff] %v7216_v9 }
 0x5a9   :  { %4432 = vmatmul.mubr.msk.bf16.vlgmr.msra.gmra.mxu1 %vm1444_vm0, %v2117_v42  ;;  %8469 = vst [vmem:[#allocation98_spill] sm:$0xff] %v7006_v11  ;;  %v2116_v60 = vadd.f32 %v2110_v40, %v7006_v11  ;;  %v7210_v11 = vld [vmem:[%s8201_s10 + $0x10] sm:$0xff] }
 0x5aa   :  { %8482 = vst [vmem:[#allocation111_spill] sm:$0xff] %v7210_v11 }
 0x669   :  { %v2175_v51 = vpop.f32.mrf.mxu1 }
 0x66a   :  { %v2184_v17 = vadd.f32 %v2175_v51, %v2113_v33 }
 0x66b   :  { %v2177_v24 = vpop.f32.mrf.mxu1 }
 0x66c   :  { %v2185_v44 = vadd.f32 %v2177_v24, %v2114_v32  ;;  %v4433_v26 = vmul.f32 -1.442695, %v2184_v17 }
 0x66d   :  { %v2179_v28 = vpop.f32.mrf.mxu1 }
 0x66e   :  { %v2186_v61 = vadd.f32 %v2179_v28, %v2115_v41  ;;  %5194 = vtanh.f32 %v2185_v44 }
 0x66f   :  { %v2181_v5 = vpop.f32.mrf.mxu1 }
 0x670   :  { %v2187_v31 = vadd.f32 %v2181_v5, %v2116_v60  ;;  %v4435_v42 = vmul.f32 -1.442695, %v2186_v61 }
 0x672   :  { %5196 = vtanh.f32 %v2187_v31 }
 0x673   :  { %5198 = vpow2.f32 %v4433_v26  ;;  %v411_v26 = vld [vmem:[#allocation8 + $0x38] sm:$0xff] }
 0x674   :  { %5200 = vpow2.f32 %v4435_v42  ;;  %v410_v42 = vld [vmem:[#allocation8 + $0x30] sm:$0xff]  ;;  %2329 = vmatprep.subr.mxu0 %v411_v26 }
 0x675   :  { %2330 = vmatpush1.msra.mxu0 %v410_v42  ;;  %v7057_v42 = vld [vmem:[%s8201_s10 + $0xe8] sm:$0xff] }
 0x67b   :  { %v5195_v27 = vpop.eup %5194 }
 0x67c   :  { %2234 = vrot.lane.b32.xlu1 %v5195_v27, %s5750_s29 }
 0x67f   :  { %v5197_v25 = vpop.eup %5196 }
 0x680   :  { %2216 = vrot.lane.b32.xlu1 %v6555_v55, %s5755_s2  ;;  %2236 = vrot.lane.b32.xlu0 %v5197_v25, %s5750_s29  ;;  %v5199_v34 = vpop.eup %5198 }
 0x681   :  { %v2200_v29 = vadd.f32 1.0, %v5199_v34  ;;  %v5201_v62 = vpop.eup %5200  ;;  %v409_v34 = vld [vmem:[#allocation8 + $0x28] sm:$0xff] }
 0x682   :  { %v2202_v20 = vadd.f32 1.0, %v5201_v62  ;;  %2331 = vmatprep.subr.mxu0 %v409_v34 }
 0x683   :  { %5202 = vrcp.f32 %v2200_v29  ;;  %v408_v29 = vld [vmem:[#allocation8 + $0x20] sm:$0xff] }
 0x684   :  { %2224 = vrot.lane.b32.xlu1 %v2220_v16, %s5750_s29  ;;  %5204 = vrcp.f32 %v2202_v20  ;;  %2332 = vmatpush1.msra.mxu0 %v408_v29  ;;  %v7062_v29 = vld [vmem:[%s8201_s10 + $0x68] sm:$0xff] }
 0x690   :  { %v5203_v54 = vpop.eup %5202 }
 0x691   :  { %v5205_v24 = vpop.eup %5204 }
 0x6ee   :  { %v2235_v40 = vpop.permute.xlu1 %2234 }
 0x6ef   :  { %v2240_v32 = vmul.f32 %v5203_v54, %v2235_v40  ;;  %v4434_v40 = vmul.f32 -1.442695, %v2185_v44  ;;  %v7040_v44 = vld [vmem:[%s8201_s10 + $0xf8] sm:$0xff] }
 0x6f0   :  { %4582 = vmatprep.subr.mxu1 %v7040_v44 }
 0x6f2   :  { %v7020_v33 = vpop.permute.xlu1 %2216  ;;  %v2237_v17 = vpop.permute.xlu0 %2236 }
 0x6f3   :  { %v2221_v51 = vsel %vm1444_vm0, %v6555_v55, %v7020_v33  ;;  %v2241_v41 = vmul.f32 %v5205_v24, %v2237_v17 }
 0x6f4   :  { %2226 = vrot.lane.b32.xlu1 %v2221_v51, %s5750_s29  ;;  %v4436_v51 = vmul.f32 -1.442695, %v2187_v31  ;;  %v428_v31 = vld [vmem:[%s8201_s10 + $0x78] sm:$0xff] }
 0x6f5   :  { %4583 = vmatpush3.msra.mxu1 %v428_v31  ;;  %v7128_v31 = vld [vmem:[%s8201_s10 + $0x48] sm:$0xff] }
 0x6f6   :  { %v2225_v28 = vpop.permute.xlu1 %2224 }
 0x6f7   :  { %v2230_v61 = vmul.f32 %v5203_v54, %v2225_v28  ;;  %v406_v28 = vld [vmem:[#allocation8 + $0x10] sm:$0xff] }
 0x6f8   :  { %2244 = vrot.lane.b32.xlu1 %v2240_v32, %s5750_s29 }
 0x6fc   :  { %2246 = vrot.lane.b32.xlu1 %v2241_v41, %s5750_s29  ;;  %v407_v41 = vld [vmem:[#allocation8 + $0x18] sm:$0xff] }
 0x6fd   :  { %2333 = vmatprep.subr.mxu0 %v407_v41 }
 0x6fe   :  { %2334 = vmatpush1.msra.mxu0 %v406_v28 }
 0x766   :  { %v2227_v60 = vpop.permute.xlu1 %2226 }
 0x767   :  { %v2231_v25 = vmul.f32 %v5205_v24, %v2227_v60  ;;  %v405_v60 = vld [vmem:[#allocation8 + $0x8] sm:$0xff] }
 0x768   :  { %2335 = vmatprep.subr.mxu0 %v405_v60 }
 0x76a   :  { %v2245_v5 = vpop.permute.xlu1 %2244 }
 0x76b   :  { %v7028_v27 = vadd.f32 %v2245_v5, %v2230_v61  ;;  %v404_v61 = vld [vmem:[#allocation8] sm:$0xff]  ;;  %v443_v5 = vld [vmem:[%s8201_s10 + $0xf0] sm:$0xff] }
 0x76c   :  { %2336 = vmatpush1.msra.mxu0 %v404_v61  ;;  %4584 = vmatprep.subr.mxu1 %v443_v5  ;;  %v7098_v61 = vld [vmem:[%s8201_s10 + $0xd8] sm:$0xff]  ;;  %v7134_v5 = vld [vmem:[%s8201_s10 + $0xc0] sm:$0xff] }
 0x76d   :  { %8470 = vst [vmem:[#allocation99_spill] sm:$0xff] %v7028_v27  ;;  %5206 = vtanh.f32 %v7028_v27  ;;  %2525 = vmatprep.subr.mxu0 %v6538_v45  ;;  %v7204_v27 = vld [vmem:[%s8201_s10 + $0x90] sm:$0xff] }
 0x76e   :  { %v2247_v55 = vpop.permute.xlu1 %2246  ;;  %8481 = vst [vmem:[#allocation110_spill] sm:$0xff] %v7204_v27 }
 0x76f   :  { %v7031_v16 = vadd.f32 %v2247_v55, %v2231_v25  ;;  %v7052_v25 = vld [vmem:[%s8201_s10 + $0x70] sm:$0xff] }
 0x770   :  { %4585 = vmatpush3.msra.mxu1 %v7052_v25 }
 0x771   :  { %8471 = vst [vmem:[#allocation100_spill] sm:$0xff] %v7031_v16  ;;  %5208 = vtanh.f32 %v7031_v16  ;;  %4586 = vmatprep.subr.mxu1 %v7057_v42  ;;  %v7198_v16 = vld [vmem:[%s8201_s10 + $0x18] sm:$0xff] }
 0x772   :  { %5210 = vpow2.f32 %v4434_v40  ;;  %4587 = vmatpush3.msra.mxu1 %v7062_v29  ;;  %8480 = vst [vmem:[#allocation109_spill] sm:$0xff] %v7198_v16 }
 0x773   :  { %5212 = vpow2.f32 %v4436_v51 }
 0x77a   :  { %v5207_v62 = vpop.eup %5206 }
 0x77b   :  { %2256 = vrot.lane.b32.xlu1 %v5207_v62, %s5750_s29  ;;  %v7068_v62 = vld [vmem:[%s8201_s10 + $0xe0] sm:$0xff] }
 0x77c   :  { %4588 = vmatprep.subr.mxu1 %v7068_v62 }
 0x77e   :  { %v5209_v20 = vpop.eup %5208 }
 0x77f   :  { %2258 = vrot.lane.b32.xlu0 %v5209_v20, %s5750_s29  ;;  %v5211_v54 = vpop.eup %5210  ;;  %v7075_v20 = vld [vmem:[%s8201_s10 + $0x60] sm:$0xff] }
 0x780   :  { %v2201_v32 = vadd.f32 1.0, %v5211_v54  ;;  %v5213_v17 = vpop.eup %5212  ;;  %4589 = vmatpush3.msra.mxu1 %v7075_v20 }
 0x781   :  { %v2203_v24 = vadd.f32 1.0, %v5213_v17  ;;  %4590 = vmatprep.subr.mxu1 %v7098_v61 }
 0x782   :  { %5214 = vrcp.f32 %v2201_v32 }
 0x783   :  { %5216 = vrcp.f32 %v2203_v24 }
 0x78f   :  { %v5215_v55 = vpop.eup %5214 }
 0x790   :  { %v5217_v40 = vpop.eup %5216 }
 0x7ed   :  { %v2257_v26 = vpop.permute.xlu1 %2256 }
 0x7ee   :  { %v2262_v34 = vmul.f32 %v5215_v55, %v2257_v26  ;;  %v7140_v55 = vld [vmem:[%s8201_s10 + $0x40] sm:$0xff]  ;;  %v7146_v26 = vld [vmem:[%s8201_s10 + $0xb8] sm:$0xff] }
 0x7f0   :  { %2276 = vrot.lane.b32.xlu1 %v2262_v34, %s5760_s5 }
 0x7f1   :  { %v2259_v51 = vpop.permute.xlu0 %2258 }
 0x7f2   :  { %v2263_v54 = vmul.f32 %v5217_v40, %v2259_v51  ;;  %v7158_v40 = vld [vmem:[%s8201_s10 + $0xb0] sm:$0xff] }
 0x7f3   :  { %8473 = vst [vmem:[#allocation102_spill] sm:$0xff] %v7158_v40  ;;  %v7164_v51 = vld [vmem:[%s8201_s10 + $0x30] sm:$0xff] }
 0x7f4   :  { %2278 = vrot.lane.b32.xlu0 %v2263_v54, %s5760_s5  ;;  %8474 = vst [vmem:[#allocation103_spill] sm:$0xff] %v7164_v51 }
 0x862   :  { %v2277_v32 = vpop.permute.xlu1 %2276 }
 0x863   :  { %v2282_v17 = vadd.f32 %v2277_v32, %v2262_v34  ;;  %v7152_v34 = vld [vmem:[%s8201_s10 + $0x38] sm:$0xff]  ;;  %v7176_v32 = vld [vmem:[%s8201_s10 + $0x28] sm:$0xff] }
 0x864   :  { %8472 = vst [vmem:[#allocation101_spill] sm:$0xff] %v7152_v34  ;;  %8476 = vst [vmem:[#allocation105_spill] sm:$0xff] %v7176_v32 }
 0x865   :  { %v7081_v24 = vmul.f32 0.5, %v2282_v17  ;;  %v7182_v17 = vld [vmem:[%s8201_s10 + $0xa0] sm:$0xff] }
 0x866   :  { %v2279_v41 = vpop.permute.xlu0 %2278  ;;  %8477 = vst [vmem:[#allocation106_spill] sm:$0xff] %v7182_v17 }
 0x867   :  { %v2283_v28 = vadd.f32 %v2279_v41, %v2263_v54  ;;  %4437 = vmatmul.mubr.msk.f32.vlgmr.msra.gmra.mxu0 %vm1444_vm0, %v7081_v24  ;;  %v7170_v54 = vld [vmem:[%s8201_s10 + $0xa8] sm:$0xff]  ;;  %v7187_v41 = vld [vmem:[%s8201_s10 + $0x20] sm:$0xff] }
 0x868   :  { %2375 = vmatprep.mubr.f32.mxu0 %v8467_v39  ;;  %2526 = vmatpush1.msra.mxu0 %v6541_v46  ;;  %v7104_v46 = vld [vmem:[%s8201_s10 + $0x58] sm:$0xff]  ;;  %8475 = vst [vmem:[#allocation104_spill] sm:$0xff] %v7170_v54  ;;  %8478 = vst [vmem:[#allocation107_spill] sm:$0xff] %v7187_v41 }
 0x869   :  { %v7087_v60 = vmul.f32 0.5, %v2283_v28  ;;  %2527 = vmatprep.subr.mxu0 %v6544_v47  ;;  %4591 = vmatpush3.msra.mxu1 %v7104_v46  ;;  %v7110_v47 = vld [vmem:[%s8201_s10 + $0xd0] sm:$0xff]  ;;  %v7192_v28 = vld [vmem:[%s8201_s10 + $0x98] sm:$0xff] }
 0x86a   :  { %2528 = vmatpush1.msra.mxu0 %v6547_v50  ;;  %4592 = vmatprep.subr.mxu1 %v7110_v47  ;;  %v7116_v50 = vld [vmem:[%s8201_s10 + $0x50] sm:$0xff]  ;;  %8479 = vst [vmem:[#allocation108_spill] sm:$0xff] %v7192_v28 }
 0x86b   :  { %4438 = vmatmul.mubr.msk.f32.gmra.mxu0 %vm1444_vm0, %v7087_v60  ;;  %2602 = vmatprep.subr.mxu0 %v6550_v53  ;;  %v7122_v53 = vld [vmem:[%s8201_s10 + $0xc8] sm:$0xff] }
 0x86c   :  { %2561 = vmatprep.mubr.f32.mxu0 %v8467_v39  ;;  %4593 = vmatpush3.msra.mxu1 %v7116_v50 }
 0x86d   :  { %4594 = vmatprep.subr.mxu1 %v7122_v53 }
 0x86e   :  { %4595 = vmatpush3.msra.mxu1 %v7128_v31 }
 0x86f   :  { %4596 = vmatprep.subr.mxu1 %v7134_v5 }
 0x870   :  { %4597 = vmatpush3.msra.mxu1 %v7140_v55 }
 0x871   :  { %4598 = vmatprep.subr.mxu1 %v7146_v26 }
 0x872   :  { %4599 = vmatpush3.msra.mxu1 %v7152_v34 }
 0x873   :  { %4600 = vmatprep.subr.mxu1 %v7158_v40  ;;  %v8322_v40 = vmax.f32 %v6497_v43, 0.0 }
 0x874   :  { %4601 = vmatpush3.msra.mxu1 %v7164_v51 }
 0x875   :  { %4602 = vmatprep.subr.mxu1 %v7170_v54 }
 0x876   :  { %4603 = vmatpush3.msra.mxu1 %v7176_v32  ;;  %v8324_v32 = vmax.f32 %v6483_v30, 0.0 }
 0x877   :  { %4604 = vmatprep.subr.mxu1 %v7182_v17 }
 0x878   :  { %4605 = vmatpush3.msra.mxu1 %v7187_v41 }
 0x879   :  { %4606 = vmatprep.subr.mxu1 %v7192_v28 }
 0x87a   :  { %4607 = vmatpush3.msra.mxu1 %v7198_v16  ;;  %v7234_v16 = vld [vmem:[%s8201_s10] sm:$0xff] }
 0x87b   :  { %4608 = vmatprep.subr.mxu1 %v7204_v27  ;;  %8486 = vst [vmem:[#allocation115_spill] sm:$0xff] %v7234_v16 }
 0x87c   :  { %4609 = vmatpush3.msra.mxu1 %v7210_v11  ;;  %v412_v11 = vld [vmem:[%s8200_s9] sm:$0x3] }
 0x87d   :  { %4610 = vmatprep.subr.mxu1 %v7216_v9  ;;  %v7244_v27 = vrot.slane %v412_v11, %v6472_v6  ;;  %v7247_v9 = vrot.slane %v412_v11, %v6474_v7 }
 0x87e   :  { %4611 = vmatpush3.msra.mxu1 %v7222_v36 }
 0x87f   :  { %4612 = vmatprep.subr.mxu1 %v7228_v4 }
 0x880   :  { %4613 = vmatpush3.msra.mxu1 %v7234_v16  ;;  %v8325_v16 = vmax.f32 %v6481_v23, 0.0 }
 0x881   :  { %4658 = vmatprep.subr.mxu1 %v6566_v57 }
 0x927   :  { %v2371_v28 = vpop.f32.mrf.mxu0 }
 0x928   :  { %v2372_v41 = vadd.f32 %v2371_v28, %v7244_v27 }
 0x929   :  { %v2373_v36 = vpop.f32.mrf.mxu0 }
 0x92a   :  { %v2382_v17 = vmax.f32 %v2372_v41, 0.0  ;;  %v2374_v4 = vadd.f32 %v2373_v36, %v7247_v9  ;;  %v8323_v36 = vmax.f32 %v6488_v35, 0.0 }
 0x92b   :  { %v2377_v57 = vpop.f32.mrf.mxu0 }
 0x92c   :  { %v2383_v54 = vmax.f32 %v2374_v4, 0.0  ;;  %v2378_v51 = vadd.f32 %v2377_v57, %v7244_v27  ;;  %v2386_v6 = vadd.f32 %v2382_v17, %v8325_v16  ;;  %v7659_v16 = vld [vmem:[%s8203_s12 + $0x118] sm:$0xff] }
 0x92d   :  { %v2379_v7 = vpop.f32.mrf.mxu0 }
 0x92e   :  { %v2387_v11 = vadd.f32 %v2383_v54, %v8324_v32  ;;  %v2384_v28 = vmax.f32 %v2378_v51, 0.0  ;;  %v2380_v41 = vadd.f32 %v2379_v7, %v7247_v9  ;;  %v7653_v32 = vld [vmem:[%s8203_s12 + $0x198] sm:$0xff] }
 0x930   :  { %5218 = vtanh.f32 %v2387_v11  ;;  %v2385_v34 = vmax.f32 %v2380_v41, 0.0  ;;  %v2388_v4 = vadd.f32 %v2384_v28, %v8323_v36  ;;  %v7647_v36 = vld [vmem:[%s8203_s12 + $0x120] sm:$0xff] }
 0x931   :  { %5220 = vtanh.f32 %v2386_v6 }
 0x932   :  { %v2389_v17 = vadd.f32 %v2385_v34, %v8322_v40 }
 0x934   :  { %5222 = vtanh.f32 %v2389_v17 }
 0x935   :  { %5224 = vtanh.f32 %v2388_v4 }
 0x93d   :  { %v5219_v57 = vpop.eup %5218 }
 0x93e   :  { %v5221_v54 = vpop.eup %5220  ;;  %2458 = vmatprep.mubr.f32.mxu1 %v5219_v57 }
 0x93f   :  { %2459 = vmatmul.mubr.f32.vlgmr.msra.gmra.mxu1 %v5221_v54 }
 0x940   :  { %4659 = vmatpush3.msra.mxu1 %v6572_v58  ;;  %v8487_v58 = vld [vmem:[#allocation80_spill] sm:$0xff] }
 0x941   :  { %v5223_v51 = vpop.eup %5222  ;;  %4660 = vmatprep.subr.mxu1 %v6578_v59  ;;  %v8488_v59 = vld [vmem:[#allocation81_spill] sm:$0xff] }
 0x942   :  { %v5225_v7 = vpop.eup %5224  ;;  %2463 = vmatprep.mubr.f32.mxu1 %v5223_v51  ;;  %4661 = vmatpush3.msra.mxu1 %v6586_v63  ;;  %v8489_v63 = vld [vmem:[#allocation82_spill] sm:$0xff]  ;;  %v8496_v51 = vld [vmem:[#allocation45_spill] sm:$0xff] }
 0x943   :  { %2464 = vmatmul.mubr.f32.gmra.mxu1 %v5225_v7  ;;  %4662 = vmatprep.subr.mxu1 %v6592_v0  ;;  %v8490_v0 = vld [vmem:[#allocation83_spill] sm:$0xff] }
 0x944   :  { %4663 = vmatpush3.msra.mxu1 %v6598_v1  ;;  %v8491_v1 = vld [vmem:[#allocation84_spill] sm:$0xff] }
 0x945   :  { %4664 = vmatprep.subr.mxu1 %v6604_v2  ;;  %v8492_v2 = vld [vmem:[#allocation85_spill] sm:$0xff] }
 0x946   :  { %4665 = vmatpush3.msra.mxu1 %v6610_v3 }
 0x947   :  { %4666 = vmatprep.subr.mxu1 %v6616_v8 }
 0x948   :  { %4667 = vmatpush3.msra.mxu1 %v6622_v12 }
 0x949   :  { %4668 = vmatprep.subr.mxu1 %v6628_v13 }
 0x94a   :  { %4669 = vmatpush3.msra.mxu1 %v6634_v14 }
 0x94b   :  { %4670 = vmatprep.subr.mxu1 %v6640_v15 }
 0x94c   :  { %4671 = vmatpush3.msra.mxu1 %v6646_v18 }
 0x94d   :  { %4672 = vmatprep.subr.mxu1 %v6652_v10 }
 0x94e   :  { %4673 = vmatpush3.msra.mxu1 %v6658_v19 }
 0x94f   :  { %4674 = vmatprep.subr.mxu1 %v6664_v21 }
 0x950   :  { %4675 = vmatpush3.msra.mxu1 %v6670_v22 }
 0x951   :  { %4676 = vmatprep.subr.mxu1 %v6854_v38  ;;  %v8493_v38 = vld [vmem:[#allocation86_spill] sm:$0xff] }
 0x952   :  { %4677 = vmatpush3.msra.mxu1 %v6866_v52  ;;  %v8494_v52 = vld [vmem:[#allocation87_spill] sm:$0xff] }
 0x953   :  { %4678 = vmatprep.subr.mxu1 %v6878_v37  ;;  %v8495_v37 = vld [vmem:[#allocation88_spill] sm:$0xff] }
 0x954   :  { %4679 = vmatpush3.msra.mxu1 %v6890_v49 }
 0x955   :  { %4680 = vmatprep.subr.mxu1 %v6902_v56 }
 0x956   :  { %4681 = vmatpush3.msra.mxu1 %v8487_v58  ;;  %v8497_v58 = vld [vmem:[#allocation46_spill] sm:$0xff] }
 0x957   :  { %4682 = vmatprep.subr.mxu1 %v8488_v59  ;;  %v8498_v59 = vld [vmem:[#allocation47_spill] sm:$0xff] }
 0x958   :  { %4683 = vmatpush3.msra.mxu1 %v8489_v63  ;;  %v8499_v63 = vld [vmem:[#allocation48_spill] sm:$0xff] }
 0x959   :  { %4684 = vmatprep.subr.mxu1 %v8490_v0  ;;  %v8500_v0 = vld [vmem:[#allocation49_spill] sm:$0xff] }
 0x95a   :  { %4685 = vmatpush3.msra.mxu1 %v8491_v1  ;;  %v8501_v1 = vld [vmem:[#allocation50_spill] sm:$0xff]  ;;  %8562 = vst [vmem:[#allocation49_spill] sm:$0xff] %v7647_v36 }
 0x95b   :  { %4686 = vmatprep.subr.mxu1 %v8492_v2  ;;  %v8502_v2 = vld [vmem:[#allocation51_spill] sm:$0xff]  ;;  %8563 = vst [vmem:[#allocation50_spill] sm:$0xff] %v7653_v32 }
 0x95c   :  { %4687 = vmatpush3.msra.mxu1 %v8493_v38  ;;  %v8503_v38 = vld [vmem:[#allocation52_spill] sm:$0xff]  ;;  %8564 = vst [vmem:[#allocation51_spill] sm:$0xff] %v7659_v16 }
 0x95d   :  { %4688 = vmatprep.subr.mxu1 %v8494_v52  ;;  %v8504_v52 = vld [vmem:[#allocation53_spill] sm:$0xff] }
 0x95e   :  { %4689 = vmatpush3.msra.mxu1 %v8495_v37  ;;  %v8505_v37 = vld [vmem:[#allocation54_spill] sm:$0xff] }
 0x95f   :  { %3053 = vmatprep.subr.mxu1 %v6538_v45 }
 0x9ff   :  { %v4614_v49 = vpop.f32.mrf.mxu1 }
 0xa01   :  { %v4615_v56 = vpop.f32.mrf.mxu1 }
 0xa02   :  { %v4616_v3 = vadd.f32 %v4615_v56, %v4614_v49  ;;  %v8506_v49 = vld [vmem:[#allocation55_spill] sm:$0xff]  ;;  %v8507_v56 = vld [vmem:[#allocation56_spill] sm:$0xff] }
 0xa03   :  { %v4617_v8 = vpop.f32.mrf.mxu1 }
 0xa04   :  { %v2469_v12 = vsel %vm1676_vm1, %v4616_v3, -inf }
 0xa05   :  { %v4618_v13 = vpop.f32.mrf.mxu1  ;;  %2470 = vmax.xlane.f32.xlu1 %v2469_v12  ;;  %v8510_v12 = vld [vmem:[#allocation59_spill] sm:$0xff] }
 0xa06   :  { %v4619_v14 = vadd.f32 %v4618_v13, %v4617_v8  ;;  %v8509_v8 = vld [vmem:[#allocation58_spill] sm:$0xff]  ;;  %v8511_v13 = vld [vmem:[#allocation60_spill] sm:$0xff] }
 0xa08   :  { %v2472_v15 = vsel %vm1676_vm1, %v4619_v14, -inf }
 0xa09   :  { %2473 = vmax.xlane.f32.xlu0 %v2472_v15  ;;  %v8513_v15 = vld [vmem:[#allocation62_spill] sm:$0xff] }
 0xa8e   :  { %v2471_v18 = vpop.xlane.xlu1 %2470 }
 0xa8f   :  { %v2475_v10 = vsub.f32 %v4616_v3, %v2471_v18  ;;  %v8508_v3 = vld [vmem:[#allocation57_spill] sm:$0xff]  ;;  %v8514_v18 = vld [vmem:[#allocation63_spill] sm:$0xff] }
 0xa91   :  { %v2477_v19 = vmul.f32 1.442695, %v2475_v10  ;;  %v8515_v10 = vld [vmem:[#allocation64_spill] sm:$0xff] }
 0xa92   :  { %v2474_v21 = vpop.xlane.xlu0 %2473 }
 0xa93   :  { %5226 = vpow2.f32 %v2477_v19  ;;  %v2476_v22 = vsub.f32 %v4619_v14, %v2474_v21  ;;  %v8512_v14 = vld [vmem:[#allocation61_spill] sm:$0xff]  ;;  %v8517_v21 = vld [vmem:[#allocation66_spill] sm:$0xff] }
 0xa94   :  { %v8516_v19 = vld [vmem:[#allocation65_spill] sm:$0xff] }
 0xa95   :  { %v2479_v34 = vmul.f32 1.442695, %v2476_v22  ;;  %v8518_v22 = vld [vmem:[#allocation67_spill] sm:$0xff] }
 0xa97   :  { %5228 = vpow2.f32 %v2479_v34  ;;  %v8519_v34 = vld [vmem:[#allocation68_spill] sm:$0xff] }
 0xaa0   :  { %v5227_v45 = vpop.eup %5226 }
 0xaa1   :  { %v2481_v6 = vsel %vm1676_vm1, %v5227_v45, 0.0 }
 0xaa2   :  { %2482 = vadd.xlane.f32.xlu0 %v2481_v6  ;;  %v8521_v6 = vld [vmem:[#allocation70_spill] sm:$0xff] }
 0xaa4   :  { %v5229_v11 = vpop.eup %5228 }
 0xaa5   :  { %v2484_v28 = vsel %vm1676_vm1, %v5229_v11, 0.0 }
 0xaa6   :  { %2485 = vadd.xlane.f32.xlu1 %v2484_v28  ;;  %v8523_v28 = vld [vmem:[#allocation72_spill] sm:$0xff] }
 0xb2b   :  { %v2483_v41 = vpop.xlane.xlu0 %2482 }
 0xb2c   :  { %5230 = vrcp.f32 %v2483_v41  ;;  %v8524_v41 = vld [vmem:[#allocation73_spill] sm:$0xff] }
 0xb2f   :  { %v2486_v4 = vpop.xlane.xlu1 %2485 }
 0xb30   :  { %5232 = vrcp.f32 %v2486_v4  ;;  %v8525_v4 = vld [vmem:[#allocation74_spill] sm:$0xff] }
 0xb39   :  { %v5231_v17 = vpop.eup %5230 }
 0xb3a   :  { %v2489_v57 = vmul.f32 %v5231_v17, %v5227_v45  ;;  %v8520_v45 = vld [vmem:[#allocation69_spill] sm:$0xff]  ;;  %v8526_v17 = vld [vmem:[#allocation75_spill] sm:$0xff] }
 0xb3c   :  { %4439 = vmatmul.mubr.msk.f32.vlgmr.msra.gmra.mxu0 %vm1676_vm1, %v2489_v57 }
 0xb3d   :  { %v5233_v54 = vpop.eup %5232  ;;  %2567 = vmatprep.mubr.f32.mxu0 %v8467_v39  ;;  %2603 = vmatpush1.msra.mxu0 %v8496_v51  ;;  %v8529_v51 = vld [vmem:[#allocation78_spill] sm:$0xff] }
 0xb3e   :  { %v2490_v7 = vmul.f32 %v5233_v54, %v5229_v11  ;;  %2604 = vmatprep.subr.mxu0 %v8497_v58  ;;  %v8522_v11 = vld [vmem:[#allocation71_spill] sm:$0xff]  ;;  %v8528_v54 = vld [vmem:[#allocation77_spill] sm:$0xff] }
 0xb3f   :  { %2605 = vmatpush1.msra.mxu0 %v8498_v59  ;;  %v5304_v58 = vld [vmem:[%s8399_s6 + $0x38] sm:$0xff] }
 0xb40   :  { %4440 = vmatmul.mubr.msk.f32.gmra.mxu0 %vm1676_vm1, %v2490_v7  ;;  %4620 = vmatprep.subr.mxu0 %v8499_v63 }
 0xb41   :  { %2638 = vmatprep.mubr.f32.mxu0 %v8467_v39 }
 0xb44   :  { %4441 = vmatmul.mubr.msk.f32.vlgmr.msra.gmra.mxu0 %vm1676_vm1, %v2489_v57  ;;  %v8527_v57 = vld [vmem:[#allocation76_spill] sm:$0xff] }
 0xb45   :  { %2644 = vmatprep.mubr.f32.mxu0 %v8467_v39  ;;  %4621 = vmatpush3.msra.mxu0 %v8500_v0  ;;  %v8531_v0 = vld [vmem:[#allocation89_spill] sm:$0xff] }
 0xb46   :  { %4622 = vmatprep.subr.mxu0 %v8501_v1 }
 0xb47   :  { %4623 = vmatpush3.msra.mxu0 %v8502_v2  ;;  %v8532_v2 = vld [vmem:[#allocation90_spill] sm:$0xff] }
 0xb48   :  { %4442 = vmatmul.mubr.msk.f32.gmra.mxu0 %vm1676_vm1, %v2490_v7  ;;  %4624 = vmatprep.subr.mxu0 %v8503_v38  ;;  %v8530_v7 = vld [vmem:[#allocation79_spill] sm:$0xff] }
 0xb49   :  { %4625 = vmatpush3.msra.mxu0 %v8504_v52 }
 0xb4a   :  { %4626 = vmatprep.subr.mxu0 %v8505_v37 }
 0xb4b   :  { %4627 = vmatpush3.msra.mxu0 %v8506_v49  ;;  %v8533_v49 = vld [vmem:[#allocation91_spill] sm:$0xff] }
 0xb4c   :  { %4628 = vmatprep.subr.mxu0 %v8507_v56 }
 0xb4d   :  { %4629 = vmatpush3.msra.mxu0 %v8508_v3  ;;  %v5305_v3 = vld [vmem:[%s8399_s6 + $0x30] sm:$0xff] }
 0xb4e   :  { %4630 = vmatprep.subr.mxu0 %v8509_v8  ;;  %v8534_v8 = vld [vmem:[#allocation92_spill] sm:$0xff] }
 0xb4f   :  { %4631 = vmatpush3.msra.mxu0 %v8510_v12 }
 0xb50   :  { %4632 = vmatprep.subr.mxu0 %v8511_v13 }
 0xb51   :  { %4633 = vmatpush3.msra.mxu0 %v8512_v14  ;;  %v5306_v14 = vld [vmem:[%s8399_s6 + $0x28] sm:$0xff] }
 0xb52   :  { %4634 = vmatprep.subr.mxu0 %v8513_v15  ;;  %v5307_v15 = vld [vmem:[%s8399_s6 + $0x20] sm:$0xff] }
 0xb53   :  { %4635 = vmatpush3.msra.mxu0 %v8514_v18 }
 0xb54   :  { %4636 = vmatprep.subr.mxu0 %v8515_v10  ;;  %v5308_v10 = vld [vmem:[%s8399_s6 + $0x18] sm:$0xff] }
 0xb55   :  { %4637 = vmatpush3.msra.mxu0 %v8516_v19  ;;  %v8535_v19 = vld [vmem:[#allocation93_spill] sm:$0xff] }
 0xb56   :  { %4638 = vmatprep.subr.mxu0 %v8517_v21 }
 0xb57   :  { %4639 = vmatpush3.msra.mxu0 %v8518_v22  ;;  %v5309_v22 = vld [vmem:[%s8399_s6 + $0x10] sm:$0xff] }
 0xb58   :  { %4640 = vmatprep.subr.mxu0 %v8519_v34  ;;  %v8536_v34 = vld [vmem:[#allocation94_spill] sm:$0xff] }
 0xb59   :  { %4641 = vmatpush3.msra.mxu0 %v8520_v45 }
 0xb5a   :  { %4642 = vmatprep.subr.mxu0 %v8521_v6 }
 0xb5b   :  { %4643 = vmatpush3.msra.mxu0 %v8522_v11  ;;  %v5310_v11 = vld [vmem:[%s8399_s6 + $0x8] sm:$0xff] }
 0xb5c   :  { %4644 = vmatprep.subr.mxu0 %v8523_v28  ;;  %v5311_v28 = vld [vmem:[%s8399_s6] sm:$0xff] }
 0xb5d   :  { %4645 = vmatpush3.msra.mxu0 %v8524_v41 }
 0xb5e   :  { %4646 = vmatprep.subr.mxu0 %v8525_v4  ;;  %v8537_v4 = vld [vmem:[#allocation95_spill] sm:$0xff] }
 0xb5f   :  { %4647 = vmatpush3.msra.mxu0 %v8526_v17 }
 0xb60   :  { %4648 = vmatprep.subr.mxu0 %v8527_v57  ;;  %v5312_v57 = vld [vmem:[%s8402_s19 + $0xf8] sm:$0xff] }
 0xb61   :  { %4649 = vmatpush3.msra.mxu0 %v8528_v54  ;;  %v8538_v54 = vld [vmem:[#allocation96_spill] sm:$0xff] }
 0xb62   :  { %4650 = vmatprep.subr.mxu0 %v8529_v51 }
 0xb63   :  { %4651 = vmatpush3.msra.mxu0 %v8530_v7  ;;  %v5313_v7 = vld [vmem:[%s8402_s19 + $0x78] sm:$0xff] }
 0xb64   :  { %2857 = vmatprep.subr.mxu0 %v5304_v58  ;;  %v7385_v58 = vld [vmem:[#allocation10 + $0x20] sm:$0xff] }
 0xbfc   :  { %v2563_v59 = vpop.f32.mrf.mxu0 }
 0xbfd   :  { %v2651_v38 = vmul.f32 %v2563_v59, %v8532_v2  ;;  %v5316_v59 = vld [vmem:[%s8402_s19 + $0x70] sm:$0xff] }
 0xbfe   :  { %v2565_v63 = vpop.f32.mrf.mxu0 }
 0xbff   :  { %v2652_v1 = vmul.f32 %v2565_v63, %v8531_v0  ;;  %v7396_v63 = vld [vmem:[#allocation10 + $0x8] sm:$0xff] }
 0xc00   :  { %v2569_v52 = vpop.f32.mrf.mxu0 }
 0xc01   :  { %2723 = vmatprep.mubr.f32.mxu0 %v2652_v1  ;;  %v2655_v12 = vmul.f32 %v2569_v52, %v8534_v8  ;;  %v5318_v1 = vld [vmem:[%s8402_s19 + $0xe8] sm:$0xff]  ;;  %v5321_v52 = vld [vmem:[%s8402_s19 + $0xe0] sm:$0xff] }
 0xc02   :  { %v2571_v37 = vpop.f32.mrf.mxu0  ;;  %2724 = vmatmul.mubr.f32.vlgmr.msra.gmra.mxu0 %v2651_v38  ;;  %v7402_v38 = vld [vmem:[#allocation10] sm:$0xff] }
 0xc03   :  { %v2656_v56 = vmul.f32 %v2571_v37, %v8533_v49  ;;  %2858 = vmatpush1.msra.mxu0 %v5305_v3  ;;  %v7412_v37 = vld [vmem:[#allocation10 + $0x38] sm:$0xff]  ;;  %v5324_v3 = vld [vmem:[%s8402_s19 + $0xd8] sm:$0xff] }
 0xc04   :  { %v2640_v13 = vpop.f32.mrf.mxu0  ;;  %2859 = vmatprep.subr.mxu0 %v5306_v14  ;;  %v5327_v14 = vld [vmem:[%s8402_s19 + $0x50] sm:$0xff] }
 0xc05   :  { %2728 = vmatprep.mubr.f32.mxu0 %v2656_v56  ;;  %2860 = vmatpush1.msra.mxu0 %v5307_v15  ;;  %v2653_v45 = vmul.f32 %v2640_v13, %v8536_v34  ;;  %v5323_v56 = vld [vmem:[%s8402_s19 + $0x60] sm:$0xff]  ;;  %v5326_v13 = vld [vmem:[%s8402_s19 + $0xd0] sm:$0xff]  ;;  %v5328_v15 = vld [vmem:[%s8402_s19 + $0xc8] sm:$0xff] }
 0xc06   :  { %v2642_v18 = vpop.f32.mrf.mxu0  ;;  %2729 = vmatmul.mubr.f32.gmra.mxu0 %v2655_v12  ;;  %2861 = vmatprep.subr.mxu0 %v5308_v10  ;;  %v5325_v12 = vld [vmem:[%s8402_s19 + $0x58] sm:$0xff]  ;;  %v5330_v10 = vld [vmem:[%s8402_s19 + $0xc0] sm:$0xff] }
 0xc07   :  { %v2654_v21 = vmul.f32 %v2642_v18, %v8535_v19  ;;  %2862 = vmatpush1.msra.mxu0 %v5309_v22  ;;  %2897 = vmatprep.mubr.f32.mxu0 %v8467_v39  ;;  %v5329_v18 = vld [vmem:[%s8402_s19 + $0x48] sm:$0xff]  ;;  %v5332_v22 = vld [vmem:[%s8402_s19 + $0xb8] sm:$0xff] }
 0xc08   :  { %v2646_v6 = vpop.f32.mrf.mxu0  ;;  %2863 = vmatprep.subr.mxu0 %v5310_v11  ;;  %v5335_v11 = vld [vmem:[%s8402_s19 + $0x30] sm:$0xff] }
 0xc09   :  { %2798 = vmatprep.mubr.f32.mxu1 %v2654_v21  ;;  %2864 = vmatpush1.msra.mxu0 %v5311_v28  ;;  %v2657_v51 = vmul.f32 %v2646_v6, %v8538_v54  ;;  %v5331_v21 = vld [vmem:[%s8402_s19 + $0x40] sm:$0xff]  ;;  %v5334_v6 = vld [vmem:[%s8402_s19 + $0xb0] sm:$0xff]  ;;  %v5336_v28 = vld [vmem:[%s8402_s19 + $0xa8] sm:$0xff] }
 0xc0a   :  { %v2648_v41 = vpop.f32.mrf.mxu0  ;;  %2799 = vmatmul.mubr.f32.vlgmr.msra.gmra.mxu1 %v2653_v45  ;;  %4445 = vmatmul.mubr.msk.f32.vlgmr.msra.gmra.mxu0 %vm1444_vm0, %v7011_v48  ;;  %v5315_v48 = vld [vmem:[%s8402_s19 + $0xf0] sm:$0xff]  ;;  %v5333_v45 = vld [vmem:[%s8402_s19 + $0x38] sm:$0xff] }
 0xc0b   :  { %v2658_v17 = vmul.f32 %v2648_v41, %v8537_v4  ;;  %2903 = vmatprep.mubr.f32.mxu0 %v8467_v39  ;;  %4696 = vmatprep.subr.mxu0 %v5312_v57  ;;  %v5337_v41 = vld [vmem:[%s8402_s19 + $0x28] sm:$0xff]  ;;  %v5339_v57 = vld [vmem:[%s8402_s19 + $0x20] sm:$0xff] }
 0xc0c   :  { %4697 = vmatpush3.msra.mxu0 %v5313_v7  ;;  %3054 = vmatpush1.msra.mxu1 %v7385_v58  ;;  %v5341_v7 = vld [vmem:[%s8402_s19 + $0x18] sm:$0xff] }
 0xc0d   :  { %2803 = vmatprep.mubr.f32.mxu1 %v2658_v17  ;;  %4698 = vmatprep.subr.mxu0 %v5315_v48  ;;  %v5338_v17 = vld [vmem:[%s8402_s19 + $0xa0] sm:$0xff]  ;;  %v5342_v48 = vld [vmem:[%s8402_s19 + $0x90] sm:$0xff] }
 0xc0e   :  { %2804 = vmatmul.mubr.f32.gmra.mxu1 %v2657_v51  ;;  %4446 = vmatmul.mubr.msk.f32.gmra.mxu0 %vm1444_vm0, %v7020_v33  ;;  %v5320_v33 = vld [vmem:[%s8402_s19 + $0x68] sm:$0xff]  ;;  %v5340_v51 = vld [vmem:[%s8402_s19 + $0x98] sm:$0xff] }
 0xc0f   :  { %4699 = vmatpush3.msra.mxu0 %v5316_v59  ;;  %3055 = vmatprep.subr.mxu1 %v7396_v63  ;;  %v5343_v59 = vld [vmem:[%s8402_s19 + $0x10] sm:$0xff] }
 0xc10   :  { %4700 = vmatprep.subr.mxu0 %v5318_v1  ;;  %3056 = vmatpush1.msra.mxu1 %v7402_v38  ;;  %v5344_v1 = vld [vmem:[%s8402_s19 + $0x88] sm:$0xff] }
 0xc11   :  { %4701 = vmatpush3.msra.mxu0 %v5320_v33  ;;  %3089 = vmatprep.mubr.f32.mxu1 %v8467_v39  ;;  %v5345_v33 = vld [vmem:[%s8402_s19 + $0x8] sm:$0xff] }
 0xc12   :  { %4702 = vmatprep.subr.mxu0 %v5321_v52  ;;  %3130 = vmatprep.subr.mxu1 %v7412_v37  ;;  %v5346_v52 = vld [vmem:[%s8402_s19 + $0x80] sm:$0xff] }
 0xc13   :  { %4703 = vmatpush3.msra.mxu0 %v5323_v56  ;;  %v5347_v56 = vld [vmem:[%s8402_s19] sm:$0xff] }
 0xc14   :  { %4704 = vmatprep.subr.mxu0 %v5324_v3  ;;  %v7493_v3 = vld [vmem:[%s8203_s12 + $0x1f8] sm:$0xff] }
 0xc15   :  { %4705 = vmatpush3.msra.mxu0 %v5325_v12 }
 0xc16   :  { %4706 = vmatprep.subr.mxu0 %v5326_v13 }
 0xc17   :  { %4707 = vmatpush3.msra.mxu0 %v5327_v14 }
 0xc18   :  { %4708 = vmatprep.subr.mxu0 %v5328_v15 }
 0xc19   :  { %4709 = vmatpush3.msra.mxu0 %v5329_v18 }
 0xc1a   :  { %4710 = vmatprep.subr.mxu0 %v5330_v10 }
 0xc1b   :  { %4711 = vmatpush3.msra.mxu0 %v5331_v21 }
 0xc1c   :  { %4712 = vmatprep.subr.mxu0 %v5332_v22  ;;  %v8539_v22 = vld [vmem:[#allocation36_spill] sm:$0xff] }
 0xc1d   :  { %4713 = vmatpush3.msra.mxu0 %v5333_v45 }
 0xc1e   :  { %4714 = vmatprep.subr.mxu0 %v5334_v6 }
 0xc1f   :  { %4715 = vmatpush3.msra.mxu0 %v5335_v11 }
 0xc20   :  { %4716 = vmatprep.subr.mxu0 %v5336_v28  ;;  %v8540_v28 = vld [vmem:[#allocation37_spill] sm:$0xff] }
 0xc21   :  { %4717 = vmatpush3.msra.mxu0 %v5337_v41 }
 0xc22   :  { %4718 = vmatprep.subr.mxu0 %v5338_v17 }
 0xc23   :  { %4719 = vmatpush3.msra.mxu0 %v5339_v57 }
 0xc24   :  { %4720 = vmatprep.subr.mxu0 %v5340_v51 }
 0xc25   :  { %4721 = vmatpush3.msra.mxu0 %v5341_v7  ;;  %v8541_v7 = vld [vmem:[#allocation38_spill] sm:$0xff] }
 0xc26   :  { %4722 = vmatprep.subr.mxu0 %v5342_v48  ;;  %v8542_v48 = vmax.f32 %v8541_v7, 0.0  ;;  %v7533_v7 = vld [vmem:[%s8203_s12 + $0x1e8] sm:$0xff] }
 0xc27   :  { %4723 = vmatpush3.msra.mxu0 %v5343_v59 }
 0xc28   :  { %4724 = vmatprep.subr.mxu0 %v5344_v1 }
 0xc29   :  { %4725 = vmatpush3.msra.mxu0 %v5345_v33  ;;  %v8543_v33 = vld [vmem:[#allocation39_spill] sm:$0xff] }
 0xc2a   :  { %4726 = vmatprep.subr.mxu0 %v5346_v52  ;;  %v8544_v52 = vmax.f32 %v8543_v33, 0.0  ;;  %v7557_v33 = vld [vmem:[%s8203_s12 + $0x1d8] sm:$0xff] }
 0xc2b   :  { %4727 = vmatpush3.msra.mxu0 %v5347_v56 }
 0xc2c   :  { %4772 = vmatprep.subr.mxu0 %v7493_v3 }
 0xcc2   :  { %v4652_v12 = vpop.f32.mrf.mxu0 }
 0xcc4   :  { %v4653_v13 = vpop.f32.mrf.mxu0 }
 0xcc5   :  { %v7496_v14 = vadd.f32 %v4653_v13, %v4652_v12 }
 0xcc6   :  { %v4655_v15 = vpop.f32.mrf.mxu0 }
 0xcc8   :  { %v4656_v18 = vpop.f32.mrf.mxu0 }
 0xcc9   :  { %v7498_v10 = vadd.f32 %v4656_v18, %v4655_v15  ;;  %v8545_v18 = vld [vmem:[#allocation40_spill] sm:$0xff] }
 0xcca   :  { %v2899_v21 = vpop.f32.mrf.mxu0 }
 0xccb   :  { %v2900_v45 = vadd.f32 %v2899_v21, %v8539_v22  ;;  %v8546_v21 = vmax.f32 %v8545_v18, 0.0  ;;  %v7593_v18 = vld [vmem:[%s8203_s12 + $0x1c0] sm:$0xff] }
 0xccc   :  { %v2901_v6 = vpop.f32.mrf.mxu0  ;;  %8553 = vst [vmem:[#allocation84_spill] sm:$0xff] %v7593_v18 }
 0xccd   :  { %v2910_v11 = vmax.f32 %v2900_v45, 0.0  ;;  %v2902_v41 = vadd.f32 %v2901_v6, %v8540_v28  ;;  %v8547_v6 = vld [vmem:[#allocation41_spill] sm:$0xff] }
 0xcce   :  { %v2905_v17 = vpop.f32.mrf.mxu0 }
 0xccf   :  { %v2911_v57 = vmax.f32 %v2902_v41, 0.0  ;;  %v2906_v51 = vadd.f32 %v2905_v17, %v8539_v22  ;;  %v2914_v59 = vadd.f32 %v2910_v11, %v8542_v48  ;;  %v8548_v41 = vmax.f32 %v8547_v6, 0.0  ;;  %v7515_v17 = vld [vmem:[%s8203_s12 + $0x178] sm:$0xff]  ;;  %v7539_v48 = vld [vmem:[%s8203_s12 + $0x168] sm:$0xff] }
 0xcd0   :  { %v2907_v1 = vpop.f32.mrf.mxu0  ;;  %v7611_v6 = vld [vmem:[%s8203_s12 + $0x138] sm:$0xff] }
 0xcd1   :  { %v2915_v56 = vadd.f32 %v2911_v57, %v8544_v52  ;;  %v2912_v12 = vmax.f32 %v2906_v51, 0.0  ;;  %v2908_v13 = vadd.f32 %v2907_v1, %v8540_v28  ;;  %v7521_v28 = vld [vmem:[%s8203_s12 + $0x1f0] sm:$0xff]  ;;  %v7551_v1 = vld [vmem:[%s8203_s12 + $0x160] sm:$0xff]  ;;  %v7563_v52 = vld [vmem:[%s8203_s12 + $0x158] sm:$0xff]  ;;  %8556 = vst [vmem:[#allocation87_spill] sm:$0xff] %v7611_v6 }
 0xcd2   :  { %v7527_v57 = vld [vmem:[%s8203_s12 + $0x170] sm:$0xff] }
 0xcd3   :  { %5234 = vtanh.f32 %v2915_v56  ;;  %v2913_v15 = vmax.f32 %v2908_v13, 0.0  ;;  %v2916_v45 = vadd.f32 %v2912_v12, %v8546_v21  ;;  %v7569_v56 = vld [vmem:[%s8203_s12 + $0x1d0] sm:$0xff]  ;;  %v7581_v13 = vld [vmem:[%s8203_s12 + $0x1c8] sm:$0xff]  ;;  %v7599_v21 = vld [vmem:[%s8203_s12 + $0x140] sm:$0xff] }
 0xcd4   :  { %5236 = vtanh.f32 %v2914_v59  ;;  %v7545_v59 = vld [vmem:[%s8203_s12 + $0x1e0] sm:$0xff]  ;;  %8549 = vst [vmem:[#allocation80_spill] sm:$0xff] %v7569_v56  ;;  %v7575_v12 = vld [vmem:[%s8203_s12 + $0x150] sm:$0xff]  ;;  %8551 = vst [vmem:[#allocation82_spill] sm:$0xff] %v7581_v13 }
 0xcd5   :  { %v2917_v40 = vadd.f32 %v2913_v15, %v8548_v41  ;;  %8550 = vst [vmem:[#allocation81_spill] sm:$0xff] %v7575_v12  ;;  %v7587_v15 = vld [vmem:[%s8203_s12 + $0x148] sm:$0xff]  ;;  %8554 = vst [vmem:[#allocation85_spill] sm:$0xff] %v7599_v21  ;;  %v7617_v41 = vld [vmem:[%s8203_s12 + $0x1b0] sm:$0xff] }
 0xcd6   :  { %8552 = vst [vmem:[#allocation83_spill] sm:$0xff] %v7587_v15  ;;  %8557 = vst [vmem:[#allocation88_spill] sm:$0xff] %v7617_v41 }
 0xcd7   :  { %5238 = vtanh.f32 %v2917_v40 }
 0xcd8   :  { %5240 = vtanh.f32 %v2916_v45  ;;  %v7605_v45 = vld [vmem:[%s8203_s12 + $0x1b8] sm:$0xff] }
 0xcd9   :  { %8555 = vst [vmem:[#allocation86_spill] sm:$0xff] %v7605_v45 }
 0xce0   :  { %v5235_v22 = vpop.eup %5234 }
 0xce1   :  { %v5237_v11 = vpop.eup %5236  ;;  %2986 = vmatprep.mubr.f32.mxu0 %v5235_v22  ;;  %v7623_v22 = vld [vmem:[%s8203_s12 + $0x130] sm:$0xff] }
 0xce2   :  { %2987 = vmatmul.mubr.f32.vlgmr.msra.gmra.mxu0 %v5237_v11  ;;  %8558 = vst [vmem:[#allocation45_spill] sm:$0xff] %v7623_v22  ;;  %v7629_v11 = vld [vmem:[%s8203_s12 + $0x1a8] sm:$0xff] }
 0xce3   :  { %4773 = vmatpush3.msra.mxu0 %v7515_v17  ;;  %8559 = vst [vmem:[#allocation46_spill] sm:$0xff] %v7629_v11 }
 0xce4   :  { %4774 = vmatprep.subr.mxu0 %v7521_v28  ;;  %v5239_v40 = vpop.eup %5238 }
 0xce5   :  { %4775 = vmatpush3.msra.mxu0 %v7527_v57  ;;  %v5241_v51 = vpop.eup %5240  ;;  %2991 = vmatprep.mubr.f32.mxu0 %v5239_v40  ;;  %v7635_v40 = vld [vmem:[%s8203_s12 + $0x128] sm:$0xff] }
 0xce6   :  { %4776 = vmatprep.subr.mxu0 %v7533_v7  ;;  %2992 = vmatmul.mubr.f32.gmra.mxu0 %v5241_v51  ;;  %8560 = vst [vmem:[#allocation47_spill] sm:$0xff] %v7635_v40  ;;  %v7641_v51 = vld [vmem:[%s8203_s12 + $0x1a0] sm:$0xff] }
 0xce7   :  { %4777 = vmatpush3.msra.mxu0 %v7539_v48  ;;  %8561 = vst [vmem:[#allocation48_spill] sm:$0xff] %v7641_v51 }
 0xce8   :  { %4778 = vmatprep.subr.mxu0 %v7545_v59 }
 0xce9   :  { %4779 = vmatpush3.msra.mxu0 %v7551_v1 }
 0xcea   :  { %4780 = vmatprep.subr.mxu0 %v7557_v33 }
 0xceb   :  { %4781 = vmatpush3.msra.mxu0 %v7563_v52 }
 0xcec   :  { %4782 = vmatprep.subr.mxu0 %v7569_v56 }
 0xced   :  { %4783 = vmatpush3.msra.mxu0 %v7575_v12 }
 0xcee   :  { %4784 = vmatprep.subr.mxu0 %v7581_v13 }
 0xcef   :  { %4785 = vmatpush3.msra.mxu0 %v7587_v15 }
 0xcf0   :  { %4786 = vmatprep.subr.mxu0 %v7593_v18 }
 0xcf1   :  { %4787 = vmatpush3.msra.mxu0 %v7599_v21 }
 0xcf2   :  { %4788 = vmatprep.subr.mxu0 %v7605_v45 }
 0xcf3   :  { %4789 = vmatpush3.msra.mxu0 %v7611_v6 }
 0xcf4   :  { %4790 = vmatprep.subr.mxu0 %v7617_v41 }
 0xcf5   :  { %4791 = vmatpush3.msra.mxu0 %v7623_v22 }
 0xcf6   :  { %4792 = vmatprep.subr.mxu0 %v7629_v11 }
 0xcf7   :  { %4793 = vmatpush3.msra.mxu0 %v7635_v40 }
 0xcf8   :  { %4794 = vmatprep.subr.mxu0 %v7641_v51  ;;  %v7665_v51 = vld [vmem:[%s8203_s12 + $0x190] sm:$0xff] }
 0xcf9   :  { %4795 = vmatpush3.msra.mxu0 %v7647_v36  ;;  %8565 = vst [vmem:[#allocation52_spill] sm:$0xff] %v7665_v51  ;;  %v7671_v36 = vld [vmem:[%s8203_s12 + $0x110] sm:$0xff] }
 0xcfa   :  { %4796 = vmatprep.subr.mxu0 %v7653_v32  ;;  %8566 = vst [vmem:[#allocation53_spill] sm:$0xff] %v7671_v36  ;;  %v7677_v32 = vld [vmem:[%s8203_s12 + $0x188] sm:$0xff] }
 0xcfb   :  { %4797 = vmatpush3.msra.mxu0 %v7659_v16  ;;  %8567 = vst [vmem:[#allocation54_spill] sm:$0xff] %v7677_v32  ;;  %v7683_v16 = vld [vmem:[%s8203_s12 + $0x108] sm:$0xff] }
 0xcfc   :  { %4798 = vmatprep.subr.mxu0 %v7665_v51  ;;  %8568 = vst [vmem:[#allocation55_spill] sm:$0xff] %v7683_v16  ;;  %v7689_v51 = vld [vmem:[%s8203_s12 + $0x180] sm:$0xff] }
 0xcfd   :  { %4799 = vmatpush3.msra.mxu0 %v7671_v36  ;;  %8569 = vst [vmem:[#allocation56_spill] sm:$0xff] %v7689_v51  ;;  %v7695_v36 = vld [vmem:[%s8203_s12 + $0x100] sm:$0xff] }
 0xcfe   :  { %4800 = vmatprep.subr.mxu0 %v7677_v32  ;;  %8570 = vst [vmem:[#allocation57_spill] sm:$0xff] %v7695_v36  ;;  %v5380_v32 = vld [vmem:[#allocation16 + $0x14] ss:$8 sps:$4 sm:$0xff]  }
 0xcff   :  { %4801 = vmatpush3.msra.mxu0 %v7683_v16 }
 0xd00   :  { %4802 = vmatprep.subr.mxu0 %v7689_v51 }
 0xd01   :  { %4803 = vmatpush3.msra.mxu0 %v7695_v36 }
 0xd02   :  { %3462 = vmatprep.subr.bf16.mxu0 %v5380_v32 }
 0xda2   :  { %v4728_v40 = vpop.f32.mrf.mxu0 }
 0xda4   :  { %v4729_v11 = vpop.f32.mrf.mxu0 }
 0xda5   :  { %v4730_v22 = vadd.f32 %v4729_v11, %v4728_v40 }
 0xda6   :  { %v4731_v16 = vpop.f32.mrf.mxu0 }
 0xda7   :  { %v2997_v41 = vsel %vm1676_vm1, %v4730_v22, -inf }
 0xda8   :  { %2998 = vmax.xlane.f32.xlu0 %v2997_v41  ;;  %v4732_v6 = vpop.f32.mrf.mxu0 }
 0xda9   :  { %v4733_v45 = vadd.f32 %v4732_v6, %v4731_v16  ;;  %v8571_v16 = vld [vmem:[#allocation44_spill] sm:$0xff]  ;;  %v5381_v6 = vld [vmem:[#allocation7] sm:$0xff] }
 0xdab   :  { %v3000_v51 = vsel %vm1676_vm1, %v4733_v45, -inf }
 0xdac   :  { %3001 = vmax.xlane.f32.xlu1 %v3000_v51 }
 0xe31   :  { %v2999_v21 = vpop.xlane.xlu0 %2998 }
 0xe32   :  { %v3003_v18 = vsub.f32 %v4730_v22, %v2999_v21  ;;  %v8572_v21 = vld [vmem:[#allocation34_spill] sm:$0xff] }
 0xe34   :  { %v3005_v15 = vmul.f32 1.442695, %v3003_v18  ;;  %v5382_v18 = vld [vmem:[#allocation7 + $0x8] sm:$0xff] }
 0xe35   :  { %v3002_v13 = vpop.xlane.xlu1 %3001 }
 0xe36   :  { %5242 = vpow2.f32 %v3005_v15  ;;  %v3004_v36 = vsub.f32 %v4733_v45, %v3002_v13 }
 0xe38   :  { %v3007_v12 = vmul.f32 1.442695, %v3004_v36 }
 0xe3a   :  { %5244 = vpow2.f32 %v3007_v12 }
 0xe43   :  { %v5243_v32 = vpop.eup %5242 }
 0xe44   :  { %v3009_v11 = vsel %vm1676_vm1, %v5243_v32, 0.0 }
 0xe45   :  { %3010 = vadd.xlane.f32.xlu0 %v3009_v11  ;;  %v8573_v11 = vld [vmem:[#allocation35_spill] sm:$0xff] }
 0xe47   :  { %v5245_v40 = vpop.eup %5244 }
 0xe48   :  { %v3012_v41 = vsel %vm1676_vm1, %v5245_v40, 0.0 }
 0xe49   :  { %3013 = vadd.xlane.f32.xlu1 %v3012_v41 }
 0xe5a   :  { %3523 = vrot.lane.b32.xlu1 %v5381_v6, %s5750_s29  ;;  %v7715_v6 = vld [vmem:[#allocation10 + $0x30] sm:$0xff] }
 0xe5b   :  { %3343 = vrot.lane.b32.xlu0 %v8571_v16, %s5755_s2  ;;  %8574 = vst [vmem:[#allocation58_spill] sm:$0xff] %v7715_v6 }
 0xe5f   :  { %3525 = vrot.lane.b32.xlu0 %v5382_v18, %s5750_s29 }
 0xece   :  { %v3011_v13 = vpop.xlane.xlu0 %3010 }
 0xecf   :  { %5246 = vrcp.f32 %v3011_v13  ;;  %v7719_v13 = vld [vmem:[#allocation10 + $0x18] sm:$0xff] }
 0xed0   :  { %8575 = vst [vmem:[#allocation59_spill] sm:$0xff] %v7719_v13 }
 0xed2   :  { %v3014_v36 = vpop.xlane.xlu1 %3013  ;;  %v7706_v12 = vpop.permute.xlu0 %3343 }
 0xed3   :  { %5248 = vrcp.f32 %v3014_v36 }
 0xed6   :  { %v3524_v15 = vpop.permute.xlu1 %3523  ;;  %v3526_v22 = vpop.permute.xlu0 %3525 }
 0xed7   :  { %v3531_v45 = vsel %vm1444_vm0, %v3524_v15, %v8572_v21  ;;  %v3532_v41 = vsel %vm1444_vm0, %v3526_v22, %v8573_v11  ;;  %v7722_v15 = vld [vmem:[#allocation10 + $0x10] sm:$0xff]  ;;  %v7744_v21 = vld [vmem:[%s8203_s12 + $0xf0] sm:$0xff]  ;;  %v7769_v11 = vld [vmem:[%s8203_s12 + $0xe0] sm:$0xff] }
 0xed8   :  { %3535 = vrot.lane.b32.xlu0 %v3531_v45, %s5750_s29  ;;  %8576 = vst [vmem:[#allocation60_spill] sm:$0xff] %v7722_v15  ;;  %8579 = vst [vmem:[#allocation63_spill] sm:$0xff] %v7744_v21  ;;  %v7750_v45 = vld [vmem:[%s8203_s12 + $0x70] sm:$0xff]  ;;  %v7757_v22 = vld [vmem:[%s8203_s12 + $0xe8] sm:$0xff] }
 0xed9   :  { %8580 = vst [vmem:[#allocation64_spill] sm:$0xff] %v7750_v45  ;;  %8581 = vst [vmem:[#allocation65_spill] sm:$0xff] %v7757_v22 }
 0xeda   :  { %8583 = vst [vmem:[#allocation67_spill] sm:$0xff] %v7769_v11 }
 0xedc   :  { %v5247_v51 = vpop.eup %5246  ;;  %3537 = vrot.lane.b32.xlu0 %v3532_v41, %s5750_s29  ;;  %v7775_v41 = vld [vmem:[%s8203_s12 + $0x60] sm:$0xff] }
 0xedd   :  { %v3017_v16 = vmul.f32 %v5247_v51, %v5243_v32  ;;  %v7728_v32 = vld [vmem:[%s8203_s12 + $0xf8] sm:$0xff]  ;;  %v7763_v51 = vld [vmem:[%s8203_s12 + $0x68] sm:$0xff]  ;;  %8584 = vst [vmem:[#allocation68_spill] sm:$0xff] %v7775_v41 }
 0xede   :  { %8577 = vst [vmem:[#allocation61_spill] sm:$0xff] %v7728_v32  ;;  %8582 = vst [vmem:[#allocation66_spill] sm:$0xff] %v7763_v51 }
 0xedf   :  { %4447 = vmatmul.mubr.msk.f32.vlgmr.msra.gmra.mxu1 %vm1676_vm1, %v3017_v16 }
 0xee0   :  { %3131 = vmatpush1.msra.mxu1 %v7715_v6  ;;  %3095 = vmatprep.mubr.f32.mxu1 %v8467_v39  ;;  %v5249_v18 = vpop.eup %5248  ;;  %v7925_v6 = vld [vmem:[#allocation13] ss:$0 sm:$0xff] }
 0xee1   :  { %3132 = vmatprep.subr.mxu1 %v7719_v13  ;;  %v3018_v36 = vmul.f32 %v5249_v18, %v5245_v40  ;;  %v7738_v40 = vld [vmem:[%s8203_s12 + $0x78] sm:$0xff]  ;;  %8609 = vst [vmem:[#allocation41_spill] sm:$0xff] %v7925_v6 }
 0xee2   :  { %3133 = vmatpush1.msra.mxu1 %v7722_v15  ;;  %8578 = vst [vmem:[#allocation62_spill] sm:$0xff] %v7738_v40  ;;  %v7787_v18 = vld [vmem:[%s8203_s12 + $0x58] sm:$0xff] }
 0xee3   :  { %4734 = vmatprep.subr.mxu1 %v7728_v32  ;;  %4448 = vmatmul.mubr.msk.f32.gmra.mxu1 %vm1676_vm1, %v3018_v36  ;;  %8586 = vst [vmem:[#allocation70_spill] sm:$0xff] %v7787_v18 }
 0xee4   :  { %3166 = vmatprep.mubr.f32.mxu1 %v8467_v39 }
 0xee7   :  { %4449 = vmatmul.mubr.msk.f32.vlgmr.msra.gmra.mxu1 %vm1676_vm1, %v3017_v16  ;;  %v7781_v16 = vld [vmem:[%s8203_s12 + $0xd8] sm:$0xff] }
 0xee8   :  { %3172 = vmatprep.mubr.f32.mxu1 %v8467_v39  ;;  %4735 = vmatpush3.msra.mxu1 %v7738_v40  ;;  %8585 = vst [vmem:[#allocation69_spill] sm:$0xff] %v7781_v16 }
 0xee9   :  { %4736 = vmatprep.subr.mxu1 %v7744_v21 }
 0xeea   :  { %4737 = vmatpush3.msra.mxu1 %v7750_v45 }
 0xeeb   :  { %4450 = vmatmul.mubr.msk.f32.gmra.mxu1 %vm1676_vm1, %v3018_v36  ;;  %4738 = vmatprep.subr.mxu1 %v7757_v22  ;;  %v7793_v36 = vld [vmem:[%s8203_s12 + $0xd0] sm:$0xff] }
 0xeec   :  { %4739 = vmatpush3.msra.mxu1 %v7763_v51  ;;  %8587 = vst [vmem:[#allocation71_spill] sm:$0xff] %v7793_v36 }
 0xeed   :  { %4740 = vmatprep.subr.mxu1 %v7769_v11  ;;  %v4690_v11 = vpop.f32.mrf.mxu1 }
 0xeee   :  { %4741 = vmatpush3.msra.mxu1 %v7775_v41  ;;  %v7799_v41 = vld [vmem:[%s8203_s12 + $0x50] sm:$0xff] }
 0xeef   :  { %4742 = vmatprep.subr.mxu1 %v7781_v16  ;;  %8588 = vst [vmem:[#allocation72_spill] sm:$0xff] %v7799_v41  ;;  %v7805_v16 = vld [vmem:[%s8203_s12 + $0xc8] sm:$0xff]  ;;  %v4691_v51 = vpop.f32.mrf.mxu1 }
 0xef0   :  { %4743 = vmatpush3.msra.mxu1 %v7787_v18  ;;  %8589 = vst [vmem:[#allocation73_spill] sm:$0xff] %v7805_v16  ;;  %v7811_v18 = vld [vmem:[%s8203_s12 + $0x48] sm:$0xff]  ;;  %v4692_v21 = vadd.f32 %v4691_v51, %v4690_v11 }
 0xef1   :  { %4744 = vmatprep.subr.mxu1 %v7793_v36  ;;  %8590 = vst [vmem:[#allocation74_spill] sm:$0xff] %v7811_v18  ;;  %v7817_v36 = vld [vmem:[%s8203_s12 + $0xc0] sm:$0xff]  ;;  %v4693_v22 = vpop.f32.mrf.mxu1  ;;  %v5419_v11 = vld [vmem:[#allocation17 + $0x10] ss:$8 sps:$4 sm:$0xff]  }
 0xef2   :  { %4745 = vmatpush3.msra.mxu1 %v7799_v41  ;;  %8591 = vst [vmem:[#allocation75_spill] sm:$0xff] %v7817_v36  ;;  %v7823_v41 = vld [vmem:[%s8203_s12 + $0x40] sm:$0xff] }
 0xef3   :  { %4746 = vmatprep.subr.mxu1 %v7805_v16  ;;  %8592 = vst [vmem:[#allocation76_spill] sm:$0xff] %v7823_v41  ;;  %v7829_v16 = vld [vmem:[%s8203_s12 + $0xb8] sm:$0xff] }
 0xef4   :  { %4747 = vmatpush3.msra.mxu1 %v7811_v18  ;;  %8593 = vst [vmem:[#allocation77_spill] sm:$0xff] %v7829_v16  ;;  %v7835_v18 = vld [vmem:[%s8203_s12 + $0x38] sm:$0xff] }
 0xef5   :  { %4748 = vmatprep.subr.mxu1 %v7817_v36  ;;  %8594 = vst [vmem:[#allocation78_spill] sm:$0xff] %v7835_v18  ;;  %v7841_v36 = vld [vmem:[%s8203_s12 + $0xb0] sm:$0xff] }
 0xef6   :  { %4749 = vmatpush3.msra.mxu1 %v7823_v41  ;;  %8595 = vst [vmem:[#allocation79_spill] sm:$0xff] %v7841_v36  ;;  %v7847_v41 = vld [vmem:[%s8203_s12 + $0x30] sm:$0xff] }
 0xef7   :  { %4750 = vmatprep.subr.mxu1 %v7829_v16  ;;  %8596 = vst [vmem:[#allocation89_spill] sm:$0xff] %v7847_v41  ;;  %v7853_v16 = vld [vmem:[%s8203_s12 + $0xa8] sm:$0xff] }
 0xef8   :  { %4751 = vmatpush3.msra.mxu1 %v7835_v18  ;;  %8597 = vst [vmem:[#allocation90_spill] sm:$0xff] %v7853_v16  ;;  %v7859_v18 = vld [vmem:[%s8203_s12 + $0x28] sm:$0xff] }
 0xef9   :  { %4752 = vmatprep.subr.mxu1 %v7841_v36  ;;  %8598 = vst [vmem:[#allocation91_spill] sm:$0xff] %v7859_v18  ;;  %v7865_v36 = vld [vmem:[%s8203_s12 + $0xa0] sm:$0xff] }
 0xefa   :  { %4753 = vmatpush3.msra.mxu1 %v7847_v41  ;;  %8599 = vst [vmem:[#allocation92_spill] sm:$0xff] %v7865_v36  ;;  %v7871_v41 = vld [vmem:[%s8203_s12 + $0x20] sm:$0xff] }
 0xefb   :  { %4754 = vmatprep.subr.mxu1 %v7853_v16  ;;  %8600 = vst [vmem:[#allocation93_spill] sm:$0xff] %v7871_v41  ;;  %v7877_v16 = vld [vmem:[%s8203_s12 + $0x98] sm:$0xff] }
 0xefc   :  { %4755 = vmatpush3.msra.mxu1 %v7859_v18  ;;  %8601 = vst [vmem:[#allocation94_spill] sm:$0xff] %v7877_v16  ;;  %v7883_v18 = vld [vmem:[%s8203_s12 + $0x18] sm:$0xff] }
 0xefd   :  { %4756 = vmatprep.subr.mxu1 %v7865_v36  ;;  %8602 = vst [vmem:[#allocation95_spill] sm:$0xff] %v7883_v18  ;;  %v7889_v36 = vld [vmem:[%s8203_s12 + $0x90] sm:$0xff] }
 0xefe   :  { %4757 = vmatpush3.msra.mxu1 %v7871_v41  ;;  %8603 = vst [vmem:[#allocation96_spill] sm:$0xff] %v7889_v36  ;;  %v7895_v41 = vld [vmem:[%s8203_s12 + $0x10] sm:$0xff] }
 0xeff   :  { %4758 = vmatprep.subr.mxu1 %v7877_v16  ;;  %8604 = vst [vmem:[#allocation36_spill] sm:$0xff] %v7895_v41  ;;  %v7901_v16 = vld [vmem:[%s8203_s12 + $0x88] sm:$0xff] }
 0xf00   :  { %4759 = vmatpush3.msra.mxu1 %v7883_v18  ;;  %8605 = vst [vmem:[#allocation37_spill] sm:$0xff] %v7901_v16  ;;  %v7907_v18 = vld [vmem:[%s8203_s12 + $0x8] sm:$0xff] }
 0xf01   :  { %4760 = vmatprep.subr.mxu1 %v7889_v36  ;;  %8606 = vst [vmem:[#allocation38_spill] sm:$0xff] %v7907_v18  ;;  %v7913_v36 = vld [vmem:[%s8203_s12 + $0x80] sm:$0xff] }
 0xf02   :  { %4761 = vmatpush3.msra.mxu1 %v7895_v41  ;;  %8607 = vst [vmem:[#allocation39_spill] sm:$0xff] %v7913_v36  ;;  %v7919_v41 = vld [vmem:[%s8203_s12] sm:$0xff] }
 0xf03   :  { %4762 = vmatprep.subr.mxu1 %v7901_v16  ;;  %8608 = vst [vmem:[#allocation40_spill] sm:$0xff] %v7919_v41  ;;  %v5418_v16 = vld [vmem:[#allocation17 + $0x14] ss:$8 sps:$4 sm:$0xff]  }
 0xf04   :  { %4763 = vmatpush3.msra.mxu1 %v7907_v18  ;;  %v4694_v18 = vpop.f32.mrf.mxu1 }
 0xf05   :  { %4764 = vmatprep.subr.mxu1 %v7913_v36  ;;  %v4695_v45 = vadd.f32 %v4694_v18, %v4693_v22  ;;  %v2801_v36 = vadd.f32 %v4692_v21, %v7496_v14  ;;  %v5420_v21 = vld [vmem:[#allocation17 + $0x4] ss:$8 sps:$4 sm:$0xff]   ;;  %v5421_v18 = vld [vmem:[#allocation17] ss:$8 sps:$4 sm:$0xff]  }
 0xf06   :  { %4765 = vmatpush3.msra.mxu1 %v7919_v41 }
 0xf07   :  { %3360 = vmatprep.subr.bf16.mxu1 %v5418_v16  ;;  %v2806_v32 = vadd.f32 %v4695_v45, %v7498_v10  ;;  %v2815_v22 = vmul.f32 %v7925_v6, %v2801_v36  ;;  %v7930_v10 = vld [vmem:[#allocation14] ss:$0 sm:$0xff]  ;;  %v8610_v36 = vmov 0  }
 0xf09   :  { %v2816_v16 = vmul.f32 %v7925_v6, %v2806_v32  ;;  %v5422_v6 = vld [vmem:[#allocation19 + $0x14] ss:$8 sps:$4 sm:$0xff]  }
 0xf9f   :  { %v3091_v40 = vpop.f32.mrf.mxu1 }
 0xfa0   :  { %v3179_v41 = vmul.f32 %v3091_v40, %v8532_v2 }
 0xfa1   :  { %v3093_v15 = vpop.f32.mrf.mxu1 }
 0xfa2   :  { %v3180_v13 = vmul.f32 %v3093_v15, %v8531_v0  ;;  %v2824_v15 = vadd.f32 %v7930_v10, %v2816_v16 }
 0xfa3   :  { %v3097_v56 = vpop.f32.mrf.mxu1 }
 0xfa4   :  { %3251 = vmatprep.mubr.f32.mxu1 %v3180_v13  ;;  %v3183_v40 = vmul.f32 %v3097_v56, %v8534_v8  ;;  %v2823_v13 = vadd.f32 %v7930_v10, %v2815_v22 }
 0xfa5   :  { %3252 = vmatmul.mubr.f32.vlgmr.msra.gmra.mxu1 %v3179_v41  ;;  %v3099_v51 = vpop.f32.mrf.mxu1 }
 0xfa6   :  { %3361 = vmatpush1.bf16.msra.mxu1 %v5419_v11  ;;  %v3184_v14 = vmul.f32 %v3099_v51, %v8533_v49  ;;  %v2826_v11 = vmax.f32 %v2824_v15, 0.0  ;;  %v2825_v56 = vmax.f32 %v2823_v13, 0.0  ;;  %v5427_v13 = vld [vmem:[#allocation16] ss:$8 sps:$4 sm:$0xff]  }
 0xfa7   :  { %3362 = vmatprep.subr.bf16.mxu1 %v5420_v21  ;;  %v3168_v45 = vpop.f32.mrf.mxu1 }
 0xfa8   :  { %3256 = vmatprep.mubr.f32.mxu1 %v3184_v14  ;;  %v3181_v51 = vmul.f32 %v3168_v45, %v8536_v34  ;;  %v5423_v14 = vld [vmem:[#allocation16 + $0x10] ss:$8 sps:$4 sm:$0xff]   ;;  %v7943_v15 = vadd.f32 %v2826_v11, %v7087_v60 }
 0xfa9   :  { %v3170_v32 = vpop.f32.mrf.mxu1  ;;  %3257 = vmatmul.mubr.f32.gmra.mxu1 %v3183_v40  ;;  %v5424_v40 = vld [vmem:[#allocation19 + $0x10] ss:$8 sps:$4 sm:$0xff]  }
 0xfaa   :  { %v3182_v41 = vmul.f32 %v3170_v32, %v8535_v19  ;;  %3363 = vmatpush1.bf16.msra.mxu1 %v5421_v18  ;;  %3380 = vmatprep.mubr.bf16.mxu1 %v8610_v36  ;;  %v5425_v32 = vld [vmem:[#allocation16 + $0x4] ss:$8 sps:$4 sm:$0xff]   ;;  %v5429_v18 = vld [vmem:[#allocation8 + $0x38] sm:$0xff] }
 0xfab   :  { %v3174_v21 = vpop.f32.mrf.mxu1  ;;  %3411 = vmatprep.subr.bf16.mxu1 %v5422_v6  ;;  %v5426_v6 = vld [vmem:[#allocation19 + $0x4] ss:$8 sps:$4 sm:$0xff]  }
 0xfac   :  { %3326 = vmatprep.mubr.f32.mxu0 %v3182_v41  ;;  %v3185_v45 = vmul.f32 %v3174_v21, %v8538_v54  ;;  %v5428_v41 = vld [vmem:[#allocation19] ss:$8 sps:$4 sm:$0xff]  }
 0xfad   :  { %v3176_v16 = vpop.f32.mrf.mxu1  ;;  %3327 = vmatmul.mubr.f32.vlgmr.msra.gmra.mxu0 %v3181_v51  ;;  %4451 = vmatmul.mubr.msk.bf16.vlgmr.msra.gmra.mxu1 %vm1444_vm0, %v7706_v12  ;;  %v7948_v12 = vadd.f32 %v2825_v56, %v7081_v24  ;;  %v5430_v24 = vld [vmem:[%s8201_s10 + $0x78] sm:$0xff] }
 0xfae   :  { %v3186_v22 = vmul.f32 %v3176_v16, %v8537_v4  ;;  %3463 = vmatpush1.bf16.msra.mxu0 %v5423_v14  ;;  %3412 = vmatpush1.bf16.msra.mxu1 %v5424_v40 }
 0xfaf   :  { %3464 = vmatprep.subr.bf16.mxu0 %v5425_v32  ;;  %3413 = vmatprep.subr.bf16.mxu1 %v5426_v6  ;;  %v3446_v60 = vpack.c.bf16 %v7943_v15, %v7948_v12 }
 0xfb0   :  { %3331 = vmatprep.mubr.f32.mxu0 %v3186_v22  ;;  %3431 = vmatprep.mubr.bf16.mxu1 %v8610_v36 }
 0xfb1   :  { %3332 = vmatmul.mubr.f32.gmra.mxu0 %v3185_v45 }
 0xfb2   :  { %3465 = vmatpush1.bf16.msra.mxu0 %v5427_v13  ;;  %3482 = vmatprep.mubr.bf16.mxu0 %v8610_v36  ;;  %v5431_v36 = vld [vmem:[%s8201_s10 + $0xf0] sm:$0xff] }
 0xfb3   :  { %3414 = vmatpush1.bf16.msra.mxu1 %v5428_v41  ;;  %4810 = vmatprep.subr.mxu0 %v7040_v44  ;;  %v8611_v44 = vld [vmem:[#allocation101_spill] sm:$0xff] }
 0xfb4   :  { %3629 = vmatprep.subr.mxu1 %v5429_v18 }
 0xfb5   :  { %4453 = vmatmul.mubr.msk.bf16.vlgmr.msra.gmra.mxu0 %vm1444_vm0, %v3446_v60  ;;  %v5432_v60 = vld [vmem:[%s8204_s13] ss:$0 sm:$0xff] }
 0xfb6   :  { %4811 = vmatpush3.msra.mxu0 %v5430_v24 }
 0xfb7   :  { %4812 = vmatprep.subr.mxu0 %v5431_v36 }
 0xfb8   :  { %4813 = vmatpush3.msra.mxu0 %v7052_v25  ;;  %v8612_v25 = vld [vmem:[#allocation102_spill] sm:$0xff] }
 0xfb9   :  { %4814 = vmatprep.subr.mxu0 %v7057_v42  ;;  %v8613_v42 = vld [vmem:[#allocation103_spill] sm:$0xff] }
 0xfba   :  { %4815 = vmatpush3.msra.mxu0 %v7062_v29  ;;  %v8614_v29 = vld [vmem:[#allocation104_spill] sm:$0xff] }
 0xfbb   :  { %4816 = vmatprep.subr.mxu0 %v7068_v62  ;;  %v8615_v62 = vld [vmem:[#allocation105_spill] sm:$0xff] }
 0xfbc   :  { %4817 = vmatpush3.msra.mxu0 %v7075_v20  ;;  %v8616_v20 = vld [vmem:[#allocation106_spill] sm:$0xff] }
 0xfbd   :  { %4818 = vmatprep.subr.mxu0 %v7098_v61  ;;  %v8617_v61 = vld [vmem:[#allocation107_spill] sm:$0xff] }
 0xfbe   :  { %4819 = vmatpush3.msra.mxu0 %v7104_v46  ;;  %v8618_v46 = vld [vmem:[#allocation108_spill] sm:$0xff] }
 0xfbf   :  { %4820 = vmatprep.subr.mxu0 %v7110_v47  ;;  %v8619_v47 = vld [vmem:[#allocation109_spill] sm:$0xff] }
 0xfc0   :  { %4821 = vmatpush3.msra.mxu0 %v7116_v50  ;;  %v8620_v50 = vld [vmem:[#allocation110_spill] sm:$0xff] }
 0xfc1   :  { %4822 = vmatprep.subr.mxu0 %v7122_v53  ;;  %v8621_v53 = vld [vmem:[#allocation111_spill] sm:$0xff] }
 0xfc2   :  { %4823 = vmatpush3.msra.mxu0 %v7128_v31  ;;  %v8622_v31 = vld [vmem:[#allocation112_spill] sm:$0xff] }
 0xfc3   :  { %4824 = vmatprep.subr.mxu0 %v7134_v5  ;;  %v8623_v5 = vld [vmem:[#allocation113_spill] sm:$0xff] }
 0xfc4   :  { %4825 = vmatpush3.msra.mxu0 %v7140_v55  ;;  %v8624_v55 = vld [vmem:[#allocation114_spill] sm:$0xff] }
 0xfc5   :  { %4826 = vmatprep.subr.mxu0 %v7146_v26  ;;  %v8625_v26 = vld [vmem:[#allocation115_spill] sm:$0xff] }
 0xfc6   :  { %4827 = vmatpush3.msra.mxu0 %v8611_v44 }
 0xfc7   :  { %4828 = vmatprep.subr.mxu0 %v8612_v25 }
 0xfc8   :  { %4829 = vmatpush3.msra.mxu0 %v8613_v42 }
 0xfc9   :  { %4830 = vmatprep.subr.mxu0 %v8614_v29 }
 0xfca   :  { %4831 = vmatpush3.msra.mxu0 %v8615_v62 }
 0xfcb   :  { %4832 = vmatprep.subr.mxu0 %v8616_v20  ;;  %v5434_v20 = vld [vmem:[#allocation8 + $0x30] sm:$0xff] }
 0xfcc   :  { %4833 = vmatpush3.msra.mxu0 %v8617_v61  ;;  %v5435_v61 = vld [vmem:[#allocation8 + $0x28] sm:$0xff] }
 0xfcd   :  { %4834 = vmatprep.subr.mxu0 %v8618_v46  ;;  %v5436_v46 = vld [vmem:[#allocation8 + $0x20] sm:$0xff] }
 0xfce   :  { %4835 = vmatpush3.msra.mxu0 %v8619_v47  ;;  %v5437_v47 = vld [vmem:[#allocation8 + $0x18] sm:$0xff] }
 0xfcf   :  { %4836 = vmatprep.subr.mxu0 %v8620_v50  ;;  %v5438_v50 = vld [vmem:[#allocation8 + $0x10] sm:$0xff] }
 0xfd0   :  { %4837 = vmatpush3.msra.mxu0 %v8621_v53  ;;  %v5439_v53 = vld [vmem:[#allocation8 + $0x8] sm:$0xff] }
 0xfd1   :  { %4838 = vmatprep.subr.mxu0 %v8622_v31  ;;  %v5440_v31 = vld [vmem:[#allocation8] sm:$0xff] }
 0xfd2   :  { %4839 = vmatpush3.msra.mxu0 %v8623_v5  ;;  %v5441_v5 = vld [vmem:[#allocation10 + $0x28] sm:$0xff] }
 0xfd3   :  { %4840 = vmatprep.subr.mxu0 %v8624_v55 }
 0xfd4   :  { %4841 = vmatpush3.msra.mxu0 %v8625_v26 }
 0xfd5   :  { %4886 = vmatprep.subr.mxu0 %v7493_v3  ;;  %v5433_v3 = vld [vmem:[#allocation11] ss:$0 sm:$0xff] }
0x1065   :  { %v4766_v11 = vpop.f32.mrf.mxu1 }
0x1067   :  { %v4767_v51 = vpop.f32.mrf.mxu1 }
0x1068   :  { %v4768_v22 = vadd.f32 %v4767_v51, %v4766_v11 }
0x1069   :  { %v4769_v21 = vpop.f32.mrf.mxu1 }
0x106b   :  { %v4770_v40 = vpop.f32.mrf.mxu1 }
0x106c   :  { %v4771_v13 = vadd.f32 %v4770_v40, %v4769_v21  ;;  %v8627_v40 = vld [vmem:[#allocation97_spill] sm:$0xff] }
0x106d   :  { %v4804_v56 = vpop.f32.mrf.mxu0  ;;  %v3382_v55 = vpop.f32.mrf.mxu1 }
0x106f   :  { %v4805_v16 = vpop.f32.mrf.mxu0  ;;  %v3384_v26 = vpop.f32.mrf.mxu1 }
0x1070   :  { %v4806_v14 = vadd.f32 %v4805_v16, %v4804_v56  ;;  %v8626_v56 = vld [vmem:[#allocation42_spill] sm:$0xff] }
0x1071   :  { %v4807_v45 = vpop.f32.mrf.mxu0  ;;  %v3386_v11 = vpop.f32.mrf.mxu1  ;;  %v3391_v16 = vadd.f32 %v3382_v55, %v8626_v56 }
0x1072   :  { %v3329_v32 = vadd.f32 %v4806_v14, %v4768_v22 }
0x1073   :  { %v4808_v6 = vpop.f32.mrf.mxu0  ;;  %v3388_v21 = vpop.f32.mrf.mxu1 }
0x1074   :  { %v3337_v41 = vmul.f32 %v5432_v60, %v3329_v32  ;;  %v4809_v18 = vadd.f32 %v4808_v6, %v4807_v45  ;;  %v3392_v45 = vadd.f32 %v3384_v26, %v8627_v40 }
0x1075   :  { %v3484_v51 = vpop.f32.mrf.mxu0 }
0x1076   :  { %v3334_v24 = vadd.f32 %v4809_v18, %v4771_v13  ;;  %v3339_v36 = vadd.f32 %v5433_v3, %v3337_v41  ;;  %v8628_v13 = vld [vmem:[#allocation43_spill] sm:$0xff] }
0x1077   :  { %v3486_v22 = vpop.f32.mrf.mxu0 }
0x1078   :  { %v3338_v44 = vmul.f32 %v5432_v60, %v3334_v24  ;;  %v3341_v42 = vmax.f32 %v3339_v36, 0.0  ;;  %v3393_v60 = vadd.f32 %v3386_v11, %v8628_v13 }
0x1079   :  { %v3488_v18 = vpop.f32.mrf.mxu0 }
0x107a   :  { %v3340_v25 = vadd.f32 %v5433_v3, %v3338_v44  ;;  %v8629_v3 = vld [vmem:[#allocation98_spill] sm:$0xff] }
0x107b   :  { %v3394_v36 = vadd.f32 %v3388_v21, %v8629_v3 }
0x107c   :  { %v3342_v29 = vmax.f32 %v3340_v25, 0.0 }
0x107e   :  { %v3395_v62 = vpack.c.bf16 %v3342_v29, %v3341_v42 }
0x1080   :  { %4452 = vmatmul.mubr.msk.bf16.vlgmr.msra.gmra.mxu1 %vm1444_vm0, %v3395_v62  ;;  %v3490_v62 = vpop.f32.mrf.mxu0 }
0x1081   :  { %3630 = vmatpush1.msra.mxu1 %v5434_v20  ;;  %3669 = vmatprep.mubr.f32.mxu1 %v8467_v39 }
0x1082   :  { %3631 = vmatprep.subr.mxu1 %v5435_v61 }
0x1083   :  { %3632 = vmatpush1.msra.mxu1 %v5436_v46 }
0x1084   :  { %3633 = vmatprep.subr.mxu1 %v5437_v47 }
0x1085   :  { %3634 = vmatpush1.msra.mxu1 %v5438_v50 }
0x1086   :  { %3635 = vmatprep.subr.mxu1 %v5439_v53 }
0x1087   :  { %3636 = vmatpush1.msra.mxu1 %v5440_v31 }
0x1088   :  { %3825 = vmatprep.subr.mxu1 %v5441_v5 }
0x1140   :  { %v3433_v14 = vpop.f32.mrf.mxu1 }
0x1141   :  { %v3442_v32 = vadd.f32 %v3433_v14, %v3391_v16 }
0x1142   :  { %v3435_v6 = vpop.f32.mrf.mxu1 }
0x1143   :  { %v3443_v41 = vadd.f32 %v3435_v6, %v3392_v45  ;;  %v3493_v47 = vadd.f32 %v3484_v51, %v3442_v32  ;;  %v3536_v51 = vpop.permute.xlu0 %3535 }
0x1144   :  { %v3437_v24 = vpop.f32.mrf.mxu1 }
0x1145   :  { %v3494_v44 = vadd.f32 %v3486_v22, %v3443_v41  ;;  %v3444_v25 = vadd.f32 %v3437_v24, %v3393_v60  ;;  %v4454_v50 = vmul.f32 -1.442695, %v3493_v47 }
0x1146   :  { %v3439_v42 = vpop.f32.mrf.mxu1 }
0x1147   :  { %v3445_v29 = vadd.f32 %v3439_v42, %v3394_v36  ;;  %5250 = vtanh.f32 %v3494_v44  ;;  %v3495_v53 = vadd.f32 %v3488_v18, %v3444_v25  ;;  %v3538_v13 = vpop.permute.xlu0 %3537  ;;  %v4455_v36 = vmul.f32 -1.442695, %v3494_v44 }
0x1149   :  { %v3496_v20 = vadd.f32 %v3490_v62, %v3445_v29  ;;  %v4456_v31 = vmul.f32 -1.442695, %v3495_v53 }
0x114b   :  { %5252 = vtanh.f32 %v3496_v20  ;;  %v4457_v25 = vmul.f32 -1.442695, %v3496_v20 }
0x114c   :  { %5254 = vpow2.f32 %v4454_v50 }
0x114d   :  { %5256 = vpow2.f32 %v4456_v31 }
0x1154   :  { %v5251_v61 = vpop.eup %5250 }
0x1155   :  { %3545 = vrot.lane.b32.xlu1 %v5251_v61, %s5750_s29 }
0x1158   :  { %v5253_v46 = vpop.eup %5252 }
0x1159   :  { %3547 = vrot.lane.b32.xlu1 %v5253_v46, %s5750_s29  ;;  %v5255_v5 = vpop.eup %5254 }
0x115a   :  { %v3509_v55 = vadd.f32 1.0, %v5255_v5  ;;  %v5257_v26 = vpop.eup %5256 }
0x115b   :  { %v3511_v11 = vadd.f32 1.0, %v5257_v26 }
0x115c   :  { %5258 = vrcp.f32 %v3509_v55 }
0x115d   :  { %5260 = vrcp.f32 %v3511_v11 }
0x1169   :  { %v5259_v21 = vpop.eup %5258 }
0x116a   :  { %v5261_v22 = vpop.eup %5260  ;;  %v3541_v45 = vmul.f32 %v5259_v21, %v3536_v51 }
0x116b   :  { %v3542_v60 = vmul.f32 %v5261_v22, %v3538_v13  ;;  %v8631_v13 = vmax.f32 %v6483_v30, 0.0 }
0x11c7   :  { %v3546_v56 = vpop.permute.xlu1 %3545 }
0x11c8   :  { %v3551_v16 = vmul.f32 %v5259_v21, %v3546_v56 }
0x11ca   :  { %3555 = vrot.lane.b32.xlu1 %v3551_v16, %s5750_s29 }
0x11cb   :  { %v3548_v14 = vpop.permute.xlu1 %3547 }
0x11cc   :  { %v3552_v40 = vmul.f32 %v5261_v22, %v3548_v14 }
0x11ce   :  { %3557 = vrot.lane.b32.xlu1 %v3552_v40, %s5750_s29 }
0x123c   :  { %v3556_v32 = vpop.permute.xlu1 %3555 }
0x123d   :  { %v8004_v6 = vadd.f32 %v3556_v32, %v3541_v45 }
0x123f   :  { %5262 = vtanh.f32 %v8004_v6 }
0x1240   :  { %v3558_v41 = vpop.permute.xlu1 %3557 }
0x1241   :  { %v8007_v18 = vadd.f32 %v3558_v41, %v3542_v60 }
0x1243   :  { %5264 = vtanh.f32 %v8007_v18 }
0x1244   :  { %5266 = vpow2.f32 %v4455_v36 }
0x1245   :  { %5268 = vpow2.f32 %v4457_v25  ;;  %v8633_v25 = vmax.f32 %v6497_v43, 0.0  ;;  %v8635_v43 = vld [vmem:[#allocation81_spill] sm:$0xff] }
0x124c   :  { %v5263_v24 = vpop.eup %5262 }
0x124d   :  { %3567 = vrot.lane.b32.xlu0 %v5263_v24, %s5750_s29 }
0x1250   :  { %v5265_v3 = vpop.eup %5264 }
0x1251   :  { %3569 = vrot.lane.b32.xlu1 %v5265_v3, %s5750_s29  ;;  %v5267_v42 = vpop.eup %5266  ;;  %v8632_v3 = vmax.f32 %v6488_v35, 0.0  ;;  %v8634_v35 = vld [vmem:[#allocation80_spill] sm:$0xff] }
0x1252   :  { %v3510_v29 = vadd.f32 1.0, %v5267_v42  ;;  %v5269_v62 = vpop.eup %5268 }
0x1253   :  { %v3512_v61 = vadd.f32 1.0, %v5269_v62  ;;  %v8646_v62 = vld [vmem:[#allocation48_spill] sm:$0xff] }
0x1254   :  { %5270 = vrcp.f32 %v3510_v29  ;;  %v8645_v29 = vld [vmem:[#allocation47_spill] sm:$0xff] }
0x1255   :  { %5272 = vrcp.f32 %v3512_v61  ;;  %v8647_v61 = vld [vmem:[#allocation49_spill] sm:$0xff] }
0x1261   :  { %v5271_v46 = vpop.eup %5270 }
0x1262   :  { %v5273_v53 = vpop.eup %5272 }
0x12bf   :  { %v3568_v47 = vpop.permute.xlu0 %3567 }
0x12c0   :  { %v3573_v50 = vmul.f32 %v5271_v46, %v3568_v47  ;;  %v8648_v46 = vld [vmem:[#allocation50_spill] sm:$0xff]  ;;  %v8649_v47 = vld [vmem:[#allocation51_spill] sm:$0xff] }
0x12c2   :  { %3587 = vrot.lane.b32.xlu0 %v3573_v50, %s5760_s5 }
0x12c3   :  { %v3570_v31 = vpop.permute.xlu1 %3569 }
0x12c4   :  { %v3574_v5 = vmul.f32 %v5273_v53, %v3570_v31  ;;  %v8651_v53 = vld [vmem:[#allocation53_spill] sm:$0xff]  ;;  %v8652_v31 = vld [vmem:[#allocation54_spill] sm:$0xff] }
0x12c6   :  { %3589 = vrot.lane.b32.xlu1 %v3574_v5, %s5760_s5 }
0x1334   :  { %v3588_v44 = vpop.permute.xlu0 %3587 }
0x1335   :  { %v3593_v55 = vadd.f32 %v3588_v44, %v3573_v50  ;;  %v8650_v50 = vld [vmem:[#allocation52_spill] sm:$0xff] }
0x1336   :  { %v8654_v44 = vld [vmem:[#allocation56_spill] sm:$0xff] }
0x1337   :  { %v8014_v20 = vmul.f32 0.5, %v3593_v55  ;;  %v8655_v55 = vld [vmem:[#allocation57_spill] sm:$0xff] }
0x1338   :  { %v3590_v26 = vpop.permute.xlu1 %3589 }
0x1339   :  { %v3594_v11 = vadd.f32 %v3590_v26, %v3574_v5  ;;  %4458 = vmatmul.mubr.msk.f32.vlgmr.msra.gmra.mxu1 %vm1444_vm0, %v8014_v20  ;;  %v8653_v5 = vld [vmem:[#allocation55_spill] sm:$0xff] }
0x133a   :  { %3675 = vmatprep.mubr.f32.mxu1 %v8467_v39  ;;  %3826 = vmatpush1.msra.mxu1 %v7385_v58 }
0x133b   :  { %v8020_v21 = vmul.f32 0.5, %v3594_v11  ;;  %3827 = vmatprep.subr.mxu1 %v7396_v63 }
0x133c   :  { %3828 = vmatpush1.msra.mxu1 %v7402_v38  ;;  %v8630_v38 = vmax.f32 %v6481_v23, 0.0 }
0x133d   :  { %4459 = vmatmul.mubr.msk.f32.gmra.mxu1 %vm1444_vm0, %v8020_v21  ;;  %3902 = vmatprep.subr.mxu1 %v7412_v37 }
0x133e   :  { %3861 = vmatprep.mubr.f32.mxu1 %v8467_v39 }
0x13f9   :  { %v3671_v56 = vpop.f32.mrf.mxu1 }
0x13fa   :  { %v3672_v16 = vadd.f32 %v3671_v56, %v7244_v27 }
0x13fb   :  { %v3673_v22 = vpop.f32.mrf.mxu1 }
0x13fc   :  { %v3682_v14 = vmax.f32 %v3672_v16, 0.0  ;;  %v3674_v58 = vadd.f32 %v3673_v22, %v7247_v9 }
0x13fd   :  { %v3677_v40 = vpop.f32.mrf.mxu1 }
0x13fe   :  { %v3683_v51 = vmax.f32 %v3674_v58, 0.0  ;;  %v3678_v63 = vadd.f32 %v3677_v40, %v7244_v27  ;;  %v3686_v45 = vadd.f32 %v3682_v14, %v8630_v38 }
0x13ff   :  { %v3679_v32 = vpop.f32.mrf.mxu1 }
0x1400   :  { %v3687_v37 = vadd.f32 %v3683_v51, %v8631_v13  ;;  %v3684_v60 = vmax.f32 %v3678_v63, 0.0  ;;  %v3680_v41 = vadd.f32 %v3679_v32, %v7247_v9 }
0x1402   :  { %5274 = vtanh.f32 %v3687_v37  ;;  %v3685_v24 = vmax.f32 %v3680_v41, 0.0  ;;  %v3688_v36 = vadd.f32 %v3684_v60, %v8632_v3 }
0x1403   :  { %5276 = vtanh.f32 %v3686_v45 }
0x1404   :  { %v3689_v42 = vadd.f32 %v3685_v24, %v8633_v25 }
0x1406   :  { %5278 = vtanh.f32 %v3689_v42 }
0x1407   :  { %5280 = vtanh.f32 %v3688_v36 }
0x140f   :  { %v5275_v23 = vpop.eup %5274 }
0x1410   :  { %v5277_v27 = vpop.eup %5276  ;;  %3758 = vmatprep.mubr.f32.mxu0 %v5275_v23 }
0x1411   :  { %3759 = vmatmul.mubr.f32.vlgmr.msra.gmra.mxu0 %v5277_v27  ;;  %v8656_v27 = vld [vmem:[#allocation58_spill] sm:$0xff] }
0x1412   :  { %4887 = vmatpush3.msra.mxu0 %v7515_v17  ;;  %v8636_v17 = vld [vmem:[#allocation82_spill] sm:$0xff] }
0x1413   :  { %v5279_v30 = vpop.eup %5278  ;;  %4888 = vmatprep.subr.mxu0 %v7521_v28  ;;  %v8637_v28 = vld [vmem:[#allocation83_spill] sm:$0xff] }
0x1414   :  { %v5281_v9 = vpop.eup %5280  ;;  %3763 = vmatprep.mubr.f32.mxu0 %v5279_v30  ;;  %4889 = vmatpush3.msra.mxu0 %v7527_v57  ;;  %v8638_v57 = vld [vmem:[#allocation84_spill] sm:$0xff] }
0x1415   :  { %3764 = vmatmul.mubr.f32.gmra.mxu0 %v5281_v9  ;;  %4890 = vmatprep.subr.mxu0 %v7533_v7  ;;  %v8639_v7 = vld [vmem:[#allocation85_spill] sm:$0xff]  ;;  %v8657_v9 = vld [vmem:[#allocation59_spill] sm:$0xff] }
0x1416   :  { %4891 = vmatpush3.msra.mxu0 %v7539_v48  ;;  %v8640_v48 = vld [vmem:[#allocation86_spill] sm:$0xff] }
0x1417   :  { %4892 = vmatprep.subr.mxu0 %v7545_v59  ;;  %v8641_v59 = vld [vmem:[#allocation87_spill] sm:$0xff] }
0x1418   :  { %4893 = vmatpush3.msra.mxu0 %v7551_v1  ;;  %v8642_v1 = vld [vmem:[#allocation88_spill] sm:$0xff] }
0x1419   :  { %4894 = vmatprep.subr.mxu0 %v7557_v33  ;;  %v8643_v33 = vld [vmem:[#allocation45_spill] sm:$0xff] }
0x141a   :  { %4895 = vmatpush3.msra.mxu0 %v7563_v52  ;;  %v8644_v52 = vld [vmem:[#allocation46_spill] sm:$0xff] }
0x141b   :  { %4896 = vmatprep.subr.mxu0 %v8634_v35  ;;  %v8658_v35 = vld [vmem:[#allocation60_spill] sm:$0xff] }
0x141c   :  { %4897 = vmatpush3.msra.mxu0 %v8635_v43  ;;  %v8659_v43 = vld [vmem:[#allocation61_spill] sm:$0xff] }
0x141d   :  { %4898 = vmatprep.subr.mxu0 %v8636_v17  ;;  %v8660_v17 = vld [vmem:[#allocation62_spill] sm:$0xff] }
0x141e   :  { %4899 = vmatpush3.msra.mxu0 %v8637_v28  ;;  %v8661_v28 = vld [vmem:[#allocation63_spill] sm:$0xff] }
0x141f   :  { %4900 = vmatprep.subr.mxu0 %v8638_v57  ;;  %v8662_v57 = vld [vmem:[#allocation64_spill] sm:$0xff] }
0x1420   :  { %4901 = vmatpush3.msra.mxu0 %v8639_v7  ;;  %v8663_v7 = vld [vmem:[#allocation65_spill] sm:$0xff] }
0x1421   :  { %4902 = vmatprep.subr.mxu0 %v8640_v48  ;;  %v8664_v48 = vld [vmem:[#allocation66_spill] sm:$0xff] }
0x1422   :  { %4903 = vmatpush3.msra.mxu0 %v8641_v59  ;;  %v8665_v59 = vld [vmem:[#allocation67_spill] sm:$0xff] }
0x1423   :  { %4904 = vmatprep.subr.mxu0 %v8642_v1  ;;  %v8666_v1 = vld [vmem:[#allocation68_spill] sm:$0xff] }
0x1424   :  { %4905 = vmatpush3.msra.mxu0 %v8643_v33  ;;  %v8667_v33 = vld [vmem:[#allocation69_spill] sm:$0xff] }
0x1425   :  { %4906 = vmatprep.subr.mxu0 %v8644_v52  ;;  %v8668_v52 = vld [vmem:[#allocation70_spill] sm:$0xff] }
0x1426   :  { %4907 = vmatpush3.msra.mxu0 %v8645_v29  ;;  %v8669_v29 = vld [vmem:[#allocation71_spill] sm:$0xff] }
0x1427   :  { %4908 = vmatprep.subr.mxu0 %v8646_v62  ;;  %v8670_v62 = vld [vmem:[#allocation72_spill] sm:$0xff] }
0x1428   :  { %4909 = vmatpush3.msra.mxu0 %v8647_v61  ;;  %v8671_v61 = vld [vmem:[#allocation73_spill] sm:$0xff] }
0x1429   :  { %4910 = vmatprep.subr.mxu0 %v8648_v46  ;;  %v8672_v46 = vld [vmem:[#allocation74_spill] sm:$0xff] }
0x142a   :  { %4911 = vmatpush3.msra.mxu0 %v8649_v47  ;;  %v8673_v47 = vld [vmem:[#allocation75_spill] sm:$0xff] }
0x142b   :  { %4912 = vmatprep.subr.mxu0 %v8650_v50  ;;  %v8674_v50 = vld [vmem:[#allocation76_spill] sm:$0xff] }
0x142c   :  { %4913 = vmatpush3.msra.mxu0 %v8651_v53  ;;  %v8675_v53 = vld [vmem:[#allocation77_spill] sm:$0xff] }
0x142d   :  { %4914 = vmatprep.subr.mxu0 %v8652_v31  ;;  %v8676_v31 = vld [vmem:[#allocation78_spill] sm:$0xff] }
0x142e   :  { %4915 = vmatpush3.msra.mxu0 %v8653_v5  ;;  %v8677_v5 = vld [vmem:[#allocation79_spill] sm:$0xff] }
0x142f   :  { %4916 = vmatprep.subr.mxu0 %v8654_v44  ;;  %v8678_v44 = vld [vmem:[#allocation89_spill] sm:$0xff] }
0x1430   :  { %4917 = vmatpush3.msra.mxu0 %v8655_v55  ;;  %v8679_v55 = vld [vmem:[#allocation90_spill] sm:$0xff] }
0x14d1   :  { %v4842_v26 = vpop.f32.mrf.mxu0 }
0x14d3   :  { %v4843_v11 = vpop.f32.mrf.mxu0 }
0x14d4   :  { %v4844_v56 = vadd.f32 %v4843_v11, %v4842_v26  ;;  %v8680_v26 = vld [vmem:[#allocation91_spill] sm:$0xff]  ;;  %v8681_v11 = vld [vmem:[#allocation92_spill] sm:$0xff] }
0x14d5   :  { %v4845_v16 = vpop.f32.mrf.mxu0 }
0x14d6   :  { %v3769_v22 = vsel %vm1676_vm1, %v4844_v56, -inf }
0x14d7   :  { %3770 = vmax.xlane.f32.xlu0 %v3769_v22  ;;  %v4846_v14 = vpop.f32.mrf.mxu0  ;;  %v8684_v22 = vld [vmem:[#allocation95_spill] sm:$0xff] }
0x14d8   :  { %v4847_v58 = vadd.f32 %v4846_v14, %v4845_v16  ;;  %v8683_v16 = vld [vmem:[#allocation94_spill] sm:$0xff]  ;;  %v8685_v14 = vld [vmem:[#allocation96_spill] sm:$0xff] }
0x14da   :  { %v3772_v40 = vsel %vm1676_vm1, %v4847_v58, -inf }
0x14db   :  { %3773 = vmax.xlane.f32.xlu1 %v3772_v40  ;;  %v8687_v40 = vld [vmem:[#allocation37_spill] sm:$0xff] }
0x1560   :  { %v3771_v51 = vpop.xlane.xlu0 %3770 }
0x1561   :  { %v3775_v63 = vsub.f32 %v4844_v56, %v3771_v51  ;;  %v8682_v56 = vld [vmem:[#allocation93_spill] sm:$0xff]  ;;  %v8688_v51 = vld [vmem:[#allocation38_spill] sm:$0xff] }
0x1563   :  { %v3777_v38 = vmul.f32 1.442695, %v3775_v63  ;;  %v8689_v63 = vld [vmem:[#allocation39_spill] sm:$0xff] }
0x1564   :  { %v3774_v45 = vpop.xlane.xlu1 %3773 }
0x1565   :  { %5282 = vpow2.f32 %v3777_v38  ;;  %v3776_v32 = vsub.f32 %v4847_v58, %v3774_v45  ;;  %v8686_v58 = vld [vmem:[#allocation36_spill] sm:$0xff] }
0x1566   :  { %v8690_v38 = vld [vmem:[#allocation40_spill] sm:$0xff] }
0x1567   :  { %v3779_v13 = vmul.f32 1.442695, %v3776_v32 }
0x1569   :  { %5284 = vpow2.f32 %v3779_v13 }
0x1572   :  { %v5283_v37 = vpop.eup %5282 }
0x1573   :  { %v3781_v60 = vsel %vm1676_vm1, %v5283_v37, 0.0 }
0x1574   :  { %3782 = vadd.xlane.f32.xlu0 %v3781_v60 }
0x1576   :  { %v5285_v41 = vpop.eup %5284 }
0x1577   :  { %v3784_v24 = vsel %vm1676_vm1, %v5285_v41, 0.0 }
0x1578   :  { %3785 = vadd.xlane.f32.xlu0 %v3784_v24 }
0x15fd   :  { %v3783_v3 = vpop.xlane.xlu0 %3782 }
0x15fe   :  { %5286 = vrcp.f32 %v3783_v3 }
0x1601   :  { %v3786_v36 = vpop.xlane.xlu0 %3785 }
0x1602   :  { %5288 = vrcp.f32 %v3786_v36 }
0x160b   :  { %v5287_v25 = vpop.eup %5286 }
0x160c   :  { %v3789_v42 = vmul.f32 %v5287_v25, %v5283_v37 }
0x160e   :  { %4460 = vmatmul.mubr.msk.f32.vlgmr.msra.gmra.mxu1 %vm1676_vm1, %v3789_v42 }
0x160f   :  { %v5289_v23 = vpop.eup %5288  ;;  %3903 = vmatpush1.msra.mxu1 %v8656_v27  ;;  %3867 = vmatprep.mubr.f32.mxu1 %v8467_v39 }
0x1610   :  { %v3790_v30 = vmul.f32 %v5289_v23, %v5285_v41  ;;  %3904 = vmatprep.subr.mxu1 %v8657_v9 }
0x1611   :  { %3905 = vmatpush1.msra.mxu1 %v8658_v35 }
0x1612   :  { %4461 = vmatmul.mubr.msk.f32.gmra.mxu1 %vm1676_vm1, %v3790_v30  ;;  %4848 = vmatprep.subr.mxu1 %v8659_v43 }
0x1613   :  { %3938 = vmatprep.mubr.f32.mxu1 %v8467_v39 }
0x1616   :  { %4462 = vmatmul.mubr.msk.f32.vlgmr.msra.gmra.mxu1 %vm1676_vm1, %v3789_v42 }
0x1617   :  { %3944 = vmatprep.mubr.f32.mxu1 %v8467_v39  ;;  %4849 = vmatpush3.msra.mxu1 %v8660_v17 }
0x1618   :  { %4850 = vmatprep.subr.mxu1 %v8661_v28 }
0x1619   :  { %4851 = vmatpush3.msra.mxu1 %v8662_v57 }
0x161a   :  { %4463 = vmatmul.mubr.msk.f32.gmra.mxu1 %vm1676_vm1, %v3790_v30  ;;  %4852 = vmatprep.subr.mxu1 %v8663_v7 }
0x161b   :  { %4853 = vmatpush3.msra.mxu1 %v8664_v48 }
0x161c   :  { %4854 = vmatprep.subr.mxu1 %v8665_v59  ;;  %v8691_v59 = vld [vmem:[#allocation41_spill] sm:$0xff] }
0x161d   :  { %4855 = vmatpush3.msra.mxu1 %v8666_v1 }
0x161e   :  { %4856 = vmatprep.subr.mxu1 %v8667_v33 }
0x161f   :  { %4857 = vmatpush3.msra.mxu1 %v8668_v52 }
0x1620   :  { %4858 = vmatprep.subr.mxu1 %v8669_v29 }
0x1621   :  { %4859 = vmatpush3.msra.mxu1 %v8670_v62 }
0x1622   :  { %4860 = vmatprep.subr.mxu1 %v8671_v61 }
0x1623   :  { %4861 = vmatpush3.msra.mxu1 %v8672_v46 }
0x1624   :  { %4862 = vmatprep.subr.mxu1 %v8673_v47 }
0x1625   :  { %4863 = vmatpush3.msra.mxu1 %v8674_v50 }
0x1626   :  { %4864 = vmatprep.subr.mxu1 %v8675_v53 }
0x1627   :  { %4865 = vmatpush3.msra.mxu1 %v8676_v31  ;;  %v4464_v31 = vld [vmem:[%s8213_s22] ss:$0 sm:$0xff]  ;;  %s5764_s22 = smov [#allocation22]  }
0x1628   :  { %4866 = vmatprep.subr.mxu1 %v8677_v5 }
0x1629   :  { %4867 = vmatpush3.msra.mxu1 %v8678_v44 }
0x162a   :  { %4868 = vmatprep.subr.mxu1 %v8679_v55 }
0x162b   :  { %4869 = vmatpush3.msra.mxu1 %v8680_v26 }
0x162c   :  { %4870 = vmatprep.subr.mxu1 %v8681_v11 }
0x162d   :  { %4871 = vmatpush3.msra.mxu1 %v8682_v56 }
0x162e   :  { %4872 = vmatprep.subr.mxu1 %v8683_v16 }
0x162f   :  { %4873 = vmatpush3.msra.mxu1 %v8684_v22 }
0x1630   :  { %4874 = vmatprep.subr.mxu1 %v8685_v14 }
0x1631   :  { %4875 = vmatpush3.msra.mxu1 %v8686_v58 }
0x1632   :  { %4876 = vmatprep.subr.mxu1 %v8687_v40 }
0x1633   :  { %4877 = vmatpush3.msra.mxu1 %v8688_v51 }
0x1634   :  { %4878 = vmatprep.subr.mxu1 %v8689_v63 }
0x1635   :  { %4879 = vmatpush3.msra.mxu1 %v8690_v38 }
0x1636   :  { %4927 = vmatprep.subr.bf16.mxu1 %v8467_v39 }
0x16ce   :  { %v3863_v45 = vpop.f32.mrf.mxu1 }
0x16cf   :  { %v3951_v37 = vmul.f32 %v3863_v45, %v8532_v2 }
0x16d0   :  { %v3865_v32 = vpop.f32.mrf.mxu1 }
0x16d1   :  { %v3952_v13 = vmul.f32 %v3865_v32, %v8531_v0 }
0x16d2   :  { %v3869_v60 = vpop.f32.mrf.mxu1 }
0x16d3   :  { %4023 = vmatprep.mubr.f32.mxu1 %v3952_v13  ;;  %v3955_v3 = vmul.f32 %v3869_v60, %v8534_v8  ;;  %v5177_v8 = vld [vmem:[%s8212_s21] sm:$0xff]  }
0x16d4   :  { %v3871_v41 = vpop.f32.mrf.mxu1  ;;  %4024 = vmatmul.mubr.f32.vlgmr.msra.gmra.mxu1 %v3951_v37 }
0x16d5   :  { %v3956_v24 = vmul.f32 %v3871_v41, %v8533_v49  ;;  %v5176_v49 = vld [vmem:[%s8212_s21 + $0x8] sm:$0xff]  }
0x16d6   :  { %v3940_v36 = vpop.f32.mrf.mxu1  ;;  %4928 = vmatpush3.bf16.msra.mxu1 %v5176_v49 }
0x16d7   :  { %4028 = vmatprep.mubr.f32.mxu1 %v3956_v24  ;;  %v3953_v23 = vmul.f32 %v3940_v36, %v8536_v34  ;;  %4929 = vmatprep.subr.bf16.mxu1 %v8467_v39 }
0x16d8   :  { %v3942_v25 = vpop.f32.mrf.mxu1  ;;  %4029 = vmatmul.mubr.f32.gmra.mxu1 %v3955_v3 }
0x16d9   :  { %v3954_v42 = vmul.f32 %v3942_v25, %v8535_v19  ;;  %4931 = vmatprep.mubr.msk.bf16.mxu1 %vm5763_vm2, %v8467_v39 }
0x16da   :  { %v3946_v27 = vpop.f32.mrf.mxu1  ;;  %4930 = vmatpush3.bf16.msra.mxu1 %v5177_v8 }
0x16db   :  { %4098 = vmatprep.mubr.f32.mxu0 %v3954_v42  ;;  %v3957_v30 = vmul.f32 %v3946_v27, %v8538_v54 }
0x16dc   :  { %v3948_v0 = vpop.f32.mrf.mxu1  ;;  %4099 = vmatmul.mubr.f32.vlgmr.msra.gmra.mxu0 %v3953_v23 }
0x16dd   :  { %v3958_v2 = vmul.f32 %v3948_v0, %v8537_v4 }
0x16df   :  { %4103 = vmatprep.mubr.f32.mxu0 %v3958_v2 }
0x16e0   :  { %4104 = vmatmul.mubr.f32.gmra.mxu0 %v3957_v30 }
0x1794   :  { %v4880_v19 = vpop.f32.mrf.mxu1 }
0x1796   :  { %v4881_v34 = vpop.f32.mrf.mxu1 }
0x1797   :  { %v4882_v35 = vadd.f32 %v4881_v34, %v4880_v19 }
0x1798   :  { %v4883_v4 = vpop.f32.mrf.mxu1 }
0x179a   :  { %v4884_v17 = vpop.f32.mrf.mxu1 }
0x179b   :  { %v4885_v48 = vadd.f32 %v4884_v17, %v4883_v4 }
0x179c   :  { %v4918_v54 = vpop.f32.mrf.mxu0 }
0x179e   :  { %v4919_v9 = vpop.f32.mrf.mxu0 }
0x179f   :  { %v4920_v43 = vadd.f32 %v4919_v9, %v4918_v54 }
0x17a0   :  { %v4921_v28 = vpop.f32.mrf.mxu0 }
0x17a1   :  { %v4101_v57 = vadd.f32 %v4920_v43, %v4882_v35 }
0x17a2   :  { %v4922_v7 = vpop.f32.mrf.mxu0 }
0x17a3   :  { %v4109_v1 = vmul.f32 %v8691_v59, %v4101_v57  ;;  %v4923_v33 = vadd.f32 %v4922_v7, %v4921_v28 }
0x17a5   :  { %v4111_v52 = vadd.f32 %v7930_v10, %v4109_v1  ;;  %v4106_v29 = vadd.f32 %v4923_v33, %v4885_v48 }
0x17a7   :  { %v4110_v39 = vmul.f32 %v8691_v59, %v4106_v29  ;;  %v4113_v62 = vmax.f32 %v4111_v52, 0.0 }
0x17a9   :  { %v4112_v61 = vadd.f32 %v7930_v10, %v4110_v39  ;;  %v4115_v47 = vadd.f32 %v4113_v62, %v8014_v20  ;;  %v8692_v20 = vld [vmem:[#allocation99_spill] sm:$0xff] }
0x17ab   :  { %v4114_v46 = vmax.f32 %v4112_v61, 0.0 }
0x17ad   :  { %v4116_v50 = vadd.f32 %v4114_v46, %v8020_v21  ;;  %v8693_v21 = vld [vmem:[#allocation100_spill] sm:$0xff] }
0x17af   :  { %v4151_v53 = vpack.c.bf16 %v4116_v50, %v4115_v47 }
0x17b1   :  { %4932 = vmatmul.mubr.msk.bf16.vlgmr.msra.gmra.mxu1 %vm1444_vm0, %v4151_v53 }
0x1871   :  { %v4207_v5 = vpop.f32.mrf.mxu1 }
0x1872   :  { %v8144_v44 = vadd.f32 %v4464_v31, %v4207_v5 }
0x1873   :  { %v4933_v55 = vpop.f32.mrf.mxu1 }
0x1874   :  { %4214 = vmax.xlane.f32.xlu1 %v8144_v44 }
0x1875   :  { %v4210_v26 = vpop.f32.mrf.mxu1 }
0x1876   :  { %v4211_v10 = vadd.f32 %v4464_v31, %v4210_v26 }
0x1877   :  { %v4934_v11 = vpop.f32.mrf.mxu1 }
0x1878   :  { %4216 = vmax.xlane.f32.xlu0 %v4211_v10 }
0x1885   :  { %2266 = vrot.lane.b32.xlu1 %v8692_v20, %s5760_s5 }
0x1889   :  { %3577 = vrot.lane.b32.xlu1 %v8004_v6, %s5760_s5 }
0x188e   :  { %2268 = vrot.lane.b32.xlu0 %v8693_v21, %s5760_s5 }
0x1892   :  { %3579 = vrot.lane.b32.xlu0 %v8007_v18, %s5760_s5 }
0x1896   :  { %4127 = vrot.lane.b32.xlu0 %v7948_v12, %s5755_s2 }
0x18fd   :  { %v8157_v56 = vpop.xlane.xlu1 %4214 }
0x18fe   :  { %v4218_v32 = vsub.f32 %v8144_v44, %v8157_v56 }
0x1900   :  { %v4220_v13 = vmul.f32 1.442695, %v4218_v32 }
0x1901   :  { %v2267_v16 = vpop.permute.xlu1 %2266  ;;  %v4217_v22 = vpop.xlane.xlu0 %4216 }
0x1902   :  { %v2272_v14 = vadd.f32 %v2267_v16, %v8692_v20  ;;  %v4219_v58 = vsub.f32 %v4211_v10, %v4217_v22 }
0x1904   :  { %v2284_v40 = vmul.f32 0.5, %v2272_v14  ;;  %v4222_v51 = vmul.f32 1.442695, %v4219_v58 }
0x1905   :  { %v2269_v63 = vpop.permute.xlu0 %2268  ;;  %v3578_v41 = vpop.permute.xlu1 %3577 }
0x1906   :  { %5290 = vpow2.f32 %v4222_v51  ;;  %v2273_v38 = vadd.f32 %v2269_v63, %v8693_v21  ;;  %4119 = vrot.lane.b32.xlu1 %v2284_v40, %s5750_s29  ;;  %v3583_v3 = vadd.f32 %v3578_v41, %v8004_v6 }
0x1907   :  { %5292 = vpow2.f32 %v4220_v13 }
0x1908   :  { %v2285_v45 = vmul.f32 0.5, %v2273_v38  ;;  %v3595_v42 = vmul.f32 0.5, %v3583_v3 }
0x1909   :  { %v3580_v60 = vpop.permute.xlu0 %3579 }
0x190a   :  { %4121 = vrot.lane.b32.xlu1 %v2285_v45, %s5750_s29  ;;  %v3584_v34 = vadd.f32 %v3580_v60, %v8007_v18  ;;  %s4243_s29 = sshll.u32 %s5764_s22, 4  ;;  %s4244_s29 = int_to_ptr.vmem [resolvable:$true] %s4243_s29 }
0x190b   :  { %p5687_p5 = scmp.lt.s32.totalorder %s4244_s29, %s4244_s29 }
0x190c   :  { %v3596_v9 = vmul.f32 0.5, %v3584_v34 }
0x190d   :  { %v4128_v24 = vpop.permute.xlu0 %4127 }
0x190e   :  { %4129 = vrot.lane.b32.xlu1 %v7943_v15, %s5755_s2  ;;  %s5682_s2 = scalar_lea.vmem %s4244_s29, 256 }
0x190f   :  { %p5683_p4 = scmp.ne.s32.totalorder %s4244_s29, %s5682_s2  ;;  %p5688_p6 = scmp.lt.s32.totalorder %s5682_s2, %s5682_s2 }
0x1911   :  { %p5689_p7 = por %p5688_p6, %p5687_p5 }
0x1913   :  { %v5291_v12 = vpop.eup %5290  ;;  %p5690_p8 = pnand %p5689_p7, %p5683_p4 }
0x1914   :  { %4226 = vadd.xlane.f32.xlu0 %v5291_v12  ;;  %v5293_v37 = vpop.eup %5292 }
0x192a   :  { %4135 = vrot.lane.b32.xlu0 %v4115_v47, %s5760_s5 }
0x1932   :  { %4224 = vadd.xlane.f32.xlu1 %v5293_v37 }
0x1943   :  { %4137 = vrot.lane.b32.xlu1 %v4116_v50, %s5760_s5 }
0x1978   :  { %v4120_v36 = vpop.permute.xlu1 %4119 }
0x1979   :  { %v4141_v25 = vsel %vm1444_vm0, %v4120_v36, %v4128_v24 }
0x197a   :  { %v4144_v23 = vsel %vm4143_vm3, %v4141_v25, %v3595_v42 }
0x197c   :  { %v4122_v19 = vpop.permute.xlu1 %4121 }
0x1980   :  { %v4130_v6 = vpop.permute.xlu1 %4129 }
0x1981   :  { %v4142_v54 = vsel %vm1444_vm0, %v4122_v19, %v4130_v6 }
0x1982   :  { %v4145_v43 = vsel %vm4143_vm3, %v4142_v54, %v3596_v9 }
0x199d   :  { %v4227_v15 = vpop.xlane.xlu0 %4226 }
0x199e   :  { %5294 = vlog2.f32 %v4227_v15 }
0x19a1   :  { %v4136_v27 = vpop.permute.xlu0 %4135 }
0x19a2   :  { %v4147_v0 = vsel %vm4146_vm4, %v4144_v23, %v4136_v27 }
0x19a3   :  { %4149 = vst [vmem:[#allocation22] sm:$0xff] %v4147_v0 }
0x19ab   :  { %v5295_v2 = vpop.eup %5294 }
0x19ac   :  { %v4231_v30 = vmul.f32 0.6931472, %v5295_v2 }
0x19ae   :  { %v4233_v49 = vadd.f32 %v4231_v30, %v4217_v22 }
0x19b0   :  { %v4235_v8 = vsub.f32 %v4211_v10, %v4233_v49 }
0x19b2   :  { %4237 = vst [vmem:[#allocation23 + $0x8] sm:$0xff] %v4235_v8 }
0x19bb   :  { %v4225_v4 = vpop.xlane.xlu1 %4224 }
0x19bc   :  { %5296 = vlog2.f32 %v4225_v4 }
0x19bf   :  { %v4138_v35 = vpop.permute.xlu1 %4137 }
0x19c0   :  { %v4148_v17 = vsel %vm4146_vm4, %v4145_v43, %v4138_v35 }
0x19c1   :  { %4150 = vst [vmem:[#allocation22 + $0x8] sm:$0xff] %v4148_v17 }
0x19c2   :  { %5693 = shalt.err (!%p5690_p8)
}
0x19c3   :  { %4249 = dma.vmem_to_hbm [thread:$0]  %s4244_s29, 256, %s8214_s23, [#allocation4], %s5748_s25, %s5748_s25, %s5749_s27  }
0x19c4   :  { %s5765_s14 = smov [#allocation23]  }
0x19c5   :  { %s4255_s26 = sshll.u32 %s5765_s14, 4  ;;  %s4256_s26 = int_to_ptr.vmem [resolvable:$true] %s4255_s26 }
0x19c6   :  { %s5702_s18 = scalar_lea.vmem %s4256_s26, 256  ;;  %p5707_p10 = scmp.lt.s32.totalorder %s4256_s26, %s4256_s26 }
0x19c7   :  { %p5703_p9 = scmp.ne.s32.totalorder %s4256_s26, %s5702_s18  ;;  %p5708_p11 = scmp.lt.s32.totalorder %s5702_s18, %s5702_s18 }
0x19c9   :  { %v5297_v18 = vpop.eup %5296  ;;  %p5709_p12 = por %p5708_p11, %p5707_p10 }
0x19ca   :  { %v4229_v28 = vmul.f32 0.6931472, %v5297_v18 }
0x19cb   :  { %p5710_p13 = pnand %p5709_p12, %p5703_p9 }
0x19cc   :  { %v4232_v57 = vadd.f32 %v4229_v28, %v8157_v56 }
0x19ce   :  { %v4234_v7 = vsub.f32 %v8144_v44, %v4232_v57 }
0x19d0   :  { %4236 = vst [vmem:[#allocation23] sm:$0xff] %v4234_v7 }
0x19d1   :  { %5713 = shalt.err (!%p5710_p13)
}
0x19d2   :  { %4261 = dma.vmem_to_hbm [thread:$0]  %s4256_s26, 256, %s8215_s24, [#allocation24], %s5748_s25, %s5748_s25, %s5749_s27  }
0x19d3   :  { %5736 = dma.done.wait [#allocation4], 256  }
0x19d4   :  { %5737 = vsyncadd [#allocation4], 4294967040 }
0x19d5   :  { %5738 = dma.done.wait [#allocation24], 256  }
0x19d6   :  { %5739 = vsyncadd [#allocation24], 4294967040 }
0x19d7   :  { %4268 = vsyncpa [#allocation3], 1 }
0x19d8   :  { %4269 = vsyncpa [#allocation6], 1 }
0x19d9   :  { %4270 = vsyncpa [#allocation9], 1 }
0x19da   :  { %4271 = vsyncpa [#allocation12], 1 }
0x19db   :  { %4272 = vsyncpa [#allocation15], 1 }
0x19dc   :  { %4273 = vsyncpa [#allocation18], 1 }
0x19dd   :  { %4274 = vsyncpa [#allocation21], 1 }
0x19de   :  { %4275 = vsyncpa [#allocation4], 1 }
0x19df   :  { %4276 = vsyncpa [#allocation24], 1 }

</bundles_post_ra>
